<compile_context>
chip_gen: v6e
topology: v6e:2x2x1
jax: 0.10.0
libtpu: 0.0.40
codegen_flags: <defaults>
</compile_context>

<pallas_src>
import math
from functools import partial

import jax
import jax.numpy as jnp
from jax import lax
from jax.experimental import pallas as pl
from jax.experimental.pallas import tpu as pltpu


def _flash_attn_kernel(q_ref, k_ref, v_ref, mask_ref, o_ref, m_sc, l_sc, qb_sc):
    # Block views:
    #   q_ref:    (1, 1, tq, D)  f32   (resident across ki)
    #   k_ref:    (1, 1, tk, D)  f32
    #   v_ref:    (1, 1, tk, D)  f32
    #   mask_ref: (1, tq, S)     bf16/f32 (resident across h and ki)
    #   o_ref:    (1, 1, tq, D)  f32   (resident across ki -> accumulator)
    ki = pl.program_id(3)
    tk = k_ref.shape[2]
    d = q_ref.shape[-1]

    @pl.when(ki == 0)
    def _():
        m_sc[...] = jnp.full(m_sc.shape, -jnp.inf, m_sc.dtype)
        l_sc[...] = jnp.zeros(l_sc.shape, l_sc.dtype)
        o_ref[...] = jnp.zeros(o_ref.shape, o_ref.dtype)
        # Hoisted out of the KV loop: scale + bf16 cast of the resident Q tile.
        scale = 1.0 / math.sqrt(d)
        qb_sc[...] = (q_ref[0, 0] * scale).astype(jnp.bfloat16)

    q_b = qb_sc[...]                                  # (tq, D) bf16
    k_b = k_ref[0, 0].astype(jnp.bfloat16)            # (tk, D) bf16
    v_b = v_ref[0, 0].astype(jnp.bfloat16)            # (tk, D) bf16

    # Slice the current KV window out of the resident full-S mask row.
    start = pl.multiple_of(ki * tk, tk)
    m = mask_ref[0, :, pl.ds(start, tk)].astype(jnp.float32)   # (tq, tk) f32

    # QK^T without an explicit transpose: contract last dim of both operands.
    s = lax.dot_general(
        q_b, k_b,
        dimension_numbers=(((1,), (1,)), ((), ())),
        preferred_element_type=jnp.float32,
    ) + m                                             # (tq, tk) f32

    # Online (streaming) softmax update, all f32.
    m_prev = m_sc[...]                                # (tq, 1)
    m_new = jnp.maximum(m_prev, jnp.max(s, axis=-1, keepdims=True))
    alpha = jnp.exp(m_prev - m_new)                   # rescale of previous state
    p = jnp.exp(s - m_new)                            # unnormalized probs, f32

    l_sc[...] = alpha * l_sc[...] + jnp.sum(p, axis=-1, keepdims=True)
    o_ref[0, 0] = alpha * o_ref[0, 0] + jnp.dot(
        p.astype(jnp.bfloat16), v_b, preferred_element_type=jnp.float32
    )
    m_sc[...] = m_new

    # Deferred normalization: one (tq, D) multiply using the EUP reciprocal.
    @pl.when(ki == pl.num_programs(3) - 1)
    def _():
        o_ref[0, 0] = o_ref[0, 0] * pl.reciprocal(l_sc[...], approx=True)


def sdpa_pallas(q, k, v, mask, *, tq=256, tk=256):
    """q, k, v: (B, H, S, D); mask: (B, S, S), broadcast over H.  Returns (B,H,S,D) f32."""
    B, H, S, D = q.shape
    assert k.shape == (B, H, S, D) and v.shape == (B, H, S, D)
    assert mask.shape == (B, S, S)

    tq = min(tq, S)
    tk = min(tk, S)
    assert S % tq == 0 and S % tk == 0, "S must be divisible by tile sizes"
    assert tq == S or tq % 8 == 0, "tq must be a multiple of 8 (sublanes)"
    assert tk == S or tk % 128 == 0, "tk must be a multiple of 128 (lanes)"

    # Grid order (B, qi, H, ki): mask row (b, qi) stays resident across H and ki.
    grid = (B, S // tq, H, S // tk)

    q_spec = pl.BlockSpec((1, 1, tq, D), lambda b, qi, h, ki: (b, h, qi, 0))
    k_spec = pl.BlockSpec((1, 1, tk, D), lambda b, qi, h, ki: (b, h, ki, 0))
    v_spec = pl.BlockSpec((1, 1, tk, D), lambda b, qi, h, ki: (b, h, ki, 0))
    mask_spec = pl.BlockSpec((1, tq, S), lambda b, qi, h, ki: (b, qi, 0))
    out_spec = pl.BlockSpec((1, 1, tq, D), lambda b, qi, h, ki: (b, h, qi, 0))

    return pl.pallas_call(
        _flash_attn_kernel,
        out_shape=jax.ShapeDtypeStruct((B, H, S, D), jnp.float32),
        grid_spec=pltpu.PrefetchScalarGridSpec(
            num_scalar_prefetch=0,
            grid=grid,
            in_specs=[q_spec, k_spec, v_spec, mask_spec],
            out_specs=out_spec,
            scratch_shapes=[
                pltpu.VMEM((tq, 1), jnp.float32),     # running max
                pltpu.VMEM((tq, 1), jnp.float32),     # running denom
                pltpu.VMEM((tq, D), jnp.bfloat16),    # pre-scaled bf16 Q tile
            ],
        ),
        compiler_params=pltpu.CompilerParams(
            dimension_semantics=("parallel", "parallel", "parallel", "arbitrary"),
        ),
    )(q, k, v, mask)


def sdpa_reference(q, k, v, mask):
    scale = 1.0 / math.sqrt(q.shape[-1])
    qk = jnp.einsum("bhqd,bhkd->bhqk", q, k) * scale
    qk = qk + mask[:, None, :, :]
    attn = jax.nn.softmax(qk, axis=-1)
    return jnp.einsum("bhqk,bhkd->bhqd", attn, v)


if __name__ == "__main__":
    # Small shapes consistent with the module's (B, H, S, D) attention inputs.
    # S=512 exercises multiple qi tiles and a 2-step online-softmax KV loop at
    # the default tq=tk=256; D=128 keeps stores lane-dense.
    B, H, S, D = 2, 4, 512, 128
    key = jax.random.PRNGKey(0)
    kq, kk, kv_, km = jax.random.split(key, 4)

    q = jax.random.normal(kq, (B, H, S, D), dtype=jnp.float32)
    k = jax.random.normal(kk, (B, H, S, D), dtype=jnp.float32)
    v = jax.random.normal(kv_, (B, H, S, D), dtype=jnp.float32)
    # Additive mask, broadcast over heads (emulates (rand > 0.7) -> -1e9).
    # Carried in bf16 to halve the dominant mask HBM stream.
    mask = jnp.where(
        jax.random.uniform(km, (B, S, S)) > 0.7, -1e9, 0.0
    ).astype(jnp.bfloat16)

    out = sdpa_pallas(q, k, v, mask)
    out = jax.block_until_ready(out)

    ref = sdpa_reference(q, k, v, mask.astype(jnp.float32))
    assert out.shape == (B, H, S, D)
    # bf16 MXU inputs + approx reciprocal -> loosened tolerance vs f32 ref.
    assert jnp.allclose(out, ref, atol=5e-2, rtol=5e-2), "mismatch vs reference"

    print("KERNEL_OK")
</pallas_src>

<mosaic_0001>
module attributes {stable_mosaic.version = 11 : i64} {
  func.func @_flash_attn_kernel(%arg0: i32, %arg1: i32, %arg2: i32, %arg3: i32, %arg4: memref<1x1x256x128xf32, #tpu.memory_space<vmem>>, %arg5: memref<1x1x256x128xf32, #tpu.memory_space<vmem>>, %arg6: memref<1x1x256x128xf32, #tpu.memory_space<vmem>>, %arg7: memref<1x256x512xbf16, #tpu.memory_space<vmem>>, %arg8: memref<1x1x256x128xf32, #tpu.memory_space<vmem>>, %arg9: memref<256x1xf32, #tpu.memory_space<vmem>>, %arg10: memref<256x1xf32, #tpu.memory_space<vmem>>, %arg11: memref<256x128xbf16, #tpu.memory_space<vmem>>) attributes {dimension_semantics = [#tpu.dimension_semantics<parallel>, #tpu.dimension_semantics<parallel>, #tpu.dimension_semantics<parallel>, #tpu.dimension_semantics<arbitrary>], iteration_bounds = array<i64: 2, 2, 4, 2>, scalar_prefetch = 0 : i64, scratch_operands = 3 : i64, tpu.core_type = #tpu.core_type<tc>, window_params = [{transform_indices = @transform_0, window_bounds = array<i64: 1, 1, 256, 128>}, {transform_indices = @transform_1, window_bounds = array<i64: 1, 1, 256, 128>}, {transform_indices = @transform_2, window_bounds = array<i64: 1, 1, 256, 128>}, {transform_indices = @transform_3, window_bounds = array<i64: 1, 256, 512>}, {transform_indices = @transform_4, window_bounds = array<i64: 1, 1, 256, 128>}]} {
    %c0_i32 = arith.constant 0 : i32
    %0 = arith.cmpi eq, %arg3, %c0_i32 : i32
    %1 = arith.extui %0 : i1 to i32
    %c0_i32_0 = arith.constant 0 : i32
    %2 = arith.cmpi ne, %1, %c0_i32_0 : i32
    scf.if %2 {
      %cst_32 = arith.constant 0xFF800000 : f32
      %47 = vector.broadcast %cst_32 : f32 to vector<256x1xf32>
      %c0_33 = arith.constant 0 : index
      %c0_34 = arith.constant 0 : index
      %48 = vector.load %arg9[%c0_33, %c0_34] : memref<256x1xf32, #tpu.memory_space<vmem>>, vector<256x1xf32>
      tpu.vector_store %arg9[%c0_33, %c0_34], %47 {strides = array<i32>} : memref<256x1xf32, #tpu.memory_space<vmem>>, vector<256x1xf32>,
      %cst_35 = arith.constant 0.000000e+00 : f32
      %49 = vector.broadcast %cst_35 : f32 to vector<256x1xf32>
      %c0_36 = arith.constant 0 : index
      %c0_37 = arith.constant 0 : index
      %50 = vector.load %arg10[%c0_36, %c0_37] : memref<256x1xf32, #tpu.memory_space<vmem>>, vector<256x1xf32>
      tpu.vector_store %arg10[%c0_36, %c0_37], %49 {strides = array<i32>} : memref<256x1xf32, #tpu.memory_space<vmem>>, vector<256x1xf32>,
      %cst_38 = arith.constant 0.000000e+00 : f32
      %51 = vector.broadcast %cst_38 : f32 to vector<1x1x256x128xf32>
      %c0_39 = arith.constant 0 : index
      %c0_40 = arith.constant 0 : index
      %c0_41 = arith.constant 0 : index
      %c0_42 = arith.constant 0 : index
      %52 = vector.load %arg8[%c0_39, %c0_40, %c0_41, %c0_42] : memref<1x1x256x128xf32, #tpu.memory_space<vmem>>, vector<1x1x256x128xf32>
      tpu.vector_store %arg8[%c0_39, %c0_40, %c0_41, %c0_42], %51 {strides = array<i32>} : memref<1x1x256x128xf32, #tpu.memory_space<vmem>>, vector<1x1x256x128xf32>,
      %c0_43 = arith.constant 0 : index
      %c0_44 = arith.constant 0 : index
      %c0_45 = arith.constant 0 : index
      %c0_46 = arith.constant 0 : index
      %53 = vector.load %arg4[%c0_43, %c0_44, %c0_45, %c0_46] : memref<1x1x256x128xf32, #tpu.memory_space<vmem>>, vector<1x1x256x128xf32>
      %54 = vector.shape_cast %53 : vector<1x1x256x128xf32> to vector<256x128xf32>
      %cst_47 = arith.constant 0.0883883461 : f32
      %55 = vector.broadcast %cst_47 : f32 to vector<256x128xf32>
      %56 = arith.mulf %54, %55 : vector<256x128xf32>
      %57 = arith.truncf %56 : vector<256x128xf32> to vector<256x128xbf16>
      %c0_48 = arith.constant 0 : index
      %c0_49 = arith.constant 0 : index
      %58 = vector.load %arg11[%c0_48, %c0_49] : memref<256x128xbf16, #tpu.memory_space<vmem>>, vector<256x128xbf16>
      tpu.vector_store %arg11[%c0_48, %c0_49], %57 {strides = array<i32>} : memref<256x128xbf16, #tpu.memory_space<vmem>>, vector<256x128xbf16>,
    } else {
    }
    %c0 = arith.constant 0 : index
    %c0_1 = arith.constant 0 : index
    %3 = vector.load %arg11[%c0, %c0_1] : memref<256x128xbf16, #tpu.memory_space<vmem>>, vector<256x128xbf16>
    %c0_2 = arith.constant 0 : index
    %c0_3 = arith.constant 0 : index
    %c0_4 = arith.constant 0 : index
    %c0_5 = arith.constant 0 : index
    %4 = vector.load %arg5[%c0_2, %c0_3, %c0_4, %c0_5] : memref<1x1x256x128xf32, #tpu.memory_space<vmem>>, vector<1x1x256x128xf32>
    %5 = vector.shape_cast %4 : vector<1x1x256x128xf32> to vector<256x128xf32>
    %6 = arith.truncf %5 : vector<256x128xf32> to vector<256x128xbf16>
    %c0_6 = arith.constant 0 : index
    %c0_7 = arith.constant 0 : index
    %c0_8 = arith.constant 0 : index
    %c0_9 = arith.constant 0 : index
    %7 = vector.load %arg6[%c0_6, %c0_7, %c0_8, %c0_9] : memref<1x1x256x128xf32, #tpu.memory_space<vmem>>, vector<1x1x256x128xf32>
    %8 = vector.shape_cast %7 : vector<1x1x256x128xf32> to vector<256x128xf32>
    %9 = arith.truncf %8 : vector<256x128xf32> to vector<256x128xbf16>
    %c256_i32 = arith.constant 256 : i32
    %10 = arith.muli %arg3, %c256_i32 : i32
    %11 = tpu.assume_multiple %10, 256 : i32
    %c0_10 = arith.constant 0 : index
    %c0_11 = arith.constant 0 : index
    %12 = arith.index_cast %11 : i32 to index
    %13 = vector.load %arg7[%c0_10, %c0_11, %12] : memref<1x256x512xbf16, #tpu.memory_space<vmem>>, vector<1x256x256xbf16>
    %14 = vector.shape_cast %13 : vector<1x256x256xbf16> to vector<256x256xbf16>
    %15 = arith.extf %14 : vector<256x256xbf16> to vector<256x256xf32>
    %cst = arith.constant dense<0.000000e+00> : vector<256x256xf32>
    %16 = tpu.matmul %3, %6, %cst {dimension_numbers = #tpu.dot_dimension_numbers<[1], [1], [0], [0], [0, 0, 1, 0], [], []>} : vector<256x128xbf16>, vector<256x128xbf16>, vector<256x256xf32> -> vector<256x256xf32>
    %17 = arith.addf %16, %15 : vector<256x256xf32>
    %c0_12 = arith.constant 0 : index
    %c0_13 = arith.constant 0 : index
    %18 = vector.load %arg9[%c0_12, %c0_13] : memref<256x1xf32, #tpu.memory_space<vmem>>, vector<256x1xf32>
    %cst_14 = arith.constant dense<0xFF800000> : vector<256xf32>
    %19 = vector.multi_reduction <maximumf>, %17, %cst_14 [1] : vector<256x256xf32> to vector<256xf32>
    %20 = vector.shape_cast %19 : vector<256xf32> to vector<256x1xf32>
    %21 = arith.maximumf %18, %20 : vector<256x1xf32>
    %22 = arith.subf %18, %21 : vector<256x1xf32>
    %23 = math.exp %22 : vector<256x1xf32>
    %24 = vector.broadcast %21 : vector<256x1xf32> to vector<256x256xf32>
    %25 = arith.subf %17, %24 : vector<256x256xf32>
    %26 = math.exp %25 : vector<256x256xf32>
    %c0_15 = arith.constant 0 : index
    %c0_16 = arith.constant 0 : index
    %27 = vector.load %arg10[%c0_15, %c0_16] : memref<256x1xf32, #tpu.memory_space<vmem>>, vector<256x1xf32>
    %28 = arith.mulf %23, %27 : vector<256x1xf32>
    %cst_17 = arith.constant dense<0.000000e+00> : vector<256xf32>
    %29 = vector.multi_reduction <add>, %26, %cst_17 [1] : vector<256x256xf32> to vector<256xf32>
    %30 = vector.shape_cast %29 : vector<256xf32> to vector<256x1xf32>
    %31 = arith.addf %28, %30 : vector<256x1xf32>
    %c0_18 = arith.constant 0 : index
    %c0_19 = arith.constant 0 : index
    %32 = vector.load %arg10[%c0_18, %c0_19] : memref<256x1xf32, #tpu.memory_space<vmem>>, vector<256x1xf32>
    tpu.vector_store %arg10[%c0_18, %c0_19], %31 {strides = array<i32>} : memref<256x1xf32, #tpu.memory_space<vmem>>, vector<256x1xf32>,
    %c0_20 = arith.constant 0 : index
    %c0_21 = arith.constant 0 : index
    %c0_22 = arith.constant 0 : index
    %c0_23 = arith.constant 0 : index
    %33 = vector.load %arg8[%c0_20, %c0_21, %c0_22, %c0_23] : memref<1x1x256x128xf32, #tpu.memory_space<vmem>>, vector<1x1x256x128xf32>
    %34 = vector.shape_cast %33 : vector<1x1x256x128xf32> to vector<256x128xf32>
    %35 = vector.broadcast %23 : vector<256x1xf32> to vector<256x128xf32>
    %36 = arith.mulf %35, %34 : vector<256x128xf32>
    %37 = arith.truncf %26 : vector<256x256xf32> to vector<256x256xbf16>
    %cst_24 = arith.constant dense<0.000000e+00> : vector<256x128xf32>
    %38 = tpu.matmul %37, %9, %cst_24 {dimension_numbers = #tpu.dot_dimension_numbers<[1], [0], [0], [1], [0, 0, 1, 1], [], []>} : vector<256x256xbf16>, vector<256x128xbf16>, vector<256x128xf32> -> vector<256x128xf32>
    %39 = arith.addf %36, %38 : vector<256x128xf32>
    %c0_25 = arith.constant 0 : index
    %c0_26 = arith.constant 0 : index
    %c0_27 = arith.constant 0 : index
    %c0_28 = arith.constant 0 : index
    %40 = vector.load %arg8[%c0_25, %c0_26, %c0_27, %c0_28] : memref<1x1x256x128xf32, #tpu.memory_space<vmem>>, vector<1x1x256x128xf32>
    %41 = vector.shape_cast %40 : vector<1x1x256x128xf32> to vector<256x128xf32>
    %42 = vector.shape_cast %39 : vector<256x128xf32> to vector<1x1x256x128xf32>
    tpu.vector_store %arg8[%c0_25, %c0_26, %c0_27, %c0_28], %42 {strides = array<i32>} : memref<1x1x256x128xf32, #tpu.memory_space<vmem>>, vector<1x1x256x128xf32>,
    %c0_29 = arith.constant 0 : index
    %c0_30 = arith.constant 0 : index
    %43 = vector.load %arg9[%c0_29, %c0_30] : memref<256x1xf32, #tpu.memory_space<vmem>>, vector<256x1xf32>
    tpu.vector_store %arg9[%c0_29, %c0_30], %21 {strides = array<i32>} : memref<256x1xf32, #tpu.memory_space<vmem>>, vector<256x1xf32>,
    %c1_i32 = arith.constant 1 : i32
    %44 = arith.cmpi eq, %arg3, %c1_i32 : i32
    %45 = arith.extui %44 : i1 to i32
    %c0_i32_31 = arith.constant 0 : i32
    %46 = arith.cmpi ne, %45, %c0_i32_31 : i32
    scf.if %46 {
      %c0_32 = arith.constant 0 : index
      %c0_33 = arith.constant 0 : index
      %c0_34 = arith.constant 0 : index
      %c0_35 = arith.constant 0 : index
      %47 = vector.load %arg8[%c0_32, %c0_33, %c0_34, %c0_35] : memref<1x1x256x128xf32, #tpu.memory_space<vmem>>, vector<1x1x256x128xf32>
      %48 = vector.shape_cast %47 : vector<1x1x256x128xf32> to vector<256x128xf32>
      %c0_36 = arith.constant 0 : index
      %c0_37 = arith.constant 0 : index
      %49 = vector.load %arg10[%c0_36, %c0_37] : memref<256x1xf32, #tpu.memory_space<vmem>>, vector<256x1xf32>
      %50 = tpu.reciprocal %49 {approx = true} : vector<256x1xf32> -> vector<256x1xf32>
      %51 = vector.broadcast %50 : vector<256x1xf32> to vector<256x128xf32>
      %52 = arith.mulf %48, %51 : vector<256x128xf32>
      %c0_38 = arith.constant 0 : index
      %c0_39 = arith.constant 0 : index
      %c0_40 = arith.constant 0 : index
      %c0_41 = arith.constant 0 : index
      %53 = vector.load %arg8[%c0_38, %c0_39, %c0_40, %c0_41] : memref<1x1x256x128xf32, #tpu.memory_space<vmem>>, vector<1x1x256x128xf32>
      %54 = vector.shape_cast %53 : vector<1x1x256x128xf32> to vector<256x128xf32>
      %55 = vector.shape_cast %52 : vector<256x128xf32> to vector<1x1x256x128xf32>
      tpu.vector_store %arg8[%c0_38, %c0_39, %c0_40, %c0_41], %55 {strides = array<i32>} : memref<1x1x256x128xf32, #tpu.memory_space<vmem>>, vector<1x1x256x128xf32>,
    } else {
    }
    return
  }
  func.func @transform_0(%arg0: i32, %arg1: i32, %arg2: i32, %arg3: i32) -> (i32, i32, i32, i32) {
    %c0_i32 = arith.constant 0 : i32
    %c0_i32_0 = arith.constant 0 : i32
    return %arg0, %arg2, %arg1, %c0_i32 : i32, i32, i32, i32
  }
  func.func @transform_1(%arg0: i32, %arg1: i32, %arg2: i32, %arg3: i32) -> (i32, i32, i32, i32) {
    %c0_i32 = arith.constant 0 : i32
    %c0_i32_0 = arith.constant 0 : i32
    return %arg0, %arg2, %arg3, %c0_i32 : i32, i32, i32, i32
  }
  func.func @transform_2(%arg0: i32, %arg1: i32, %arg2: i32, %arg3: i32) -> (i32, i32, i32, i32) {
    %c0_i32 = arith.constant 0 : i32
    %c0_i32_0 = arith.constant 0 : i32
    return %arg0, %arg2, %arg3, %c0_i32 : i32, i32, i32, i32
  }
  func.func @transform_3(%arg0: i32, %arg1: i32, %arg2: i32, %arg3: i32) -> (i32, i32, i32) {
    %c0_i32 = arith.constant 0 : i32
    %c0_i32_0 = arith.constant 0 : i32
    return %arg0, %arg1, %c0_i32 : i32, i32, i32
  }
  func.func @transform_4(%arg0: i32, %arg1: i32, %arg2: i32, %arg3: i32) -> (i32, i32, i32, i32) {
    %c0_i32 = arith.constant 0 : i32
    %c0_i32_0 = arith.constant 0 : i32
    return %arg0, %arg2, %arg1, %c0_i32 : i32, i32, i32, i32
  }
}

</mosaic_0001>

<bundles_post_ra>
// kernel: tpu_custom_call.1
= control target key start
LH: loop header
LB: loop body
LE: loop exit
PB: predicated region body
PF: predicated region fallthrough
CT: control target
= control target key end

     0   :  { %s6170_s0 = inlined_call_operand.hbm [shape: f32[2,4,512,128], index: 0, kind: input, shape index: {}]   ;;  %s6171_s1 = inlined_call_operand.hbm [shape: f32[2,4,512,128], index: 1, kind: input, shape index: {}]   ;;  %s6172_s2 = inlined_call_operand.hbm [shape: f32[2,4,512,128], index: 2, kind: input, shape index: {}]   ;;  %s6173_s3 = inlined_call_operand.hbm [shape: bf16[2,512,512], index: 3, kind: input, shape index: {}]   ;;  %s6174_s4 = inlined_call_operand.hbm [shape: f32[2,4,512,128], index: 4, kind: output, shape index: {}]  }
   0x1   :  { %6297 = sst [smem:[#allocation110_spill]] %s6170_s0 }
   0x2   :  { %6298 = sst [smem:[#allocation111_spill]] %s6171_s1 }
   0x3   :  { %6299 = sst [smem:[#allocation112_spill]] %s6173_s3 }
   0x4   :  { %6300 = sst [smem:[#allocation113_spill]] %s6174_s4 }
   0x5   :  { %9 = vsyncpa [#allocation6], 0 }
   0x6   :  { %11 = vsyncpa [#allocation6 + $0x1], 0 }
   0x7   :  { %12 = vsyncpa [#allocation9], 0 }
   0x8   :  { %14 = vsyncpa [#allocation9 + $0x1], 0 }
   0x9   :  { %15 = vsyncpa [#allocation12], 0 }
   0xa   :  { %17 = vsyncpa [#allocation12 + $0x1], 0 }
   0xb   :  { %18 = vsyncpa [#allocation7], 0 }
   0xc   :  { %20 = vsyncpa [#allocation7 + $0x1], 0  ;;  %s4290_s15 = smov 0   ;;  %s4292_s16 = smov 0  }
   0xd   :  { %s4294_s17 = smov 0   ;;  %s4296_s18 = smov 0  }
   0xe   :  { %s4298_s19 = smov 0   ;;  %s4300_s20 = smov 0  }
   0xf   :  { %s4302_s21 = smov 0   ;;  %s4304_s22 = smov 0  }
  0x10   :  { %s4306_s23 = smov 0   ;;  %s4308_s24 = smov 0  }
  0x11   :  { %s4310_s25 = smov 0   ;;  %s4312_s26 = smov 0  }
  0x12   :  { %s4314_s27 = smov 0   ;;  %s4316_s28 = smov 0  }
  0x13   :  { %s4318_s29 = smov 0   ;;  %s4320_s30 = smov 0  }
  0x14   :  { %s4322_s5 = smov 0   ;;  %s4324_s6 = smov 0  }
  0x15 LB: > { %6301 = sst [smem:[#allocation18_spill]] %s4180_s15  ;;  %s4381_s7 = sadd.s32 4294967295, %s4248_s6   ;;  %s4248_s6 = sphi %s4324_s6, %s26_s6   ;;  %s4244_s5 = sphi %s4322_s5, %s6597_s5   ;;  %s4240_s30 = sphi %s4320_s30, %s6607_s30   ;;  %s4236_s29 = sphi %s4318_s29, %s6606_s29   ;;  %s4232_s28 = sphi %s4316_s28, %s6594_s28   ;;  %s4228_s27 = sphi %s4314_s27, %s6605_s27   ;;  %s4224_s26 = sphi %s4312_s26, %s6604_s26   ;;  %s4220_s25 = sphi %s4310_s25, %s6603_s25   ;;  %s4216_s24 = sphi %s4308_s24, %s6592_s24   ;;  %s4212_s23 = sphi %s4306_s23, %s6602_s23   ;;  %s4208_s22 = sphi %s4304_s22, %s6601_s22   ;;  %s4204_s21 = sphi %s4302_s21, %s6600_s21   ;;  %s4200_s20 = sphi %s4300_s20, %s6590_s20   ;;  %s4196_s19 = sphi %s4298_s19, %s6589_s19   ;;  %s4192_s18 = sphi %s4296_s18, %s6588_s18   ;;  %s4188_s17 = sphi %s4294_s17, %s6598_s17   ;;  %s4184_s16 = sphi %s4292_s16, %s6587_s16   ;;  %s4180_s15 = sphi %s4290_s15, %s6586_s15  }
  0x16   : > { %6302 = sst [smem:[#allocation19_spill]] %s4184_s16  ;;  %s41_s8 = sadd.s32 1, %s4232_s28 }
  0x17   : > { %6303 = sst [smem:[#allocation20_spill]] %s4188_s17  ;;  %p42_p0 = scmp.ge.s32.totalorder %s41_s8, 2 }
  0x18   : > { %6304 = sst [smem:[#allocation21_spill]] %s4196_s19  ;;  %s44_s9 = sadd.s32 1, %s4236_s29 }
  0x19   : > { %6305 = sst [smem:[#allocation22_spill]] %s4200_s20  ;;  %s48_s10 = sadd.s32 1, %s4240_s30 }
  0x1a   : > { %6306 = sst [smem:[#allocation23_spill]] %s4204_s21  ;;  %s52_s11 = sadd.s32 1, %s4244_s5 }
  0x1b   : > { %6307 = sst [smem:[#allocation24_spill]] %s4216_s24  ;;  %s6609_s8 = smov (%p42_p0, %s41_s8), 0 }
  0x1c   : > { %6308 = sst [smem:[#allocation25_spill]] %s4220_s25  ;;  %s6611_s9 = smov (!%p42_p0, %s44_s9), %s4236_s29 }
  0x1d   : > { %6309 = sst [smem:[#allocation26_spill]] %s4224_s26  ;;  %p6201_p1 = scmp.eq.s32.totalorder %s4248_s6, 0 }
  0x1e   : > { %6310 = sst [smem:[#allocation27_spill]] %s4228_s27  ;;  %p6200_p2 = scmp.eq.s32.totalorder %s4381_s7, 0 }
  0x1f   : > { %6311 = sst [smem:[#allocation28_spill]] %s4232_s28  ;;  %p46_p3 = scmp.ge.s32.totalorder %s6611_s9, 4 }
  0x20   : > { %6312 = sst [smem:[#allocation29_spill]] %s4244_s5  ;;  %s89_s12 = ssub.s32 %s4232_s28, %s6609_s8 }
  0x21   : > { %6313 = sst [smem:[#allocation30_spill]] %s6609_s8  ;;  %s93_s13 = sadd.s32 1, %s4200_s20 }
  0x22   : > { %p100_p4 = scmp.ne.s32.totalorder %s4200_s20, %s4196_s19  ;;  %s6613_s9 = smov (%p46_p3, %s6611_s9), 0 }
  0x23   : > { %6314 = sst [smem:[#allocation31_spill]] %s6613_s9  ;;  %s6615_s10 = smov (!%p46_p3, %s48_s10), %s4240_s30 }
  0x24   : > { %s57_s14 = ssub.s32 %s4236_s29, %s6613_s9  ;;  %p4404_p5 = por %p100_p4, %p6201_p1 }
  0x25   : > { %p50_p6 = scmp.ge.s32.totalorder %s6615_s10, 2  ;;  %p106_p7 = scmp.ne.s32.totalorder %s4196_s19, %s4192_s18 }
  0x26   : > { %p6188_p8 = scmp.lt.s32.totalorder %s4248_s6, 32  ;;  %s4424_s25 = sshll.u32 %s4244_s5, 8 }
  0x27   : > { %s6617_s10 = smov (%p50_p6, %s6615_s10), 0  ;;  %s6619_s11 = smov (!%p50_p6, %s52_s11), %s4244_s5 }
  0x28   : > { %6316 = sst [smem:[#allocation32_spill]] %s6617_s10  ;;  %s59_s8 = ssub.s32 %s4240_s30, %s6617_s10 }
  0x29   : > { %p4418_p9 = por %p106_p7, %p6200_p2  ;;  %p54_p10 = scmp.ge.s32.totalorder %s6619_s11, 2 }
  0x2a   : > { %s243_s18 = sand.u32 1, %s4248_s6   ;;  %s245_s15 = sand.u32 1, %s4200_s20  }
  0x2b   : > { %s6317_s27 = scalar_select %p4418_p9, 1, 0 }
  0x2c   : > { %s6621_s11 = smov (%p54_p10, %s6619_s11), 0  ;;  %s3125_s17 = sshll.u32 %s245_s15, 8 }
  0x2d   : > { %6318 = sst [smem:[#allocation33_spill]] %s6317_s27  ;;  %s56_s26 = ssub.s32 %s4244_s5, %s6621_s11 }
  0x2e   : > { %6319 = sst [smem:[#allocation34_spill]] %s6621_s11  ;;  %s58_s24 = sor.u32 %s57_s14, %s56_s26 }
  0x2f   : > { %s148_s10 = sor.u32 %s59_s8, %s56_s26  ;;  %s60_s19 = sor.u32 %s59_s8, %s58_s24 }
  0x30   : > { %s90_s3 = sor.u32 %s89_s12, %s58_s24  ;;  %p4431_p11 = scmp.eq.s32.totalorder %s60_s19, 0 }
  0x31   : > { %p91_p12 = scmp.eq.s32.totalorder %s90_s3, 0  ;;  %p4435_p13 = scmp.eq.s32.totalorder %s148_s10, 0 }
  0x32   : > { %s3126_s11 = sshll.u32 %s4232_s28, 5  ;;  %s6323_s14 = sshll.u32 %s4236_s29, 6 }
  0x33   : > { %s4441_s16 = scalar_select %p91_p12, %s4200_s20, %s93_s13  }
  0x34   : > { %s253_s26 = sadd.s32 %s3126_s11, %s6323_s14  ;;  %s247_s5 = scalar_lea.vmem [#allocation8], %s3125_s17 }
  0x35   : > { %6322 = sst [smem:[#allocation35_spill]] %s4441_s16  ;;  %s255_s8 = sadd.s32 %s4424_s25, %s253_s26 }
  0x36   : > { %s258_s0 = sshll.u32 %s247_s5, 4  ;;  %s4447_s24 = sshll.u32 %s255_s8, 7  ;;  %s259_s0 = int_to_ptr.vmem [resolvable:$true] %s258_s0 }
  0x37   : > { %s6324_s1 = sld [smem:[#allocation111_spill]]  ;;  %p4457_p0 = pnand %p6188_p8, %p4404_p5 }
  0x38   : > { %s272_s13 = scalar_lea.vmem [#allocation10], %s3125_s17  ;;  %s4465_s26 = scalar_lea.sflag [#allocation9], %s243_s18 }
  0x39   : > { %s283_s14 = sshll.u32 %s272_s13, 4  ;;  %p6189_p3 = pneg %p4457_p0  ;;  %s4478_s14 = int_to_ptr.vmem [resolvable:$true] %s283_s14 }
  0x3a   : > { %s3965_s8 = scalar_lea.vmem %s259_s0, 4096  ;;  %s4250_s4 = smov [#allocation8]  }
  0x3b   : > { %p3966_p4 = scmp.ne.s32.totalorder %s259_s0, %s3965_s8  ;;  %s3970_s3 = sshll.u32 %s4250_s4, 4  ;;  %s3971_s3 = int_to_ptr.vmem [resolvable:$false] %s3970_s3 }
  0x3c   : > { %s3972_s19 = scalar_lea.vmem %s3971_s3, 8192  ;;  %p3973_p7 = scmp.lt.s32.totalorder %s259_s0, %s3971_s3 }
  0x3d   : > { %s257_s10 = scalar_lea.hbm %s6324_s1, %s4447_s24  ;;  %p3968_p5 = pnand %p3966_p4, %p6189_p3 }
  0x3e   : > { %p3974_p10 = scmp.lt.s32.totalorder %s3972_s19, %s3965_s8 }
  0x3f   : > { %p3969_p6 = pneg %p3968_p5 }
  0x40   : > { %p3975_p12 = por %p3974_p10, %p3973_p7 }
  0x42   : > { %p3976_p8 = pnand %p3975_p12, %p3969_p6 }
  0x44   : > { %3979 = shalt.err (!%p3976_p8)
}
  0x45   : > { %s6190_s17 = smov 128   ;;  %s6192_s18 = smov 8  }
  0x46   : > { %3509 = dma.hbm_to_vmem [thread:$0]  (!%p4457_p0), %s257_s10, 4096, %s259_s0, %s4465_s26, %s6190_s17, %s6190_s17, %s6192_s18  }
  0x47   : > { %p3140_p8 = scmp.ge.s32.totalorder %s4248_s6, 1  ;;  %p315_p4 = scmp.lt.s32.totalorder %s4248_s6, 33 }
  0x48   : > { %s3117_s11 = sadd.s32 4294967294, %s4248_s6   ;;  %s63_s13 = sadd.s32 1, %s4212_s23 }
  0x49   : > { %p4482_p5 = pnand %p3140_p8, %p315_p4  ;;  %p70_p6 = scmp.ne.s32.totalorder %s4212_s23, %s4208_s22 }
  0x4a   : > { %s4491_s8 = scalar_select %p4431_p11, %s4212_s23, %s63_s13  }
  0x4b   : > { %p76_p7 = scmp.ne.s32.totalorder %s4208_s22, %s4204_s21  ;;  %p192_p10 = scmp.eq.s32.totalorder %s4381_s7, 31 }
  0x4c   : > { %6327 = sst [smem:[#allocation36_spill]] %s4491_s8  ;;  %p198_p12 = scmp.eq.s32.totalorder %s3117_s11, 31 }
  0x4d   : > { %p4500_p3 = por %p6201_p1, %p70_p6  ;;  %p4506_p8 = por %p6200_p2, %p76_p7 }
  0x4e   : > { %p4510_p11 = por %p192_p10, %p70_p6  ;;  %p4514_p4 = por %p198_p12, %p76_p7 }
  0x4f   : > { %s6329_s10 = scalar_select %p4506_p8, 1, 0 }
  0x50   : > { %s6331_s27 = scalar_select %p4510_p11, 1, 0 }
  0x51   : > { %6330 = sst [smem:[#allocation37_spill]] %s6329_s10  ;;  %s218_s3 = sand.u32 1, %s4212_s23  }
  0x52   : > { %s6332_s4 = scalar_select %p4514_p4, 1, 0 }
  0x53   : > { %s3121_s19 = sshll.u32 %s4240_s30, 5  ;;  %s3120_s11 = sshll.u32 %s218_s3, 8 }
  0x54   : > { %6333 = sst [smem:[#allocation38_spill]] %s6332_s4  ;;  %s6334_s13 = sshll.u32 %s4236_s29, 6 }
  0x55   : > { %s228_s5 = sadd.s32 %s6334_s13, %s3121_s19  ;;  %s222_s18 = scalar_lea.vmem [#allocation5], %s3120_s11 }
  0x56   : > { %s230_s17 = sadd.s32 %s4424_s25, %s228_s5  ;;  %s233_s1 = sshll.u32 %s222_s18, 4  ;;  %s4527_s1 = int_to_ptr.vmem [resolvable:$true] %s233_s1 }
  0x57   : > { %s4525_s28 = sshll.u32 %s230_s17, 7  ;;  %s6335_s20 = sld [smem:[#allocation110_spill]] }
  0x58   : > { %p6337_p6 = scmp.lt.s32.totalorder %s4248_s6, 32  ;;  %s3993_s19 = scalar_lea.vmem %s4478_s14, 4096 }
  0x59   : > { %p3994_p10 = scmp.ne.s32.totalorder %s4478_s14, %s3993_s19  ;;  %p6339_p12 = pneg %p4457_p0 }
  0x5a   : > { %p4537_p7 = pnand %p6337_p6, %p4500_p3  ;;  %s4253_s5 = smov [#allocation10]  }
  0x5b   : > { %p3996_p2 = pnand %p3994_p10, %p6339_p12  ;;  %s3998_s17 = sshll.u32 %s4253_s5, 4  ;;  %s3999_s17 = int_to_ptr.vmem [resolvable:$false] %s3998_s17 }
  0x5c   : > { %s4000_s18 = scalar_lea.vmem %s3999_s17, 8192  ;;  %p4001_p4 = scmp.lt.s32.totalorder %s4478_s14, %s3999_s17 }
  0x5d   : > { %s232_s21 = scalar_lea.hbm %s6335_s20, %s4525_s28  ;;  %p3997_p1 = pneg %p3996_p2 }
  0x5e   : > { %p4002_p11 = scmp.lt.s32.totalorder %s4000_s18, %s3993_s19 }
  0x60   : > { %p4003_p9 = por %p4002_p11, %p4001_p4 }
  0x62   : > { %p4004_p8 = pnand %p4003_p9, %p3997_p1 }
  0x64   : > { %4007 = shalt.err (!%p4004_p8)
}
  0x65   : > { %s6340_s16 = smov 8   ;;  %s6341_s20 = smov 128  }
  0x66   : > { %s6342_s11 = scalar_lea.hbm %s6172_s2, %s4447_s24  ;;  %s219_s13 = scalar_lea.sflag [#allocation6], %s218_s3 }
  0x67   : > { %3512 = dma.hbm_to_vmem [thread:$0]  (!%p4457_p0), %s6342_s11, 4096, %s4478_s14, %s4465_s26, %s6341_s20, %s6341_s20, %s6340_s16  }
  0x68   : > { %p4010_p1 = pneg %p4537_p7  ;;  %s4021_s12 = scalar_lea.vmem %s4527_s1, 4096 }
  0x69   : > { %p4022_p2 = scmp.ne.s32.totalorder %s4527_s1, %s4021_s12  ;;  %s4254_s19 = smov [#allocation5]  }
  0x6a   : > { %s4026_s5 = sshll.u32 %s4254_s19, 4  ;;  %s4027_s5 = int_to_ptr.vmem [resolvable:$false] %s4026_s5 }
  0x6b   : > { %p4024_p9 = pnand %p4022_p2, %p4010_p1  ;;  %s4028_s17 = scalar_lea.vmem %s4027_s5, 8192 }
  0x6c   : > { %p4029_p8 = scmp.lt.s32.totalorder %s4527_s1, %s4027_s5  ;;  %p4030_p11 = scmp.lt.s32.totalorder %s4028_s17, %s4021_s12 }
  0x6d   : > { %p4025_p3 = pneg %p4024_p9 }
  0x6e   : > { %p4031_p4 = por %p4030_p11, %p4029_p8 }
  0x70   : > { %p4032_p6 = pnand %p4031_p4, %p4025_p3 }
  0x72   : > { %4035 = shalt.err (!%p4032_p6)
}
  0x73   : > { %s6343_s26 = sld [smem:[#allocation20_spill]]  ;;  %s3205_s0 = sshll.u32 %s4240_s30, 7 }
  0x74   : > { %s6344_s3 = sld [smem:[#allocation19_spill]]  ;;  %p6346_p12 = scmp.eq.s32.totalorder %s4248_s6, 0 }
  0x75   : > { %s6345_s18 = sld [smem:[#allocation18_spill]]  ;;  %p6347_p2 = scmp.eq.s32.totalorder %s4381_s7, 0 }
  0x76   : > { %3506 = dma.hbm_to_vmem [thread:$0]  (!%p4537_p7), %s232_s21, 4096, %s4527_s1, %s219_s13, %s6341_s20, %s6341_s20, %s6340_s16  }
  0x77   : > { %s304_s19 = sadd.s32 %s3205_s0, %s4424_s25  ;;  %s6349_s20 = sld [smem:[#allocation112_spill]] }
  0x78   : > { %s3139_s5 = sshll.u32 %s304_s19, 6  ;;  %s4255_s25 = smov [#allocation11]  }
  0x79   : > { %s151_s4 = sadd.s32 1, %s6343_s26  ;;  %s293_s28 = sand.u32 1, %s6343_s26  }
  0x7a   : > { %s4581_s8 = scalar_select %p4435_p13, %s6343_s26, %s151_s4  }
  0x7b   : > { %p158_p0 = scmp.ne.s32.totalorder %s6343_s26, %s6344_s3  ;;  %p164_p10 = scmp.ne.s32.totalorder %s6344_s3, %s6345_s18 }
  0x7c   : > { %s3135_s12 = sshll.u32 %s293_s28, 9  ;;  %p6350_p13 = scmp.lt.s32.totalorder %s4248_s6, 32 }
  0x7d   : > { %p160_p1 = por %p158_p0, %p6346_p12  ;;  %p4593_p9 = por %p164_p10, %p6347_p2 }
  0x7e   : > { %s297_s1 = scalar_lea.vmem [#allocation11], %s3135_s12  ;;  %s306_s13 = scalar_lea.hbm %s6349_s20, %s3139_s5 }
  0x7f   : > { %s307_s21 = sshll.u32 %s297_s1, 4  ;;  %p4603_p7 = pnand %p6350_p13, %p160_p1  ;;  %s308_s21 = int_to_ptr.vmem [resolvable:$true] %s307_s21 }
  0x80   : > { %s294_s24 = scalar_lea.sflag [#allocation12], %s293_s28  ;;  %s4049_s14 = scalar_lea.vmem %s308_s21, 8192 }
  0x81   : > { %p4038_p3 = pneg %p4603_p7  ;;  %p4050_p8 = scmp.ne.s32.totalorder %s308_s21, %s4049_s14 }
  0x82   : > { %s4054_s26 = sshll.u32 %s4255_s25, 4  ;;  %s4055_s26 = int_to_ptr.vmem [resolvable:$false] %s4054_s26 }
  0x83   : > { %p4052_p11 = pnand %p4050_p8, %p4038_p3  ;;  %s4056_s3 = scalar_lea.vmem %s4055_s26, 16384 }
  0x84   : > { %p4057_p6 = scmp.lt.s32.totalorder %s308_s21, %s4055_s26  ;;  %p4058_p0 = scmp.lt.s32.totalorder %s4056_s3, %s4049_s14 }
  0x85   : > { %p4053_p4 = pneg %p4052_p11 }
  0x86   : > { %p4059_p10 = por %p4058_p0, %p4057_p6 }
  0x88   : > { %p4060_p12 = pnand %p4059_p10, %p4053_p4 }
  0x8a   : > { %4063 = shalt.err (!%p4060_p12)
}
  0x8b   : > { %s4256_s18 = smov 256   ;;  %s4257_s4 = smov 16  }
  0x8c   : > { %3515 = dma.hbm_to_vmem [thread:$0]  (!%p4603_p7), %s306_s13, 8192, %s308_s21, %s294_s24, %s4256_s18, %s4256_s18, %s4257_s4  }
  0x8d   : > { %319 = sbr.rel (%p4482_p5) target bundleno = 1455 (0x5af), region = 36 }
  0x92   : > { %s6352_s28 = sld [smem:[#allocation37_spill]]  ;;  %s4614_s0 = sand.u32 1, %s4208_s22  }
  0x93   : > { %s3141_s12 = sshll.u32 %s4614_s0, 8  ;;  %s322_s19 = scalar_lea.sflag [#allocation6], %s4614_s0 }
  0x94   : > { %s4618_s5 = scalar_lea.vmem [#allocation5], %s3141_s12 }
  0x98   : > { %p6353_p1 = scmp.ne.s32.totalorder %s6352_s28, 0 }
  0x9a   : > { %4163 = dma.done.wait (%p6353_p1), %s322_s19, 4096  }
  0x9b   : > { %4165 = vsyncadd (%p6353_p1), %s322_s19, 4294963200  ;;  %s6354_s1 = sld [smem:[#allocation21_spill]]  ;;  %s330_s15 = sand.u32 1, %s4381_s7  }
  0x9c   : > { %s6355_s21 = sld [smem:[#allocation33_spill]]  ;;  %s331_s20 = scalar_lea.sflag [#allocation9], %s330_s15 }
  0xa1   : > { %s332_s16 = sand.u32 1, %s6354_s1  }
  0xa2   : > { %s3142_s9 = sshll.u32 %s332_s16, 8  ;;  %p6356_p5 = scmp.ne.s32.totalorder %s6355_s21, 0 }
  0xa3   : > { %s4626_s13 = scalar_lea.vmem [#allocation8], %s3142_s9 }
  0xa4   : > { %4167 = dma.done.wait (%p6356_p5), %s331_s20, 8192  }
  0xa5   : > { %4169 = vsyncadd (%p6356_p5), %s331_s20, 4294959104  ;;  %s6357_s17 = sld [smem:[#allocation19_spill]]  ;;  %s4635_s25 = scalar_lea.vmem [#allocation10], %s3142_s9 }
  0xab   : > { %s348_s24 = sand.u32 1, %s6357_s17  }
  0xac   : > { %s4633_s14 = sshll.u32 %s348_s24, 9  ;;  %s349_s26 = scalar_lea.sflag [#allocation12], %s348_s24 }
  0xad   : > { %s352_s7 = scalar_lea.vmem [#allocation11], %s4633_s14 }
  0xae   : > { %4171 = dma.done.wait (%p4593_p9), %s349_s26, 8192  }
  0xaf   : > { %4173 = vsyncadd (%p4593_p9), %s349_s26, 4294959104  ;;  %s4642_s3 = scalar_lea.vmem [#allocation13], %s3141_s12  ;;  %s6358_s18 = sld [smem:[#allocation24_spill]] }
  0xb5   : > { %p3146_p2 = scmp.ne.s32.totalorder %s6358_s18, 0 }
  0xb7   : > { %401 = sbr.rel (%p3146_p2) target bundleno = 245 (0xf5), region = 56 }
  0xbc   : > { %vm402_vm0 = vcmask 7168   ;;  %v4646_v0 = vld [vmem:[%s4618_s5] sm:$0xff]  ;;  %v4649_v1 = vld [vmem:[%s4618_s5 + $0x8] sm:$0xff]  ;;  %v4652_v2 = vld [vmem:[%s4618_s5 + $0x10] sm:$0xff]  ;;  %v4258_v3 = vmov -inf   ;;  %v4259_v4 = vmov 0.0  }
  0xbd   : > { %403 = vst.msk [vmem:[#allocation2] sm:$0xff] %vm402_vm0, %v4258_v3  ;;  %404 = vst.msk [vmem:[#allocation2 + $0x8] sm:$0xff] %vm402_vm0, %v4258_v3  ;;  %v531_v5 = vmul.f32 0.088388346, %v4646_v0  ;;  %v532_v6 = vmul.f32 0.088388346, %v4649_v1 }
  0xbe   : > { %405 = vst.msk [vmem:[#allocation2 + $0x10] sm:$0xff] %vm402_vm0, %v4258_v3  ;;  %406 = vst.msk [vmem:[#allocation2 + $0x18] sm:$0xff] %vm402_vm0, %v4258_v3  ;;  %v502_v7 = vld [vmem:[%s4618_s5 + $0x18] sm:$0xff]  ;;  %v503_v8 = vld [vmem:[%s4618_s5 + $0x20] sm:$0xff]  ;;  %v533_v9 = vmul.f32 0.088388346, %v4652_v2 }
  0xbf   : > { %407 = vst.msk [vmem:[#allocation2 + $0x20] sm:$0xff] %vm402_vm0, %v4258_v3  ;;  %408 = vst.msk [vmem:[#allocation2 + $0x28] sm:$0xff] %vm402_vm0, %v4258_v3  ;;  %v534_v10 = vmul.f32 0.088388346, %v502_v7  ;;  %v504_v11 = vld [vmem:[%s4618_s5 + $0x28] sm:$0xff]  ;;  %v505_v12 = vld [vmem:[%s4618_s5 + $0x30] sm:$0xff]  ;;  %v3241_v13 = vpack.c.bf16 %v532_v6, %v531_v5 }
  0xc0   : > { %409 = vst.msk [vmem:[#allocation2 + $0x30] sm:$0xff] %vm402_vm0, %v4258_v3  ;;  %410 = vst.msk [vmem:[#allocation2 + $0x38] sm:$0xff] %vm402_vm0, %v4258_v3  ;;  %v535_v14 = vmul.f32 0.088388346, %v503_v8  ;;  %v536_v15 = vmul.f32 0.088388346, %v504_v11 }
  0xc1   : > { %411 = vst.msk [vmem:[#allocation2 + $0x40] sm:$0xff] %vm402_vm0, %v4258_v3  ;;  %412 = vst.msk [vmem:[#allocation2 + $0x48] sm:$0xff] %vm402_vm0, %v4258_v3  ;;  %v506_v16 = vld [vmem:[%s4618_s5 + $0x38] sm:$0xff]  ;;  %v507_v17 = vld [vmem:[%s4618_s5 + $0x40] sm:$0xff]  ;;  %v3246_v18 = vpack.c.bf16 %v534_v10, %v533_v9  ;;  %v537_v19 = vmul.f32 0.088388346, %v505_v12 }
  0xc2   : > { %413 = vst.msk [vmem:[#allocation2 + $0x50] sm:$0xff] %vm402_vm0, %v4258_v3  ;;  %414 = vst.msk [vmem:[#allocation2 + $0x58] sm:$0xff] %vm402_vm0, %v4258_v3  ;;  %v538_v20 = vmul.f32 0.088388346, %v506_v16  ;;  %v508_v21 = vld [vmem:[%s4618_s5 + $0x48] sm:$0xff]  ;;  %v509_v22 = vld [vmem:[%s4618_s5 + $0x50] sm:$0xff]  ;;  %v3251_v23 = vpack.c.bf16 %v536_v15, %v535_v14 }
  0xc3   : > { %415 = vst.msk [vmem:[#allocation2 + $0x60] sm:$0xff] %vm402_vm0, %v4258_v3  ;;  %416 = vst.msk [vmem:[#allocation2 + $0x68] sm:$0xff] %vm402_vm0, %v4258_v3  ;;  %v539_v24 = vmul.f32 0.088388346, %v507_v17  ;;  %v540_v25 = vmul.f32 0.088388346, %v508_v21 }
  0xc4   : > { %417 = vst.msk [vmem:[#allocation2 + $0x70] sm:$0xff] %vm402_vm0, %v4258_v3  ;;  %418 = vst.msk [vmem:[#allocation2 + $0x78] sm:$0xff] %vm402_vm0, %v4258_v3  ;;  %v510_v26 = vld [vmem:[%s4618_s5 + $0x58] sm:$0xff]  ;;  %v511_v27 = vld [vmem:[%s4618_s5 + $0x60] sm:$0xff]  ;;  %v3256_v28 = vpack.c.bf16 %v538_v20, %v537_v19  ;;  %v541_v29 = vmul.f32 0.088388346, %v509_v22 }
  0xc5   : > { %419 = vst.msk [vmem:[#allocation2 + $0x80] sm:$0xff] %vm402_vm0, %v4258_v3  ;;  %420 = vst.msk [vmem:[#allocation2 + $0x88] sm:$0xff] %vm402_vm0, %v4258_v3  ;;  %v542_v30 = vmul.f32 0.088388346, %v510_v26  ;;  %v512_v31 = vld [vmem:[%s4618_s5 + $0x68] sm:$0xff]  ;;  %v513_v32 = vld [vmem:[%s4618_s5 + $0x70] sm:$0xff]  ;;  %v3261_v33 = vpack.c.bf16 %v540_v25, %v539_v24 }
  0xc6   : > { %421 = vst.msk [vmem:[#allocation2 + $0x90] sm:$0xff] %vm402_vm0, %v4258_v3  ;;  %422 = vst.msk [vmem:[#allocation2 + $0x98] sm:$0xff] %vm402_vm0, %v4258_v3  ;;  %v543_v34 = vmul.f32 0.088388346, %v511_v27  ;;  %v544_v35 = vmul.f32 0.088388346, %v512_v31 }
  0xc7   : > { %423 = vst.msk [vmem:[#allocation2 + $0xa0] sm:$0xff] %vm402_vm0, %v4258_v3  ;;  %424 = vst.msk [vmem:[#allocation2 + $0xa8] sm:$0xff] %vm402_vm0, %v4258_v3  ;;  %v514_v36 = vld [vmem:[%s4618_s5 + $0x78] sm:$0xff]  ;;  %v515_v37 = vld [vmem:[%s4618_s5 + $0x80] sm:$0xff]  ;;  %v3266_v38 = vpack.c.bf16 %v542_v30, %v541_v29  ;;  %v545_v39 = vmul.f32 0.088388346, %v513_v32 }
  0xc8   : > { %425 = vst.msk [vmem:[#allocation2 + $0xb0] sm:$0xff] %vm402_vm0, %v4258_v3  ;;  %426 = vst.msk [vmem:[#allocation2 + $0xb8] sm:$0xff] %vm402_vm0, %v4258_v3  ;;  %v546_v40 = vmul.f32 0.088388346, %v514_v36  ;;  %v516_v41 = vld [vmem:[%s4618_s5 + $0x88] sm:$0xff]  ;;  %v517_v42 = vld [vmem:[%s4618_s5 + $0x90] sm:$0xff]  ;;  %v3271_v43 = vpack.c.bf16 %v544_v35, %v543_v34 }
  0xc9   : > { %427 = vst.msk [vmem:[#allocation2 + $0xc0] sm:$0xff] %vm402_vm0, %v4258_v3  ;;  %428 = vst.msk [vmem:[#allocation2 + $0xc8] sm:$0xff] %vm402_vm0, %v4258_v3  ;;  %v547_v44 = vmul.f32 0.088388346, %v515_v37  ;;  %v548_v45 = vmul.f32 0.088388346, %v516_v41 }
  0xca   : > { %429 = vst.msk [vmem:[#allocation2 + $0xd0] sm:$0xff] %vm402_vm0, %v4258_v3  ;;  %430 = vst.msk [vmem:[#allocation2 + $0xd8] sm:$0xff] %vm402_vm0, %v4258_v3  ;;  %v518_v46 = vld [vmem:[%s4618_s5 + $0x98] sm:$0xff]  ;;  %v519_v47 = vld [vmem:[%s4618_s5 + $0xa0] sm:$0xff]  ;;  %v3276_v48 = vpack.c.bf16 %v546_v40, %v545_v39  ;;  %v549_v49 = vmul.f32 0.088388346, %v517_v42 }
  0xcb   : > { %431 = vst.msk [vmem:[#allocation2 + $0xe0] sm:$0xff] %vm402_vm0, %v4258_v3  ;;  %432 = vst.msk [vmem:[#allocation2 + $0xe8] sm:$0xff] %vm402_vm0, %v4258_v3  ;;  %v550_v50 = vmul.f32 0.088388346, %v518_v46  ;;  %v520_v51 = vld [vmem:[%s4618_s5 + $0xa8] sm:$0xff]  ;;  %v521_v52 = vld [vmem:[%s4618_s5 + $0xb0] sm:$0xff]  ;;  %v3281_v53 = vpack.c.bf16 %v548_v45, %v547_v44 }
  0xcc   : > { %433 = vst.msk [vmem:[#allocation2 + $0xf0] sm:$0xff] %vm402_vm0, %v4258_v3  ;;  %434 = vst.msk [vmem:[#allocation2 + $0xf8] sm:$0xff] %vm402_vm0, %v4258_v3  ;;  %v551_v54 = vmul.f32 0.088388346, %v519_v47  ;;  %v552_v55 = vmul.f32 0.088388346, %v520_v51 }
  0xcd   : > { %435 = vst.msk [vmem:[#allocation3] sm:$0xff] %vm402_vm0, %v4259_v4  ;;  %436 = vst.msk [vmem:[#allocation3 + $0x8] sm:$0xff] %vm402_vm0, %v4259_v4  ;;  %v522_v56 = vld [vmem:[%s4618_s5 + $0xb8] sm:$0xff]  ;;  %v523_v57 = vld [vmem:[%s4618_s5 + $0xc0] sm:$0xff]  ;;  %v3286_v58 = vpack.c.bf16 %v550_v50, %v549_v49  ;;  %v553_v59 = vmul.f32 0.088388346, %v521_v52 }
  0xce   : > { %437 = vst.msk [vmem:[#allocation3 + $0x10] sm:$0xff] %vm402_vm0, %v4259_v4  ;;  %438 = vst.msk [vmem:[#allocation3 + $0x18] sm:$0xff] %vm402_vm0, %v4259_v4  ;;  %v554_v60 = vmul.f32 0.088388346, %v522_v56  ;;  %v524_v61 = vld [vmem:[%s4618_s5 + $0xc8] sm:$0xff]  ;;  %v525_v62 = vld [vmem:[%s4618_s5 + $0xd0] sm:$0xff]  ;;  %v3291_v63 = vpack.c.bf16 %v552_v55, %v551_v54 }
  0xcf   : > { %439 = vst.msk [vmem:[#allocation3 + $0x20] sm:$0xff] %vm402_vm0, %v4259_v4  ;;  %440 = vst.msk [vmem:[#allocation3 + $0x28] sm:$0xff] %vm402_vm0, %v4259_v4  ;;  %v555_v0 = vmul.f32 0.088388346, %v523_v57  ;;  %v556_v1 = vmul.f32 0.088388346, %v524_v61 }
  0xd0   : > { %441 = vst.msk [vmem:[#allocation3 + $0x30] sm:$0xff] %vm402_vm0, %v4259_v4  ;;  %442 = vst.msk [vmem:[#allocation3 + $0x38] sm:$0xff] %vm402_vm0, %v4259_v4  ;;  %v526_v2 = vld [vmem:[%s4618_s5 + $0xd8] sm:$0xff]  ;;  %v527_v3 = vld [vmem:[%s4618_s5 + $0xe0] sm:$0xff]  ;;  %v557_v5 = vmul.f32 0.088388346, %v525_v62 }
  0xd1   : > { %443 = vst.msk [vmem:[#allocation3 + $0x40] sm:$0xff] %vm402_vm0, %v4259_v4  ;;  %444 = vst.msk [vmem:[#allocation3 + $0x48] sm:$0xff] %vm402_vm0, %v4259_v4  ;;  %v558_v6 = vmul.f32 0.088388346, %v526_v2  ;;  %v528_v7 = vld [vmem:[%s4618_s5 + $0xe8] sm:$0xff]  ;;  %v529_v8 = vld [vmem:[%s4618_s5 + $0xf0] sm:$0xff]  ;;  %v3301_v9 = vpack.c.bf16 %v556_v1, %v555_v0 }
  0xd2   : > { %445 = vst.msk [vmem:[#allocation3 + $0x50] sm:$0xff] %vm402_vm0, %v4259_v4  ;;  %446 = vst.msk [vmem:[#allocation3 + $0x58] sm:$0xff] %vm402_vm0, %v4259_v4  ;;  %v559_v10 = vmul.f32 0.088388346, %v527_v3  ;;  %v560_v11 = vmul.f32 0.088388346, %v528_v7 }
  0xd3   : > { %447 = vst.msk [vmem:[#allocation3 + $0x60] sm:$0xff] %vm402_vm0, %v4259_v4  ;;  %448 = vst.msk [vmem:[#allocation3 + $0x68] sm:$0xff] %vm402_vm0, %v4259_v4  ;;  %v530_v12 = vld [vmem:[%s4618_s5 + $0xf8] sm:$0xff]  ;;  %v561_v14 = vmul.f32 0.088388346, %v529_v8 }
  0xd4   : > { %449 = vst.msk [vmem:[#allocation3 + $0x70] sm:$0xff] %vm402_vm0, %v4259_v4  ;;  %450 = vst.msk [vmem:[#allocation3 + $0x78] sm:$0xff] %vm402_vm0, %v4259_v4  ;;  %v562_v15 = vmul.f32 0.088388346, %v530_v12  ;;  %v3311_v16 = vpack.c.bf16 %v560_v11, %v559_v10 }
  0xd5   : > { %451 = vst.msk [vmem:[#allocation3 + $0x80] sm:$0xff] %vm402_vm0, %v4259_v4  ;;  %452 = vst.msk [vmem:[#allocation3 + $0x88] sm:$0xff] %vm402_vm0, %v4259_v4 }
  0xd6   : > { %453 = vst.msk [vmem:[#allocation3 + $0x90] sm:$0xff] %vm402_vm0, %v4259_v4  ;;  %454 = vst.msk [vmem:[#allocation3 + $0x98] sm:$0xff] %vm402_vm0, %v4259_v4  ;;  %v3316_v17 = vpack.c.bf16 %v562_v15, %v561_v14 }
  0xd7   : > { %455 = vst.msk [vmem:[#allocation3 + $0xa0] sm:$0xff] %vm402_vm0, %v4259_v4  ;;  %456 = vst.msk [vmem:[#allocation3 + $0xa8] sm:$0xff] %vm402_vm0, %v4259_v4 }
  0xd8   : > { %457 = vst.msk [vmem:[#allocation3 + $0xb0] sm:$0xff] %vm402_vm0, %v4259_v4  ;;  %458 = vst.msk [vmem:[#allocation3 + $0xb8] sm:$0xff] %vm402_vm0, %v4259_v4 }
  0xd9   : > { %459 = vst.msk [vmem:[#allocation3 + $0xc0] sm:$0xff] %vm402_vm0, %v4259_v4  ;;  %460 = vst.msk [vmem:[#allocation3 + $0xc8] sm:$0xff] %vm402_vm0, %v4259_v4 }
  0xda   : > { %461 = vst.msk [vmem:[#allocation3 + $0xd0] sm:$0xff] %vm402_vm0, %v4259_v4  ;;  %462 = vst.msk [vmem:[#allocation3 + $0xd8] sm:$0xff] %vm402_vm0, %v4259_v4 }
  0xdb   : > { %463 = vst.msk [vmem:[#allocation3 + $0xe0] sm:$0xff] %vm402_vm0, %v4259_v4  ;;  %464 = vst.msk [vmem:[#allocation3 + $0xe8] sm:$0xff] %vm402_vm0, %v4259_v4 }
  0xdc   : > { %465 = vst.msk [vmem:[#allocation3 + $0xf0] sm:$0xff] %vm402_vm0, %v4259_v4  ;;  %466 = vst.msk [vmem:[#allocation3 + $0xf8] sm:$0xff] %vm402_vm0, %v4259_v4 }
  0xdd   : > { %467 = vst [vmem:[%s4642_s3] sm:$0xff] %v4259_v4  ;;  %468 = vst [vmem:[%s4642_s3 + $0x8] sm:$0xff] %v4259_v4 }
  0xde   : > { %469 = vst [vmem:[%s4642_s3 + $0x10] sm:$0xff] %v4259_v4  ;;  %470 = vst [vmem:[%s4642_s3 + $0x18] sm:$0xff] %v4259_v4 }
  0xdf   : > { %471 = vst [vmem:[%s4642_s3 + $0x20] sm:$0xff] %v4259_v4  ;;  %472 = vst [vmem:[%s4642_s3 + $0x28] sm:$0xff] %v4259_v4 }
  0xe0   : > { %473 = vst [vmem:[%s4642_s3 + $0x30] sm:$0xff] %v4259_v4  ;;  %474 = vst [vmem:[%s4642_s3 + $0x38] sm:$0xff] %v4259_v4 }
  0xe1   : > { %475 = vst [vmem:[%s4642_s3 + $0x40] sm:$0xff] %v4259_v4  ;;  %476 = vst [vmem:[%s4642_s3 + $0x48] sm:$0xff] %v4259_v4 }
  0xe2   : > { %477 = vst [vmem:[%s4642_s3 + $0x50] sm:$0xff] %v4259_v4  ;;  %478 = vst [vmem:[%s4642_s3 + $0x58] sm:$0xff] %v4259_v4 }
  0xe3   : > { %479 = vst [vmem:[%s4642_s3 + $0x60] sm:$0xff] %v4259_v4  ;;  %480 = vst [vmem:[%s4642_s3 + $0x68] sm:$0xff] %v4259_v4 }
  0xe4   : > { %481 = vst [vmem:[%s4642_s3 + $0x70] sm:$0xff] %v4259_v4  ;;  %482 = vst [vmem:[%s4642_s3 + $0x78] sm:$0xff] %v4259_v4 }
  0xe5   : > { %483 = vst [vmem:[%s4642_s3 + $0x80] sm:$0xff] %v4259_v4  ;;  %484 = vst [vmem:[%s4642_s3 + $0x88] sm:$0xff] %v4259_v4 }
  0xe6   : > { %485 = vst [vmem:[%s4642_s3 + $0x90] sm:$0xff] %v4259_v4  ;;  %486 = vst [vmem:[%s4642_s3 + $0x98] sm:$0xff] %v4259_v4 }
  0xe7   : > { %487 = vst [vmem:[%s4642_s3 + $0xa0] sm:$0xff] %v4259_v4  ;;  %488 = vst [vmem:[%s4642_s3 + $0xa8] sm:$0xff] %v4259_v4 }
  0xe8   : > { %489 = vst [vmem:[%s4642_s3 + $0xb0] sm:$0xff] %v4259_v4  ;;  %490 = vst [vmem:[%s4642_s3 + $0xb8] sm:$0xff] %v4259_v4 }
  0xe9   : > { %491 = vst [vmem:[%s4642_s3 + $0xc0] sm:$0xff] %v4259_v4  ;;  %492 = vst [vmem:[%s4642_s3 + $0xc8] sm:$0xff] %v4259_v4 }
  0xea   : > { %493 = vst [vmem:[%s4642_s3 + $0xd0] sm:$0xff] %v4259_v4  ;;  %494 = vst [vmem:[%s4642_s3 + $0xd8] sm:$0xff] %v4259_v4 }
  0xeb   : > { %495 = vst [vmem:[%s4642_s3 + $0xe0] sm:$0xff] %v4259_v4  ;;  %496 = vst [vmem:[%s4642_s3 + $0xe8] sm:$0xff] %v4259_v4 }
  0xec   : > { %497 = vst [vmem:[%s4642_s3 + $0xf0] sm:$0xff] %v4259_v4  ;;  %498 = vst [vmem:[%s4642_s3 + $0xf8] sm:$0xff] %v4259_v4  ;;  %v3296_v4 = vpack.c.bf16 %v554_v60, %v553_v59 }
  0xed   : > { %3242 = vst [vmem:[#allocation4] sm:$0xff] %v3241_v13   ;;  %3318 = vst [vmem:[#allocation4 + $0x8] sm:$0xff] %v3246_v18   ;;  %v3306_v13 = vpack.c.bf16 %v558_v6, %v557_v5 }
  0xee   : > { %3319 = vst [vmem:[#allocation4 + $0x10] sm:$0xff] %v3251_v23   ;;  %3320 = vst [vmem:[#allocation4 + $0x18] sm:$0xff] %v3256_v28  }
  0xef   : > { %3321 = vst [vmem:[#allocation4 + $0x20] sm:$0xff] %v3261_v33   ;;  %3322 = vst [vmem:[#allocation4 + $0x28] sm:$0xff] %v3266_v38  }
  0xf0   : > { %3323 = vst [vmem:[#allocation4 + $0x30] sm:$0xff] %v3271_v43   ;;  %3324 = vst [vmem:[#allocation4 + $0x38] sm:$0xff] %v3276_v48  }
  0xf1   : > { %3325 = vst [vmem:[#allocation4 + $0x40] sm:$0xff] %v3281_v53   ;;  %3326 = vst [vmem:[#allocation4 + $0x48] sm:$0xff] %v3286_v58  }
  0xf2   : > { %3327 = vst [vmem:[#allocation4 + $0x50] sm:$0xff] %v3291_v63   ;;  %3328 = vst [vmem:[#allocation4 + $0x58] sm:$0xff] %v3296_v4  }
  0xf3   : > { %3329 = vst [vmem:[#allocation4 + $0x60] sm:$0xff] %v3301_v9   ;;  %3330 = vst [vmem:[#allocation4 + $0x68] sm:$0xff] %v3306_v13  }
  0xf4   : > { %3331 = vst [vmem:[#allocation4 + $0x70] sm:$0xff] %v3311_v16   ;;  %3332 = vst [vmem:[#allocation4 + $0x78] sm:$0xff] %v3316_v17  }
  0xf5 PF: > { %v785_v18 = vld [vmem:[%s4626_s13 + $0xf0] sm:$0xff]  ;;  %v786_v19 = vld [vmem:[%s4626_s13 + $0xf8] sm:$0xff]  ;;  %v783_v23 = vld [vmem:[%s4626_s13 + $0xe0] sm:$0xff]  ;;  %s6359_s11 = sld [smem:[#allocation24_spill]]  ;;  %vm2041_vm1 = vcmask 7168  }
  0xf6   : > { %v769_v20 = vld [vmem:[%s4626_s13 + $0x70] sm:$0xff]  ;;  %v802_v21 = vpack.c.bf16 %v786_v19, %v785_v18  ;;  %v770_v22 = vld [vmem:[%s4626_s13 + $0x78] sm:$0xff]  ;;  %v784_v24 = vld [vmem:[%s4626_s13 + $0xe8] sm:$0xff] }
  0xf7   : > { %v794_v25 = vpack.c.bf16 %v770_v22, %v769_v20  ;;  %v801_v26 = vpack.c.bf16 %v784_v24, %v783_v23  ;;  %v767_v27 = vld [vmem:[%s4626_s13 + $0x60] sm:$0xff]  ;;  %v768_v28 = vld [vmem:[%s4626_s13 + $0x68] sm:$0xff]  ;;  %v781_v29 = vld [vmem:[%s4626_s13 + $0xd0] sm:$0xff] }
  0xf8   : > { %3333 = vmatprep.subr.bf16.mxu0 %v802_v21  ;;  %v782_v30 = vld [vmem:[%s4626_s13 + $0xd8] sm:$0xff]  ;;  %v793_v31 = vpack.c.bf16 %v768_v28, %v767_v27  ;;  %v765_v33 = vld [vmem:[%s4626_s13 + $0x50] sm:$0xff]  ;;  %v3678_v34 = vld [vmem:[#allocation4] sm:$0xff]  }
  0xf9   : > { %3334 = vmatpush3.bf16.xpose.msra.mxu0 %v794_v25  ;;  %v800_v32 = vpack.c.bf16 %v782_v30, %v781_v29  ;;  %v766_v35 = vld [vmem:[%s4626_s13 + $0x58] sm:$0xff]  ;;  %v779_v36 = vld [vmem:[%s4626_s13 + $0xc0] sm:$0xff]  ;;  %3349 = vmatprep.mubr.bf16.mxu0 %v3678_v34  ;;  %v780_v37 = vld [vmem:[%s4626_s13 + $0xc8] sm:$0xff] }
  0xfa   : > { %3335 = vmatprep.subr.bf16.mxu0 %v801_v26  ;;  %v792_v38 = vpack.c.bf16 %v766_v35, %v765_v33  ;;  %v799_v39 = vpack.c.bf16 %v780_v37, %v779_v36  ;;  %v763_v40 = vld [vmem:[%s4626_s13 + $0x40] sm:$0xff]  ;;  %v764_v41 = vld [vmem:[%s4626_s13 + $0x48] sm:$0xff]  ;;  %v777_v42 = vld [vmem:[%s4626_s13 + $0xb0] sm:$0xff] }
  0xfb   : > { %v778_v43 = vld [vmem:[%s4626_s13 + $0xb8] sm:$0xff]  ;;  %v791_v44 = vpack.c.bf16 %v764_v41, %v763_v40  ;;  %v761_v46 = vld [vmem:[%s4626_s13 + $0x30] sm:$0xff]  ;;  %v775_v48 = vld [vmem:[%s4626_s13 + $0xa0] sm:$0xff]  ;;  %s3179_s4 = sshll.u32 %s6359_s11, 8  ;;  %p3197_p9 = scmp.ne.s32.totalorder %s6359_s11, 1 }
  0xfc   : > { %v798_v45 = vpack.c.bf16 %v778_v43, %v777_v42  ;;  %v762_v47 = vld [vmem:[%s4626_s13 + $0x38] sm:$0xff]  ;;  %v776_v49 = vld [vmem:[%s4626_s13 + $0xa8] sm:$0xff]  ;;  %v759_v52 = vld [vmem:[%s4626_s13 + $0x20] sm:$0xff]  ;;  %s852_s28 = sshra.s32 %s3179_s4, 7 }
  0xfd   : > { %v790_v50 = vpack.c.bf16 %v762_v47, %v761_v46  ;;  %v797_v51 = vpack.c.bf16 %v776_v49, %v775_v48  ;;  %v760_v53 = vld [vmem:[%s4626_s13 + $0x28] sm:$0xff]  ;;  %v773_v54 = vld [vmem:[%s4626_s13 + $0x90] sm:$0xff]  ;;  %v774_v55 = vld [vmem:[%s4626_s13 + $0x98] sm:$0xff]  ;;  %s3180_s12 = sshll.u32 %s852_s28, 2 }
  0xfe   : > { %v789_v56 = vpack.c.bf16 %v760_v53, %v759_v52  ;;  %v796_v57 = vpack.c.bf16 %v774_v55, %v773_v54  ;;  %v757_v58 = vld [vmem:[%s4626_s13 + $0x10] sm:$0xff]  ;;  %v758_v59 = vld [vmem:[%s4626_s13 + $0x18] sm:$0xff]  ;;  %v771_v60 = vld [vmem:[%s4626_s13 + $0x80] sm:$0xff]  ;;  %s4881_s19 = scalar_lea.vmem %s352_s7, %s3180_s12 [#allocation11] }
  0xff   : > { %v772_v61 = vld [vmem:[%s4626_s13 + $0x88] sm:$0xff]  ;;  %v788_v62 = vpack.c.bf16 %v758_v59, %v757_v58  ;;  %v755_v0 = vld [vmem:[%s4626_s13] sm:$0xff]  ;;  %v3680_v4 = vld [vmem:[#allocation4 + $0x10] sm:$0xff]  }
 0x100   : > { %v795_v63 = vpack.c.bf16 %v772_v61, %v771_v60  ;;  %v756_v1 = vld [vmem:[%s4626_s13 + $0x8] sm:$0xff]  ;;  %v3681_v5 = vld [vmem:[#allocation4 + $0x18] sm:$0xff]   ;;  %v3682_v6 = vld [vmem:[#allocation4 + $0x20] sm:$0xff]  }
 0x101   : > { %3336 = vmatpush3.bf16.xpose.msra.mxu0 %v793_v31  ;;  %v787_v2 = vpack.c.bf16 %v756_v1, %v755_v0  ;;  %v3679_v3 = vld [vmem:[#allocation4 + $0x8] sm:$0xff]   ;;  %v3684_v8 = vld [vmem:[#allocation4 + $0x30] sm:$0xff]   ;;  %v3685_v9 = vld [vmem:[#allocation4 + $0x38] sm:$0xff]  }
 0x102   : > { %3337 = vmatprep.subr.bf16.mxu0 %v800_v32  ;;  %v3683_v7 = vld [vmem:[#allocation4 + $0x28] sm:$0xff]   ;;  %v3686_v10 = vld [vmem:[#allocation4 + $0x40] sm:$0xff]   ;;  %v3688_v12 = vld [vmem:[#allocation4 + $0x50] sm:$0xff]  }
 0x103   : > { %v3687_v11 = vld [vmem:[#allocation4 + $0x48] sm:$0xff]   ;;  %v3689_v13 = vld [vmem:[#allocation4 + $0x58] sm:$0xff]   ;;  %v3690_v14 = vld [vmem:[#allocation4 + $0x60] sm:$0xff]  }
 0x104   : > { %v3691_v15 = vld [vmem:[#allocation4 + $0x68] sm:$0xff]   ;;  %v3692_v16 = vld [vmem:[#allocation4 + $0x70] sm:$0xff]   ;;  %v3693_v17 = vld [vmem:[#allocation4 + $0x78] sm:$0xff]  }
 0x105   : > { %v856_v18 = vld [vmem:[%s4881_s19] sm:$0xff]  ;;  %v857_v22 = vld [vmem:[%s4881_s19 + $0x10] sm:$0xff] }
 0x106   : > { %v888_v19 = vunpack.c.l.bf16 %v856_v18  ;;  %v889_v20 = vunpack.c.h.bf16 %v856_v18  ;;  %v890_v26 = vunpack.c.l.bf16 %v857_v22  ;;  %v891_v27 = vunpack.c.h.bf16 %v857_v22  ;;  %v858_v29 = vld [vmem:[%s4881_s19 + $0x20] sm:$0xff]  ;;  %v859_v37 = vld [vmem:[%s4881_s19 + $0x30] sm:$0xff] }
 0x107   : > { %v893_v35 = vunpack.c.h.bf16 %v858_v29  ;;  %v894_v42 = vunpack.c.l.bf16 %v859_v37  ;;  %v895_v43 = vunpack.c.h.bf16 %v859_v37  ;;  %v861_v53 = vld [vmem:[%s4881_s19 + $0x50] sm:$0xff] }
 0x108   : > { %v898_v59 = vunpack.c.l.bf16 %v861_v53  ;;  %v899_v60 = vunpack.c.h.bf16 %v861_v53  ;;  %v865_v22 = vld [vmem:[%s4881_s19 + $0x90] sm:$0xff] }
 0x109   : > { %3338 = vmatpush3.bf16.xpose.msra.mxu0 %v792_v38 }
 0x10a   : > { %3339 = vmatprep.subr.bf16.mxu0 %v799_v39 }
 0x111   : > { %3340 = vmatpush3.bf16.xpose.msra.mxu0 %v791_v44 }
 0x112   : > { %3341 = vmatprep.subr.bf16.mxu0 %v798_v45  ;;  %v860_v45 = vld [vmem:[%s4881_s19 + $0x40] sm:$0xff] }
 0x119   : > { %3342 = vmatpush3.bf16.xpose.msra.mxu0 %v790_v50  ;;  %v896_v50 = vunpack.c.l.bf16 %v860_v45 }
 0x11a   : > { %3343 = vmatprep.subr.bf16.mxu0 %v797_v51  ;;  %v897_v51 = vunpack.c.h.bf16 %v860_v45 }
 0x121   : > { %3344 = vmatpush3.bf16.xpose.msra.mxu0 %v789_v56  ;;  %v4260_v56 = vmov 0  }
 0x122   : > { %3345 = vmatprep.subr.bf16.mxu0 %v796_v57  ;;  %3676 = vset.pattern.permute.xlu0 %v4260_v56 }
 0x123   : > { %3677 = vset.pattern.permute.xlu1 %v4260_v56 }
 0x129   : > { %3346 = vmatpush3.bf16.xpose.msra.mxu0 %v788_v62  ;;  %v862_v62 = vld [vmem:[%s4881_s19 + $0x60] sm:$0xff] }
 0x12a   : > { %3347 = vmatprep.subr.bf16.mxu0 %v795_v63 }
 0x131   : > { %3348 = vmatpush3.bf16.xpose.msra.mxu0 %v787_v2 }
 0x138   : > { %3350 = vmatmul.mubr.bf16.vlgmr.msra.gmra.mxu0 %v3678_v34  ;;  %v892_v34 = vunpack.c.l.bf16 %v858_v29  ;;  %v906_v29 = vunpack.c.l.bf16 %v865_v22 }
 0x139   : > { %3351 = vmatprep.mubr.bf16.mxu0 %v3679_v3 }
 0x140   : > { %3352 = vmatmul.mubr.bf16.gmra.mxu0 %v3679_v3  ;;  %v900_v3 = vunpack.c.l.bf16 %v862_v62 }
 0x141   : > { %3353 = vmatprep.mubr.bf16.mxu0 %v3680_v4 }
 0x148   : > { %3354 = vmatmul.mubr.bf16.gmra.mxu0 %v3680_v4  ;;  %v901_v4 = vunpack.c.h.bf16 %v862_v62 }
 0x149   : > { %3355 = vmatprep.mubr.bf16.mxu0 %v3681_v5 }
 0x150   : > { %3356 = vmatmul.mubr.bf16.gmra.mxu0 %v3681_v5 }
 0x151   : > { %3357 = vmatprep.mubr.bf16.mxu0 %v3682_v6 }
 0x158   : > { %3358 = vmatmul.mubr.bf16.gmra.mxu0 %v3682_v6  ;;  %v863_v6 = vld [vmem:[%s4881_s19 + $0x70] sm:$0xff] }
 0x159   : > { %3359 = vmatprep.mubr.bf16.mxu0 %v3683_v7 }
 0x160   : > { %3360 = vmatmul.mubr.bf16.gmra.mxu0 %v3683_v7 }
 0x161   : > { %3361 = vmatprep.mubr.bf16.mxu0 %v3684_v8 }
 0x168   : > { %3362 = vmatmul.mubr.bf16.gmra.mxu0 %v3684_v8 }
 0x169   : > { %3363 = vmatprep.mubr.bf16.mxu0 %v3685_v9 }
 0x170   : > { %3364 = vmatmul.mubr.bf16.gmra.mxu0 %v3685_v9 }
 0x171   : > { %3365 = vmatprep.mubr.bf16.mxu0 %v3686_v10 }
 0x178   : > { %3366 = vmatmul.mubr.bf16.gmra.mxu0 %v3686_v10 }
 0x179   : > { %3367 = vmatprep.mubr.bf16.mxu0 %v3687_v11 }
 0x180   : > { %3368 = vmatmul.mubr.bf16.gmra.mxu0 %v3687_v11  ;;  %v902_v11 = vunpack.c.l.bf16 %v863_v6 }
 0x181   : > { %3369 = vmatprep.mubr.bf16.mxu0 %v3688_v12 }
 0x188   : > { %3370 = vmatmul.mubr.bf16.gmra.mxu0 %v3688_v12  ;;  %v903_v12 = vunpack.c.h.bf16 %v863_v6 }
 0x189   : > { %3371 = vmatprep.mubr.bf16.mxu0 %v3689_v13 }
 0x190   : > { %3372 = vmatmul.mubr.bf16.gmra.mxu0 %v3689_v13 }
 0x191   : > { %3373 = vmatprep.mubr.bf16.mxu0 %v3690_v14 }
 0x198   : > { %3374 = vmatmul.mubr.bf16.gmra.mxu0 %v3690_v14  ;;  %v864_v14 = vld [vmem:[%s4881_s19 + $0x80] sm:$0xff] }
 0x199   : > { %3375 = vmatprep.mubr.bf16.mxu0 %v3691_v15 }
 0x1a0   : > { %3376 = vmatmul.mubr.bf16.gmra.mxu0 %v3691_v15 }
 0x1a1   : > { %3377 = vmatprep.mubr.bf16.mxu0 %v3692_v16 }
 0x1a8   : > { %3378 = vmatmul.mubr.bf16.gmra.mxu0 %v3692_v16 }
 0x1a9   : > { %3379 = vmatprep.mubr.bf16.mxu0 %v3693_v17 }
 0x1b0   : > { %3380 = vmatmul.mubr.bf16.gmra.mxu0 %v3693_v17 }
 0x1f8   : > { %v1082_v21 = vpop.f32.mrf.mxu0 }
 0x1f9   : > { %v4885_v24 = vadd.f32 %v1082_v21, %v888_v19  ;;  %v904_v19 = vunpack.c.l.bf16 %v864_v14 }
 0x1fa   : > { %v1084_v23 = vpop.f32.mrf.mxu0 }
 0x1fb   : > { %v4887_v25 = vadd.f32 %v1084_v23, %v889_v20  ;;  %v905_v20 = vunpack.c.h.bf16 %v864_v14 }
 0x1fc   : > { %v1086_v28 = vpop.f32.mrf.mxu0 }
 0x1fd   : > { %v1273_v30 = vmax.f32 %v4885_v24, %v4887_v25  ;;  %v4892_v32 = vadd.f32 %v1086_v28, %v890_v26 }
 0x1fe   : > { %v1088_v31 = vpop.f32.mrf.mxu0 }
 0x1ff   : > { %v4894_v33 = vadd.f32 %v1088_v31, %v891_v27  ;;  %1274 = vmax.xlane.f32.xlu0 %v1273_v30  ;;  %v907_v30 = vunpack.c.h.bf16 %v865_v22 }
 0x200   : > { %v1092_v36 = vpop.f32.mrf.mxu0 }
 0x201   : > { %v1276_v38 = vmax.f32 %v4892_v32, %v4894_v33  ;;  %v4899_v40 = vadd.f32 %v1092_v36, %v892_v34  ;;  %v866_v34 = vld [vmem:[%s4881_s19 + $0xa0] sm:$0xff] }
 0x202   : > { %v1094_v39 = vpop.f32.mrf.mxu0 }
 0x203   : > { %v4901_v41 = vadd.f32 %v1094_v39, %v893_v35  ;;  %1277 = vmax.xlane.f32.xlu0 %v1276_v38  ;;  %v908_v39 = vunpack.c.l.bf16 %v866_v34 }
 0x204   : > { %v1096_v44 = vpop.f32.mrf.mxu0 }
 0x205   : > { %v1279_v46 = vmax.f32 %v4899_v40, %v4901_v41  ;;  %v4906_v48 = vadd.f32 %v1096_v44, %v894_v42  ;;  %v909_v42 = vunpack.c.h.bf16 %v866_v34  ;;  %v867_v44 = vld [vmem:[%s4881_s19 + $0xb0] sm:$0xff] }
 0x206   : > { %v1098_v47 = vpop.f32.mrf.mxu0  ;;  %v911_v53 = vunpack.c.h.bf16 %v867_v44 }
 0x207   : > { %v4908_v49 = vadd.f32 %v1098_v47, %v895_v43  ;;  %1280 = vmax.xlane.f32.xlu1 %v1279_v46  ;;  %v868_v47 = vld [vmem:[%s4881_s19 + $0xc0] sm:$0xff] }
 0x208   : > { %v1102_v52 = vpop.f32.mrf.mxu0  ;;  %v912_v56 = vunpack.c.l.bf16 %v868_v47 }
 0x209   : > { %v1282_v54 = vmax.f32 %v4906_v48, %v4908_v49  ;;  %v4913_v57 = vadd.f32 %v1102_v52, %v896_v50  ;;  %v910_v52 = vunpack.c.l.bf16 %v867_v44 }
 0x20a   : > { %v1104_v55 = vpop.f32.mrf.mxu0 }
 0x20b   : > { %v4915_v58 = vadd.f32 %v1104_v55, %v897_v51  ;;  %1283 = vmax.xlane.f32.xlu1 %v1282_v54 }
 0x20c   : > { %v1106_v61 = vpop.f32.mrf.mxu0 }
 0x20d   : > { %v1285_v63 = vmax.f32 %v4913_v57, %v4915_v58  ;;  %v4920_v1 = vadd.f32 %v1106_v61, %v898_v59 }
 0x20e   : > { %v1108_v0 = vpop.f32.mrf.mxu0 }
 0x20f   : > { %v4922_v2 = vadd.f32 %v1108_v0, %v899_v60  ;;  %1286 = vmax.xlane.f32.xlu0 %v1285_v63  ;;  %v869_v60 = vld [vmem:[%s4881_s19 + $0xd0] sm:$0xff]  ;;  %v913_v63 = vunpack.c.h.bf16 %v868_v47 }
 0x210   : > { %v1112_v5 = vpop.f32.mrf.mxu0 }
 0x211   : > { %v1288_v7 = vmax.f32 %v4920_v1, %v4922_v2  ;;  %v4927_v9 = vadd.f32 %v1112_v5, %v900_v3  ;;  %v914_v5 = vunpack.c.l.bf16 %v869_v60 }
 0x212   : > { %v1114_v8 = vpop.f32.mrf.mxu0 }
 0x213   : > { %v4929_v10 = vadd.f32 %v1114_v8, %v901_v4  ;;  %1289 = vmax.xlane.f32.xlu1 %v1288_v7  ;;  %v870_v7 = vld [vmem:[%s4881_s19 + $0xe0] sm:$0xff] }
 0x214   : > { %v1116_v13 = vpop.f32.mrf.mxu0  ;;  %v916_v14 = vunpack.c.l.bf16 %v870_v7 }
 0x215   : > { %v1291_v15 = vmax.f32 %v4927_v9, %v4929_v10  ;;  %v4934_v17 = vadd.f32 %v1116_v13, %v902_v11  ;;  %v915_v11 = vunpack.c.h.bf16 %v869_v60 }
 0x216   : > { %v1118_v16 = vpop.f32.mrf.mxu0 }
 0x217   : > { %v4936_v18 = vadd.f32 %v1118_v16, %v903_v12  ;;  %1292 = vmax.xlane.f32.xlu0 %v1291_v15 }
 0x218   : > { %v1122_v21 = vpop.f32.mrf.mxu0 }
 0x219   : > { %v1294_v23 = vmax.f32 %v4934_v17, %v4936_v18  ;;  %v4941_v27 = vadd.f32 %v1122_v21, %v904_v19  ;;  %v871_v19 = vld [vmem:[%s4881_s19 + $0xf0] sm:$0xff]  ;;  %v917_v21 = vunpack.c.h.bf16 %v870_v7 }
 0x21a   : > { %v1124_v26 = vpop.f32.mrf.mxu0 }
 0x21b   : > { %v4943_v28 = vadd.f32 %v1124_v26, %v905_v20  ;;  %1295 = vmax.xlane.f32.xlu1 %v1294_v23  ;;  %v918_v26 = vunpack.c.l.bf16 %v871_v19 }
 0x21c   : > { %v1126_v31 = vpop.f32.mrf.mxu0 }
 0x21d   : > { %v1297_v35 = vmax.f32 %v4941_v27, %v4943_v28  ;;  %v4948_v37 = vadd.f32 %v1126_v31, %v906_v29  ;;  %v872_v31 = vld [vmem:[%s4881_s19 + $0x100] sm:$0xff] }
 0x21e   : > { %v1128_v36 = vpop.f32.mrf.mxu0  ;;  %v921_v47 = vunpack.c.h.bf16 %v872_v31 }
 0x21f   : > { %v4950_v38 = vadd.f32 %v1128_v36, %v907_v30  ;;  %1298 = vmax.xlane.f32.xlu0 %v1297_v35  ;;  %v919_v35 = vunpack.c.h.bf16 %v871_v19 }
 0x220   : > { %v1132_v43 = vpop.f32.mrf.mxu0 }
 0x221   : > { %v1300_v45 = vmax.f32 %v4948_v37, %v4950_v38  ;;  %v4956_v50 = vadd.f32 %v1132_v43, %v908_v39 }
 0x222   : > { %v1134_v46 = vpop.f32.mrf.mxu0 }
 0x223   : > { %v4958_v51 = vadd.f32 %v1134_v46, %v909_v42  ;;  %1301 = vmax.xlane.f32.xlu1 %v1300_v45  ;;  %v920_v42 = vunpack.c.l.bf16 %v872_v31  ;;  %v873_v45 = vld [vmem:[%s4881_s19 + $0x110] sm:$0xff] }
 0x224   : > { %v1136_v54 = vpop.f32.mrf.mxu0 }
 0x225   : > { %v1303_v55 = vmax.f32 %v4956_v50, %v4958_v51  ;;  %v4963_v61 = vadd.f32 %v1136_v54, %v910_v52  ;;  %v922_v54 = vunpack.c.l.bf16 %v873_v45 }
 0x226   : > { %v1138_v59 = vpop.f32.mrf.mxu0 }
 0x227   : > { %v4965_v62 = vadd.f32 %v1138_v59, %v911_v53  ;;  %1304 = vmax.xlane.f32.xlu0 %v1303_v55  ;;  %v874_v59 = vld [vmem:[%s4881_s19 + $0x120] sm:$0xff] }
 0x228   : > { %v1142_v0 = vpop.f32.mrf.mxu0 }
 0x229   : > { %v4967_v3 = vadd.f32 %v1142_v0, %v912_v56  ;;  %v1306_v4 = vmax.f32 %v4963_v61, %v4965_v62 }
 0x22a   : > { %v1144_v6 = vpop.f32.mrf.mxu0 }
 0x22b   : > { %6360 = vst [vmem:[#allocation39_spill] sm:$0xff] %v4967_v3  ;;  %v4972_v8 = vadd.f32 %v1144_v6, %v913_v63  ;;  %1307 = vmax.xlane.f32.xlu1 %v1306_v4  ;;  %v923_v63 = vunpack.c.h.bf16 %v873_v45 }
 0x22c   : > { %v1146_v12 = vpop.f32.mrf.mxu0 }
 0x22d   : > { %6361 = vst [vmem:[#allocation40_spill] sm:$0xff] %v4972_v8  ;;  %v4974_v13 = vadd.f32 %v1146_v12, %v914_v5  ;;  %v1309_v15 = vmax.f32 %v4967_v3, %v4972_v8  ;;  %v924_v5 = vunpack.c.l.bf16 %v874_v59  ;;  %v5269_v3 = vld [vmem:[#allocation2 + $0x78] sm:$0xff] }
 0x22e   : > { %v1148_v16 = vpop.f32.mrf.mxu0  ;;  %6403 = vst [vmem:[#allocation82_spill] sm:$0xff] %v5269_v3 }
 0x22f   : > { %6362 = vst [vmem:[#allocation41_spill] sm:$0xff] %v4974_v13  ;;  %v4979_v20 = vadd.f32 %v1148_v16, %v915_v11  ;;  %1310 = vmax.xlane.f32.xlu0 %v1309_v15  ;;  %v875_v11 = vld [vmem:[%s4881_s19 + $0x130] sm:$0xff] }
 0x230   : > { %v1152_v22 = vpop.f32.mrf.mxu0  ;;  %v926_v19 = vunpack.c.l.bf16 %v875_v11 }
 0x231   : > { %6363 = vst [vmem:[#allocation42_spill] sm:$0xff] %v4979_v20  ;;  %v4981_v23 = vadd.f32 %v1152_v22, %v916_v14  ;;  %v1312_v29 = vmax.f32 %v4974_v13, %v4979_v20  ;;  %v925_v14 = vunpack.c.h.bf16 %v874_v59 }
 0x232   : > { %v1154_v30 = vpop.f32.mrf.mxu0 }
 0x233   : > { %6364 = vst [vmem:[#allocation43_spill] sm:$0xff] %v4981_v23  ;;  %v4986_v34 = vadd.f32 %v1154_v30, %v917_v21  ;;  %1313 = vmax.xlane.f32.xlu1 %v1312_v29  ;;  %v927_v30 = vunpack.c.h.bf16 %v875_v11 }
 0x234   : > { %v1156_v36 = vpop.f32.mrf.mxu0 }
 0x235   : > { %6365 = vst [vmem:[#allocation44_spill] sm:$0xff] %v4986_v34  ;;  %v4988_v39 = vadd.f32 %v1156_v36, %v918_v26  ;;  %v1315_v43 = vmax.f32 %v4981_v23, %v4986_v34  ;;  %v876_v26 = vld [vmem:[%s4881_s19 + $0x140] sm:$0xff]  ;;  %v887_v34 = vld [vmem:[%s4881_s19 + $0x1f0] sm:$0xff] }
 0x236   : > { %v1158_v44 = vpop.f32.mrf.mxu0  ;;  %v928_v36 = vunpack.c.l.bf16 %v876_v26  ;;  %v950_v13 = vunpack.c.l.bf16 %v887_v34  ;;  %v951_v8 = vunpack.c.h.bf16 %v887_v34  ;;  %v5303_v34 = vld [vmem:[#allocation2 + $0x90] sm:$0xff] }
 0x237   : > { %6366 = vst [vmem:[#allocation45_spill] sm:$0xff] %v4988_v39  ;;  %v4993_v46 = vadd.f32 %v1158_v44, %v919_v35  ;;  %1316 = vmax.xlane.f32.xlu0 %v1315_v43  ;;  %v877_v44 = vld [vmem:[%s4881_s19 + $0x150] sm:$0xff]  ;;  %6409 = vst [vmem:[#allocation88_spill] sm:$0xff] %v5303_v34 }
 0x238   : > { %v1162_v52 = vpop.f32.mrf.mxu0 }
 0x239   : > { %6367 = vst [vmem:[#allocation46_spill] sm:$0xff] %v4993_v46  ;;  %v4995_v53 = vadd.f32 %v1162_v52, %v920_v42  ;;  %v1318_v55 = vmax.f32 %v4988_v39, %v4993_v46  ;;  %v5250_v46 = vld [vmem:[#allocation2 + $0x68] sm:$0xff] }
 0x23a   : > { %v1164_v56 = vpop.f32.mrf.mxu0  ;;  %6401 = vst [vmem:[#allocation80_spill] sm:$0xff] %v5250_v46 }
 0x23b   : > { %6368 = vst [vmem:[#allocation47_spill] sm:$0xff] %v4995_v53  ;;  %v5000_v60 = vadd.f32 %v1164_v56, %v921_v47  ;;  %1319 = vmax.xlane.f32.xlu1 %v1318_v55  ;;  %v929_v47 = vunpack.c.h.bf16 %v876_v26  ;;  %v930_v55 = vunpack.c.l.bf16 %v877_v44 }
 0x23c   : > { %v1166_v0 = vpop.f32.mrf.mxu0 }
 0x23d   : > { %6369 = vst [vmem:[#allocation48_spill] sm:$0xff] %v5000_v60  ;;  %v5002_v4 = vadd.f32 %v1166_v0, %v922_v54  ;;  %v1321_v6 = vmax.f32 %v4995_v53, %v5000_v60  ;;  %v5259_v53 = vld [vmem:[#allocation2 + $0x70] sm:$0xff] }
 0x23e   : > { %v1168_v7 = vpop.f32.mrf.mxu0  ;;  %6402 = vst [vmem:[#allocation81_spill] sm:$0xff] %v5259_v53 }
 0x23f   : > { %6370 = vst [vmem:[#allocation49_spill] sm:$0xff] %v5002_v4  ;;  %v5007_v12 = vadd.f32 %v1168_v7, %v923_v63  ;;  %1322 = vmax.xlane.f32.xlu0 %v1321_v6  ;;  %v878_v63 = vld [vmem:[%s4881_s19 + $0x160] sm:$0xff] }
 0x240   : > { %v1172_v15 = vpop.f32.mrf.mxu0  ;;  %v932_v11 = vunpack.c.l.bf16 %v878_v63 }
 0x241   : > { %6371 = vst [vmem:[#allocation50_spill] sm:$0xff] %v5007_v12  ;;  %v5009_v16 = vadd.f32 %v1172_v15, %v924_v5  ;;  %v1324_v21 = vmax.f32 %v5002_v4, %v5007_v12  ;;  %v931_v5 = vunpack.c.h.bf16 %v877_v44  ;;  %v5240_v4 = vld [vmem:[#allocation2 + $0x60] sm:$0xff] }
 0x242   : > { %v1174_v22 = vpop.f32.mrf.mxu0  ;;  %6400 = vst [vmem:[#allocation79_spill] sm:$0xff] %v5240_v4 }
 0x243   : > { %6372 = vst [vmem:[#allocation51_spill] sm:$0xff] %v5009_v16  ;;  %v5014_v29 = vadd.f32 %v1174_v22, %v925_v14  ;;  %1325 = vmax.xlane.f32.xlu1 %v1324_v21  ;;  %v933_v22 = vunpack.c.h.bf16 %v878_v63 }
 0x244   : > { %v1176_v31 = vpop.f32.mrf.mxu0 }
 0x245   : > { %6373 = vst [vmem:[#allocation52_spill] sm:$0xff] %v5014_v29  ;;  %v5016_v35 = vadd.f32 %v1176_v31, %v926_v19  ;;  %v1327_v42 = vmax.f32 %v5009_v16, %v5014_v29  ;;  %v879_v19 = vld [vmem:[%s4881_s19 + $0x170] sm:$0xff] }
 0x246   : > { %v1178_v43 = vpop.f32.mrf.mxu0  ;;  %v934_v31 = vunpack.c.l.bf16 %v879_v19  ;;  %v5220_v16 = vld [vmem:[#allocation2 + $0x50] sm:$0xff] }
 0x247   : > { %6374 = vst [vmem:[#allocation53_spill] sm:$0xff] %v5016_v35  ;;  %v5021_v45 = vadd.f32 %v1178_v43, %v927_v30  ;;  %1328 = vmax.xlane.f32.xlu0 %v1327_v42  ;;  %v880_v43 = vld [vmem:[%s4881_s19 + $0x180] sm:$0xff]  ;;  %6396 = vst [vmem:[#allocation75_spill] sm:$0xff] %v5220_v16 }
 0x248   : > { %v1182_v52 = vpop.f32.mrf.mxu0 }
 0x249   : > { %6375 = vst [vmem:[#allocation54_spill] sm:$0xff] %v5021_v45  ;;  %v5023_v54 = vadd.f32 %v1182_v52, %v928_v36  ;;  %v1330_v56 = vmax.f32 %v5016_v35, %v5021_v45  ;;  %v820_v35 = vld [vmem:[%s4635_s25 + $0x88] sm:$0xff] }
 0x24a   : > { %v1184_v59 = vpop.f32.mrf.mxu0 }
 0x24b   : > { %6376 = vst [vmem:[#allocation55_spill] sm:$0xff] %v5023_v54  ;;  %v5028_v0 = vadd.f32 %v1184_v59, %v929_v47  ;;  %1331 = vmax.xlane.f32.xlu1 %v1330_v56  ;;  %v935_v47 = vunpack.c.h.bf16 %v879_v19  ;;  %v936_v56 = vunpack.c.l.bf16 %v880_v43 }
 0x24c   : > { %v1186_v6 = vpop.f32.mrf.mxu0 }
 0x24d   : > { %6377 = vst [vmem:[#allocation56_spill] sm:$0xff] %v5028_v0  ;;  %v5030_v7 = vadd.f32 %v1186_v6, %v930_v55  ;;  %v1333_v14 = vmax.f32 %v5023_v54, %v5028_v0 }
 0x24e   : > { %v1188_v15 = vpop.f32.mrf.mxu0 }
 0x24f   : > { %6378 = vst [vmem:[#allocation57_spill] sm:$0xff] %v5030_v7  ;;  %v5035_v21 = vadd.f32 %v1188_v15, %v931_v5  ;;  %1334 = vmax.xlane.f32.xlu1 %v1333_v14  ;;  %v881_v5 = vld [vmem:[%s4881_s19 + $0x190] sm:$0xff] }
 0x250   : > { %v1192_v26 = vpop.f32.mrf.mxu0  ;;  %v938_v19 = vunpack.c.l.bf16 %v881_v5 }
 0x251   : > { %6379 = vst [vmem:[#allocation58_spill] sm:$0xff] %v5035_v21  ;;  %v5037_v30 = vadd.f32 %v1192_v26, %v932_v11  ;;  %v1336_v36 = vmax.f32 %v5030_v7, %v5035_v21  ;;  %v937_v11 = vunpack.c.h.bf16 %v880_v43 }
 0x252   : > { %v1194_v42 = vpop.f32.mrf.mxu0 }
 0x253   : > { %6380 = vst [vmem:[#allocation59_spill] sm:$0xff] %v5037_v30  ;;  %v5042_v44 = vadd.f32 %v1194_v42, %v933_v22  ;;  %1337 = vmax.xlane.f32.xlu0 %v1336_v36  ;;  %v939_v42 = vunpack.c.h.bf16 %v881_v5 }
 0x254   : > { %v1196_v52 = vpop.f32.mrf.mxu0 }
 0x255   : > { %6381 = vst [vmem:[#allocation60_spill] sm:$0xff] %v5042_v44  ;;  %v5044_v55 = vadd.f32 %v1196_v52, %v934_v31  ;;  %v1339_v59 = vmax.f32 %v5037_v30, %v5042_v44  ;;  %v882_v31 = vld [vmem:[%s4881_s19 + $0x1a0] sm:$0xff] }
 0x256   : > { %v1198_v63 = vpop.f32.mrf.mxu0  ;;  %v940_v43 = vunpack.c.l.bf16 %v882_v31  ;;  %v941_v44 = vunpack.c.h.bf16 %v882_v31 }
 0x257   : > { %6382 = vst [vmem:[#allocation61_spill] sm:$0xff] %v5044_v55  ;;  %v5049_v6 = vadd.f32 %v1198_v63, %v935_v47  ;;  %1340 = vmax.xlane.f32.xlu1 %v1339_v59  ;;  %v883_v63 = vld [vmem:[%s4881_s19 + $0x1b0] sm:$0xff] }
 0x258   : > { %v1202_v14 = vpop.f32.mrf.mxu0  ;;  %v942_v5 = vunpack.c.l.bf16 %v883_v63  ;;  %v943_v0 = vunpack.c.h.bf16 %v883_v63 }
 0x259   : > { %6383 = vst [vmem:[#allocation62_spill] sm:$0xff] %v5049_v6  ;;  %v5051_v15 = vadd.f32 %v1202_v14, %v936_v56  ;;  %v1342_v22 = vmax.f32 %v5044_v55, %v5049_v6  ;;  %v5230_v55 = vld [vmem:[#allocation2 + $0x58] sm:$0xff] }
 0x25a   : > { %v1204_v26 = vpop.f32.mrf.mxu0  ;;  %6398 = vst [vmem:[#allocation77_spill] sm:$0xff] %v5230_v55 }
 0x25b   : > { %6384 = vst [vmem:[#allocation63_spill] sm:$0xff] %v5051_v15  ;;  %v5056_v36 = vadd.f32 %v1204_v26, %v937_v11  ;;  %1343 = vmax.xlane.f32.xlu0 %v1342_v22  ;;  %v884_v26 = vld [vmem:[%s4881_s19 + $0x1c0] sm:$0xff] }
 0x25c   : > { %v1206_v52 = vpop.f32.mrf.mxu0 }
 0x25d   : > { %6385 = vst [vmem:[#allocation64_spill] sm:$0xff] %v5056_v36  ;;  %v5058_v47 = vadd.f32 %v1206_v52, %v938_v19  ;;  %v1345_v59 = vmax.f32 %v5051_v15, %v5056_v36 }
 0x25e   : > { %v1208_v56 = vpop.f32.mrf.mxu0 }
 0x25f   : > { %6386 = vst [vmem:[#allocation65_spill] sm:$0xff] %v5058_v47  ;;  %v5063_v14 = vadd.f32 %v1208_v56, %v939_v42  ;;  %1346 = vmax.xlane.f32.xlu0 %v1345_v59  ;;  %v944_v42 = vunpack.c.l.bf16 %v884_v26  ;;  %v945_v56 = vunpack.c.h.bf16 %v884_v26 }
 0x260   : > { %v1212_v30 = vpop.f32.mrf.mxu0 }
 0x261   : > { %6387 = vst [vmem:[#allocation66_spill] sm:$0xff] %v5063_v14  ;;  %v5065_v11 = vadd.f32 %v1212_v30, %v940_v43  ;;  %v1348_v22 = vmax.f32 %v5058_v47, %v5063_v14  ;;  %v885_v30 = vld [vmem:[%s4881_s19 + $0x1d0] sm:$0xff]  ;;  %v5210_v47 = vld [vmem:[#allocation2 + $0x48] sm:$0xff] }
 0x262   : > { %v1214_v19 = vpop.f32.mrf.mxu0 }
 0x263   : > { %6388 = vst [vmem:[#allocation67_spill] sm:$0xff] %v5065_v11  ;;  %v5070_v52 = vadd.f32 %v1214_v19, %v941_v44  ;;  %1349 = vmax.xlane.f32.xlu1 %v1348_v22  ;;  %v946_v44 = vunpack.c.l.bf16 %v885_v30  ;;  %v947_v22 = vunpack.c.h.bf16 %v885_v30  ;;  %v834_v30 = vld [vmem:[%s4635_s25 + $0xf8] sm:$0xff] }
 0x264   : > { %v1216_v36 = vpop.f32.mrf.mxu0 }
 0x265   : > { %6389 = vst [vmem:[#allocation68_spill] sm:$0xff] %v5070_v52  ;;  %v5072_v15 = vadd.f32 %v1216_v36, %v942_v5  ;;  %v1351_v31 = vmax.f32 %v5065_v11, %v5070_v52  ;;  %v823_v11 = vld [vmem:[%s4635_s25 + $0xa0] sm:$0xff] }
 0x266   : > { %v1218_v59 = vpop.f32.mrf.mxu0 }
 0x267   : > { %6390 = vst [vmem:[#allocation69_spill] sm:$0xff] %v5072_v15  ;;  %v5077_v43 = vadd.f32 %v1218_v59, %v943_v0  ;;  %1352 = vmax.xlane.f32.xlu1 %v1351_v31  ;;  %v833_v59 = vld [vmem:[%s4635_s25 + $0xf0] sm:$0xff] }
 0x268   : > { %v1222_v54 = vpop.f32.mrf.mxu0 }
 0x269   : > { %6391 = vst [vmem:[#allocation70_spill] sm:$0xff] %v5077_v43  ;;  %v5079_v45 = vadd.f32 %v1222_v54, %v944_v42  ;;  %v1354_v36 = vmax.f32 %v5072_v15, %v5077_v43  ;;  %v822_v43 = vld [vmem:[%s4635_s25 + $0x98] sm:$0xff]  ;;  %v819_v15 = vld [vmem:[%s4635_s25 + $0x80] sm:$0xff] }
 0x26a   : > { %v1224_v63 = vpop.f32.mrf.mxu0 }
 0x26b   : > { %6392 = vst [vmem:[#allocation71_spill] sm:$0xff] %v5079_v45  ;;  %v5083_v5 = vadd.f32 %v1224_v63, %v945_v56  ;;  %1355 = vmax.xlane.f32.xlu0 %v1354_v36  ;;  %v850_v56 = vpack.c.bf16 %v834_v30, %v833_v59  ;;  %v818_v36 = vld [vmem:[%s4635_s25 + $0x78] sm:$0xff]  ;;  %v829_v59 = vld [vmem:[%s4635_s25 + $0xd0] sm:$0xff] }
 0x26c   : > { %v1226_v0 = vpop.f32.mrf.mxu0  ;;  %v830_v30 = vld [vmem:[%s4635_s25 + $0xd8] sm:$0xff] }
 0x26d   : > { %6393 = vst [vmem:[#allocation72_spill] sm:$0xff] %v5083_v5  ;;  %v5085_v19 = vadd.f32 %v1226_v0, %v946_v44  ;;  %v1357_v54 = vmax.f32 %v5079_v45, %v5083_v5  ;;  %v817_v44 = vld [vmem:[%s4635_s25 + $0x70] sm:$0xff]  ;;  %3381 = vmatprep.subr.bf16.mxu1 %v850_v56  ;;  %v832_v0 = vld [vmem:[%s4635_s25 + $0xe8] sm:$0xff]  ;;  %v848_v52 = vpack.c.bf16 %v830_v30, %v829_v59  ;;  %v814_v56 = vld [vmem:[%s4635_s25 + $0x58] sm:$0xff] }
 0x26e   : > { %v1228_v26 = vpop.f32.mrf.mxu0  ;;  %v842_v63 = vpack.c.bf16 %v818_v36, %v817_v44  ;;  %v816_v5 = vld [vmem:[%s4635_s25 + $0x68] sm:$0xff]  ;;  %v813_v44 = vld [vmem:[%s4635_s25 + $0x50] sm:$0xff]  ;;  %v811_v59 = vld [vmem:[%s4635_s25 + $0x40] sm:$0xff] }
 0x26f   : > { %6394 = vst [vmem:[#allocation73_spill] sm:$0xff] %v5085_v19  ;;  %v5089_v42 = vadd.f32 %v1228_v26, %v947_v22  ;;  %1358 = vmax.xlane.f32.xlu0 %v1357_v54  ;;  %v831_v22 = vld [vmem:[%s4635_s25 + $0xe0] sm:$0xff] }
 0x270   : > { %3382 = vmatpush3.bf16.msra.mxu1 %v842_v63  ;;  %v849_v26 = vpack.c.bf16 %v832_v0, %v831_v22  ;;  %v815_v54 = vld [vmem:[%s4635_s25 + $0x60] sm:$0xff]  ;;  %v840_v63 = vpack.c.bf16 %v814_v56, %v813_v44  ;;  %v828_v0 = vld [vmem:[%s4635_s25 + $0xc8] sm:$0xff] }
 0x271   : > { %6395 = vst [vmem:[#allocation74_spill] sm:$0xff] %v5089_v42  ;;  %v1360_v31 = vmax.f32 %v5085_v19, %v5089_v42  ;;  %v841_v45 = vpack.c.bf16 %v816_v5, %v815_v54  ;;  %v5110_v5 = vld [vmem:[#allocation2 + $0x8] sm:$0xff]  ;;  %v821_v19 = vld [vmem:[%s4635_s25 + $0x90] sm:$0xff] }
 0x272   : > { %3383 = vmatprep.subr.bf16.mxu1 %v849_v26  ;;  %v826_v26 = vld [vmem:[%s4635_s25 + $0xb8] sm:$0xff]  ;;  %v824_v42 = vld [vmem:[%s4635_s25 + $0xa8] sm:$0xff] }
 0x273   : > { %1361 = vmax.xlane.f32.xlu1 %v1360_v31  ;;  %v5101_v31 = vld [vmem:[#allocation2] sm:$0xff] }
 0x274   : > { %3384 = vmatpush3.bf16.msra.mxu1 %v841_v45  ;;  %v827_v45 = vld [vmem:[%s4635_s25 + $0xc0] sm:$0xff] }
 0x275   : > { %3385 = vmatprep.subr.bf16.mxu1 %v848_v52  ;;  %v847_v54 = vpack.c.bf16 %v828_v0, %v827_v45  ;;  %v812_v52 = vld [vmem:[%s4635_s25 + $0x48] sm:$0xff]  ;;  %v809_v0 = vld [vmem:[%s4635_s25 + $0x30] sm:$0xff] }
 0x276   : > { %v839_v44 = vpack.c.bf16 %v812_v52, %v811_v59 }
 0x278   : > { %3386 = vmatpush3.bf16.msra.mxu1 %v840_v63  ;;  %v825_v63 = vld [vmem:[%s4635_s25 + $0xb0] sm:$0xff] }
 0x279   : > { %3387 = vmatprep.subr.bf16.mxu1 %v847_v54  ;;  %v846_v45 = vpack.c.bf16 %v826_v26, %v825_v63  ;;  %v810_v54 = vld [vmem:[%s4635_s25 + $0x38] sm:$0xff]  ;;  %v845_v26 = vpack.c.bf16 %v824_v42, %v823_v11  ;;  %v807_v63 = vld [vmem:[%s4635_s25 + $0x20] sm:$0xff]  ;;  %v844_v11 = vpack.c.bf16 %v822_v43, %v821_v19  ;;  %v805_v42 = vld [vmem:[%s4635_s25 + $0x10] sm:$0xff]  ;;  %v843_v43 = vpack.c.bf16 %v820_v35, %v819_v15 }
 0x27a   : > { %v838_v52 = vpack.c.bf16 %v810_v54, %v809_v0  ;;  %v803_v19 = vld [vmem:[%s4635_s25] sm:$0xff] }
 0x27c   : > { %3388 = vmatpush3.bf16.msra.mxu1 %v839_v44  ;;  %v5138_v44 = vld [vmem:[#allocation2 + $0x18] sm:$0xff] }
 0x27d   : > { %3389 = vmatprep.subr.bf16.mxu1 %v846_v45  ;;  %v808_v45 = vld [vmem:[%s4635_s25 + $0x28] sm:$0xff] }
 0x27e   : > { %v837_v54 = vpack.c.bf16 %v808_v45, %v807_v63 }
 0x280   : > { %3390 = vmatpush3.bf16.msra.mxu1 %v838_v52  ;;  %v5152_v52 = vld [vmem:[#allocation2 + $0x20] sm:$0xff] }
 0x281   : > { %3391 = vmatprep.subr.bf16.mxu1 %v845_v26  ;;  %v806_v26 = vld [vmem:[%s4635_s25 + $0x18] sm:$0xff] }
 0x282   : > { %v836_v45 = vpack.c.bf16 %v806_v26, %v805_v42  ;;  %v804_v42 = vld [vmem:[%s4635_s25 + $0x8] sm:$0xff] }
 0x284   : > { %3392 = vmatpush3.bf16.msra.mxu1 %v837_v54  ;;  %v5166_v54 = vld [vmem:[#allocation2 + $0x28] sm:$0xff] }
 0x285   : > { %3393 = vmatprep.subr.bf16.mxu1 %v844_v11 }
 0x288   : > { %v1275_v36 = vpop.xlane.xlu0 %1274  ;;  %3394 = vmatpush3.bf16.msra.mxu1 %v836_v45  ;;  %v5180_v45 = vld [vmem:[#allocation2 + $0x30] sm:$0xff] }
 0x289   : > { %v5108_v22 = vmax.f32 %v5101_v31, %v1275_v36  ;;  %v5124_v36 = vld [vmem:[#allocation2 + $0x10] sm:$0xff]  ;;  %3395 = vmatprep.subr.bf16.mxu1 %v843_v43 }
 0x28b   : > { %2555 = vst.msk [vmem:[#allocation2] sm:$0xff] %vm2041_vm1, %v5108_v22  ;;  %1499 = vperm.xlu0 %3676, %v5108_v22  }
 0x28c   : > { %v1278_v30 = vpop.xlane.xlu0 %1277 }
 0x28d   : > { %v5122_v56 = vmax.f32 %v5110_v5, %v1278_v30 }
 0x28f   : > { %2556 = vst.msk [vmem:[#allocation2 + $0x8] sm:$0xff] %vm2041_vm1, %v5122_v56  ;;  %1504 = vperm.xlu1 %3677, %v5122_v56  }
 0x290   : > { %v1281_v59 = vpop.xlane.xlu1 %1280 }
 0x291   : > { %v5136_v30 = vmax.f32 %v5124_v36, %v1281_v59 }
 0x293   : > { %2557 = vst.msk [vmem:[#allocation2 + $0x10] sm:$0xff] %vm2041_vm1, %v5136_v30  ;;  %1509 = vperm.xlu1 %3677, %v5136_v30  }
 0x294   : > { %v1284_v0 = vpop.xlane.xlu1 %1283 }
 0x295   : > { %v5150_v59 = vmax.f32 %v5138_v44, %v1284_v0 }
 0x297   : > { %2558 = vst.msk [vmem:[#allocation2 + $0x18] sm:$0xff] %vm2041_vm1, %v5150_v59  ;;  %1514 = vperm.xlu1 %3677, %v5150_v59  }
 0x298   : > { %v1287_v63 = vpop.xlane.xlu0 %1286 }
 0x299   : > { %v5164_v0 = vmax.f32 %v5152_v52, %v1287_v63  ;;  %v835_v63 = vpack.c.bf16 %v804_v42, %v803_v19  ;;  %v5190_v19 = vld [vmem:[#allocation2 + $0x38] sm:$0xff] }
 0x29b   : > { %2559 = vst.msk [vmem:[#allocation2 + $0x20] sm:$0xff] %vm2041_vm1, %v5164_v0  ;;  %1519 = vperm.xlu0 %3676, %v5164_v0   ;;  %3396 = vmatpush3.bf16.msra.mxu1 %v835_v63  ;;  %v5200_v63 = vld [vmem:[#allocation2 + $0x40] sm:$0xff] }
 0x29c   : > { %v1290_v26 = vpop.xlane.xlu1 %1289 }
 0x29d   : > { %v5178_v11 = vmax.f32 %v5166_v54, %v1290_v26 }
 0x29f   : > { %2560 = vst.msk [vmem:[#allocation2 + $0x28] sm:$0xff] %vm2041_vm1, %v5178_v11  ;;  %1524 = vperm.xlu0 %3676, %v5178_v11  }
 0x2a0   : > { %v1293_v35 = vpop.xlane.xlu0 %1292 }
 0x2a1   : > { %v5188_v15 = vmax.f32 %v5180_v45, %v1293_v35 }
 0x2a3   : > { %2561 = vst.msk [vmem:[#allocation2 + $0x30] sm:$0xff] %vm2041_vm1, %v5188_v15  ;;  %1529 = vperm.xlu1 %3677, %v5188_v15  }
 0x2a4   : > { %v1296_v42 = vpop.xlane.xlu1 %1295 }
 0x2a5   : > { %v5198_v26 = vmax.f32 %v5190_v19, %v1296_v42 }
 0x2a7   : > { %2562 = vst.msk [vmem:[#allocation2 + $0x38] sm:$0xff] %vm2041_vm1, %v5198_v26  ;;  %1534 = vperm.xlu1 %3677, %v5198_v26  }
 0x2a8   : > { %v1299_v43 = vpop.xlane.xlu0 %1298 }
 0x2a9   : > { %v5208_v14 = vmax.f32 %v5200_v63, %v1299_v43 }
 0x2ab   : > { %2563 = vst.msk [vmem:[#allocation2 + $0x40] sm:$0xff] %vm2041_vm1, %v5208_v14  ;;  %1539 = vperm.xlu0 %3676, %v5208_v14  }
 0x2ac   : > { %v1302_v35 = vpop.xlane.xlu1 %1301 }
 0x2ad   : > { %v5218_v29 = vmax.f32 %v5210_v47, %v1302_v35  ;;  %v1232_v35 = vpop.f32.mrf.mxu0 }
 0x2af   : > { %2564 = vst.msk [vmem:[#allocation2 + $0x48] sm:$0xff] %vm2041_vm1, %v5218_v29  ;;  %1544 = vperm.xlu0 %3676, %v5218_v29   ;;  %v1234_v39 = vpop.f32.mrf.mxu0 }
 0x2b0   : > { %v1305_v42 = vpop.xlane.xlu0 %1304 }
 0x2b1   : > { %v5228_v6 = vmax.f32 %v5220_v16, %v1305_v42  ;;  %v1236_v23 = vpop.f32.mrf.mxu0 }
 0x2b3   : > { %6397 = vst [vmem:[#allocation76_spill] sm:$0xff] %v5228_v6  ;;  %2565 = vst.msk [vmem:[#allocation2 + $0x50] sm:$0xff] %vm2041_vm1, %v5228_v6  ;;  %1549 = vperm.xlu1 %3677, %v5228_v6   ;;  %v5293_v6 = vld [vmem:[#allocation2 + $0x88] sm:$0xff] }
 0x2b4   : > { %v1308_v43 = vpop.xlane.xlu1 %1307  ;;  %6408 = vst [vmem:[#allocation87_spill] sm:$0xff] %v5293_v6 }
 0x2b5   : > { %v5238_v12 = vmax.f32 %v5230_v55, %v1308_v43  ;;  %v5282_v55 = vld [vmem:[#allocation2 + $0x80] sm:$0xff] }
 0x2b6   : > { %6406 = vst [vmem:[#allocation85_spill] sm:$0xff] %v5282_v55 }
 0x2b7   : > { %6399 = vst [vmem:[#allocation78_spill] sm:$0xff] %v5238_v12  ;;  %2566 = vst.msk [vmem:[#allocation2 + $0x58] sm:$0xff] %vm2041_vm1, %v5238_v12  ;;  %1554 = vperm.xlu1 %3677, %v5238_v12   ;;  %v5278_v12 = vadd.f32 %v1236_v23, %v950_v13 }
 0x2b8   : > { %v1311_v21 = vpop.xlane.xlu0 %1310 }
 0x2b9   : > { %v5248_v7 = vmax.f32 %v5240_v4, %v1311_v21  ;;  %6404 = vst [vmem:[#allocation83_spill] sm:$0xff] %v5278_v12 }
 0x2bb   : > { %2567 = vst.msk [vmem:[#allocation2 + $0x60] sm:$0xff] %vm2041_vm1, %v5248_v7 }
 0x2bc   : > { %v1314_v42 = vpop.xlane.xlu1 %1313 }
 0x2bd   : > { %v5257_v60 = vmax.f32 %v5250_v46, %v1314_v42  ;;  %v1238_v42 = vpop.f32.mrf.mxu0 }
 0x2bf   : > { %2568 = vst.msk [vmem:[#allocation2 + $0x68] sm:$0xff] %vm2041_vm1, %v5257_v60 }
 0x2c0   : > { %v1317_v20 = vpop.xlane.xlu0 %1316 }
 0x2c1   : > { %v5267_v43 = vmax.f32 %v5259_v53, %v1317_v20  ;;  %v5280_v20 = vadd.f32 %v1238_v42, %v951_v8  ;;  %v886_v42 = vld [vmem:[%s4881_s19 + $0x1e0] sm:$0xff] }
 0x2c2   : > { %v949_v8 = vunpack.c.h.bf16 %v886_v42 }
 0x2c3   : > { %2569 = vst.msk [vmem:[#allocation2 + $0x70] sm:$0xff] %vm2041_vm1, %v5267_v43  ;;  %6405 = vst [vmem:[#allocation84_spill] sm:$0xff] %v5280_v20 }
 0x2c4   : > { %v1320_v21 = vpop.xlane.xlu1 %1319 }
 0x2c5   : > { %v5276_v46 = vmax.f32 %v5269_v3, %v1320_v21  ;;  %v1366_v21 = vmax.f32 %v5278_v12, %v5280_v20  ;;  %v948_v12 = vunpack.c.l.bf16 %v886_v42  ;;  %v5312_v3 = vld [vmem:[#allocation2 + $0x98] sm:$0xff]  ;;  %v5325_v42 = vld [vmem:[#allocation2 + $0xa0] sm:$0xff] }
 0x2c6   : > { %6410 = vst [vmem:[#allocation89_spill] sm:$0xff] %v5312_v3  ;;  %6414 = vst [vmem:[#allocation93_spill] sm:$0xff] %v5325_v42 }
 0x2c7   : > { %2570 = vst.msk [vmem:[#allocation2 + $0x78] sm:$0xff] %vm2041_vm1, %v5276_v46  ;;  %v5318_v16 = vadd.f32 %v1232_v35, %v948_v12  ;;  %v5354_v35 = vld [vmem:[#allocation2 + $0xb8] sm:$0xff] }
 0x2c8   : > { %v1323_v4 = vpop.xlane.xlu0 %1322  ;;  %6420 = vst [vmem:[#allocation99_spill] sm:$0xff] %v5354_v35 }
 0x2c9   : > { %v5289_v53 = vmax.f32 %v5282_v55, %v1323_v4  ;;  %6411 = vst [vmem:[#allocation90_spill] sm:$0xff] %v5318_v16  ;;  %v5320_v4 = vadd.f32 %v1234_v39, %v949_v8  ;;  %v5336_v39 = vld [vmem:[#allocation2 + $0xa8] sm:$0xff] }
 0x2ca   : > { %6416 = vst [vmem:[#allocation95_spill] sm:$0xff] %v5336_v39 }
 0x2cb   : > { %6407 = vst [vmem:[#allocation86_spill] sm:$0xff] %v5289_v53  ;;  %2571 = vst.msk [vmem:[#allocation2 + $0x80] sm:$0xff] %vm2041_vm1, %v5289_v53 }
 0x2cc   : > { %v1326_v13 = vpop.xlane.xlu1 %1325  ;;  %6412 = vst [vmem:[#allocation91_spill] sm:$0xff] %v5320_v4 }
 0x2cd   : > { %v5300_v23 = vmax.f32 %v5293_v6, %v1326_v13 }
 0x2ce   : > { %1367 = vmax.xlane.f32.xlu0 %v1366_v21 }
 0x2cf   : > { %2572 = vst.msk [vmem:[#allocation2 + $0x88] sm:$0xff] %vm2041_vm1, %v5300_v23 }
 0x2d0   : > { %v1329_v20 = vpop.xlane.xlu0 %1328 }
 0x2d1   : > { %v5310_v55 = vmax.f32 %v5303_v34, %v1329_v20  ;;  %v1363_v34 = vmax.f32 %v5318_v16, %v5320_v4  ;;  %v5345_v20 = vld [vmem:[#allocation2 + $0xb0] sm:$0xff] }
 0x2d2   : > { %6418 = vst [vmem:[#allocation97_spill] sm:$0xff] %v5345_v20 }
 0x2d3   : > { %2573 = vst.msk [vmem:[#allocation2 + $0x90] sm:$0xff] %vm2041_vm1, %v5310_v55 }
 0x2d4   : > { %v1332_v21 = vpop.xlane.xlu1 %1331 }
 0x2d5   : > { %v5323_v6 = vmax.f32 %v5312_v3, %v1332_v21  ;;  %v5385_v3 = vld [vmem:[#allocation2 + $0xd0] sm:$0xff] }
 0x2d6   : > { %6425 = vst [vmem:[#allocation104_spill] sm:$0xff] %v5385_v3 }
 0x2d7   : > { %6413 = vst [vmem:[#allocation92_spill] sm:$0xff] %v5323_v6  ;;  %2574 = vst.msk [vmem:[#allocation2 + $0x98] sm:$0xff] %vm2041_vm1, %v5323_v6 }
 0x2d8   : > { %v1335_v13 = vpop.xlane.xlu1 %1334 }
 0x2d9   : > { %v5334_v12 = vmax.f32 %v5325_v42, %v1335_v13  ;;  %v5374_v42 = vld [vmem:[#allocation2 + $0xc8] sm:$0xff] }
 0x2da   : > { %6423 = vst [vmem:[#allocation102_spill] sm:$0xff] %v5374_v42 }
 0x2db   : > { %6415 = vst [vmem:[#allocation94_spill] sm:$0xff] %v5334_v12  ;;  %1364 = vmax.xlane.f32.xlu1 %v1363_v34  ;;  %2575 = vst.msk [vmem:[#allocation2 + $0xa0] sm:$0xff] %vm2041_vm1, %v5334_v12 }
 0x2dc   : > { %v1338_v8 = vpop.xlane.xlu0 %1337 }
 0x2dd   : > { %v5343_v21 = vmax.f32 %v5336_v39, %v1338_v8  ;;  %v5364_v39 = vld [vmem:[#allocation2 + $0xc0] sm:$0xff] }
 0x2de   : > { %6422 = vst [vmem:[#allocation101_spill] sm:$0xff] %v5364_v39 }
 0x2df   : > { %6417 = vst [vmem:[#allocation96_spill] sm:$0xff] %v5343_v21  ;;  %2576 = vst.msk [vmem:[#allocation2 + $0xa8] sm:$0xff] %vm2041_vm1, %v5343_v21 }
 0x2e0   : > { %v1341_v13 = vpop.xlane.xlu1 %1340 }
 0x2e1   : > { %v5352_v34 = vmax.f32 %v5345_v20, %v1341_v13 }
 0x2e3   : > { %6419 = vst [vmem:[#allocation98_spill] sm:$0xff] %v5352_v34  ;;  %2577 = vst.msk [vmem:[#allocation2 + $0xb0] sm:$0xff] %vm2041_vm1, %v5352_v34 }
 0x2e4   : > { %1559 = vperm.xlu0 %3676, %v5248_v7   ;;  %v1344_v8 = vpop.xlane.xlu0 %1343 }
 0x2e5   : > { %v5362_v4 = vmax.f32 %v5354_v35, %v1344_v8 }
 0x2e7   : > { %6421 = vst [vmem:[#allocation100_spill] sm:$0xff] %v5362_v4  ;;  %2578 = vst.msk [vmem:[#allocation2 + $0xb8] sm:$0xff] %vm2041_vm1, %v5362_v4 }
 0x2e8   : > { %1564 = vperm.xlu0 %3676, %v5257_v60   ;;  %v1347_v16 = vpop.xlane.xlu0 %1346 }
 0x2e9   : > { %v5372_v20 = vmax.f32 %v5364_v39, %v1347_v16 }
 0x2eb   : > { %2579 = vst.msk [vmem:[#allocation2 + $0xc0] sm:$0xff] %vm2041_vm1, %v5372_v20 }
 0x2ec   : > { %1569 = vperm.xlu0 %3676, %v5267_v43   ;;  %1579 = vperm.xlu1 %3677, %v5289_v53   ;;  %v1350_v13 = vpop.xlane.xlu1 %1349  ;;  %v5396_v53 = vld [vmem:[#allocation2 + $0xd8] sm:$0xff] }
 0x2ed   : > { %v5383_v35 = vmax.f32 %v5374_v42, %v1350_v13  ;;  %6426 = vst [vmem:[#allocation105_spill] sm:$0xff] %v5396_v53 }
 0x2ef   : > { %6424 = vst [vmem:[#allocation103_spill] sm:$0xff] %v5383_v35  ;;  %2580 = vst.msk [vmem:[#allocation2 + $0xc8] sm:$0xff] %vm2041_vm1, %v5383_v35 }
 0x2f0   : > { %1574 = vperm.xlu0 %3676, %v5276_v46   ;;  %1604 = vperm.xlu1 %3677, %v5343_v21   ;;  %v1353_v8 = vpop.xlane.xlu1 %1352  ;;  %v5407_v21 = vld [vmem:[#allocation2 + $0xe0] sm:$0xff] }
 0x2f1   : > { %v5394_v39 = vmax.f32 %v5385_v3, %v1353_v8  ;;  %6428 = vst [vmem:[#allocation107_spill] sm:$0xff] %v5407_v21 }
 0x2f3   : > { %2581 = vst.msk [vmem:[#allocation2 + $0xd0] sm:$0xff] %vm2041_vm1, %v5394_v39 }
 0x2f4   : > { %1584 = vperm.xlu0 %3676, %v5300_v23   ;;  %1614 = vperm.xlu1 %3677, %v5362_v4   ;;  %v1356_v16 = vpop.xlane.xlu0 %1355  ;;  %v5418_v4 = vld [vmem:[#allocation2 + $0xe8] sm:$0xff] }
 0x2f5   : > { %v5405_v42 = vmax.f32 %v5396_v53, %v1356_v16  ;;  %6429 = vst [vmem:[#allocation108_spill] sm:$0xff] %v5418_v4 }
 0x2f7   : > { %6427 = vst [vmem:[#allocation106_spill] sm:$0xff] %v5405_v42  ;;  %2582 = vst.msk [vmem:[#allocation2 + $0xd8] sm:$0xff] %vm2041_vm1, %v5405_v42 }
 0x2f8   : > { %1589 = vperm.xlu0 %3676, %v5310_v55   ;;  %1624 = vperm.xlu1 %3677, %v5383_v35   ;;  %v1359_v13 = vpop.xlane.xlu0 %1358 }
 0x2f9   : > { %v5416_v3 = vmax.f32 %v5407_v21, %v1359_v13 }
 0x2fb   : > { %2583 = vst.msk [vmem:[#allocation2 + $0xe0] sm:$0xff] %vm2041_vm1, %v5416_v3 }
 0x2fc   : > { %1594 = vperm.xlu0 %3676, %v5323_v6   ;;  %1634 = vperm.xlu1 %3677, %v5405_v42   ;;  %v1362_v8 = vpop.xlane.xlu1 %1361 }
 0x2fd   : > { %v5427_v53 = vmax.f32 %v5418_v4, %v1362_v8 }
 0x2ff   : > { %6430 = vst [vmem:[#allocation109_spill] sm:$0xff] %v5427_v53  ;;  %2584 = vst.msk [vmem:[#allocation2 + $0xe8] sm:$0xff] %vm2041_vm1, %v5427_v53 }
 0x300   : > { %1599 = vperm.xlu0 %3676, %v5334_v12   ;;  %1644 = vperm.xlu1 %3677, %v5427_v53  }
 0x304   : > { %1609 = vperm.xlu0 %3676, %v5352_v34  }
 0x306   : > { %v1500_v16 = vpop.permute.xlu0 %1499 }
 0x307   : > { %v1657_v21 = vsub.f32 %v4885_v24, %v1500_v16  ;;  %v1658_v42 = vsub.f32 %v4887_v25, %v1500_v16 }
 0x308   : > { %1619 = vperm.xlu0 %3676, %v5372_v20  }
 0x309   : > { %v1721_v8 = vmul.f32 1.442695, %v1657_v21  ;;  %v1723_v35 = vmul.f32 1.442695, %v1658_v42 }
 0x30a   : > { %v1505_v6 = vpop.permute.xlu1 %1504 }
 0x30b   : > { %3694 = vpow2.f32 %v1721_v8  ;;  %v1659_v13 = vsub.f32 %v4892_v32, %v1505_v6  ;;  %v1660_v4 = vsub.f32 %v4894_v33, %v1505_v6 }
 0x30c   : > { %3696 = vpow2.f32 %v1723_v35  ;;  %1629 = vperm.xlu0 %3676, %v5394_v39  }
 0x30d   : > { %v1725_v53 = vmul.f32 1.442695, %v1659_v13  ;;  %v1727_v34 = vmul.f32 1.442695, %v1660_v4 }
 0x30e   : > { %v1510_v12 = vpop.permute.xlu1 %1509 }
 0x30f   : > { %3698 = vpow2.f32 %v1725_v53  ;;  %v1661_v24 = vsub.f32 %v4899_v40, %v1510_v12  ;;  %v1662_v25 = vsub.f32 %v4901_v41, %v1510_v12 }
 0x310   : > { %3700 = vpow2.f32 %v1727_v34  ;;  %1639 = vperm.xlu0 %3676, %v5416_v3  }
 0x311   : > { %v1729_v42 = vmul.f32 1.442695, %v1661_v24  ;;  %v1731_v21 = vmul.f32 1.442695, %v1662_v25 }
 0x312   : > { %v1515_v16 = vpop.permute.xlu1 %1514 }
 0x313   : > { %3702 = vpow2.f32 %v1729_v42  ;;  %v1663_v32 = vsub.f32 %v4906_v48, %v1515_v16  ;;  %v1664_v33 = vsub.f32 %v4908_v49, %v1515_v16 }
 0x314   : > { %3704 = vpow2.f32 %v1731_v21 }
 0x315   : > { %v1733_v6 = vmul.f32 1.442695, %v1663_v32  ;;  %v1735_v4 = vmul.f32 1.442695, %v1664_v33 }
 0x316   : > { %v1520_v35 = vpop.permute.xlu0 %1519 }
 0x317   : > { %3706 = vpow2.f32 %v1733_v6  ;;  %v1665_v40 = vsub.f32 %v4913_v57, %v1520_v35  ;;  %v1666_v41 = vsub.f32 %v4915_v58, %v1520_v35 }
 0x318   : > { %v3695_v53 = vpop.eup %3694  ;;  %3708 = vpow2.f32 %v1735_v4 }
 0x319   : > { %v3697_v12 = vpop.eup %3696  ;;  %v1737_v34 = vmul.f32 1.442695, %v1665_v40  ;;  %v1739_v13 = vmul.f32 1.442695, %v1666_v41 }
 0x31a   : > { %v1525_v8 = vpop.permute.xlu0 %1524  ;;  %v5449_v24 = vadd.f32 %v3697_v12, %v3695_v53 }
 0x31b   : > { %3710 = vpow2.f32 %v1737_v34  ;;  %v1667_v48 = vsub.f32 %v4920_v1, %v1525_v8  ;;  %v1668_v49 = vsub.f32 %v4922_v2, %v1525_v8 }
 0x31c   : > { %v3699_v25 = vpop.eup %3698  ;;  %3712 = vpow2.f32 %v1739_v13 }
 0x31d   : > { %v3701_v42 = vpop.eup %3700  ;;  %v1741_v21 = vmul.f32 1.442695, %v1667_v48  ;;  %v1743_v57 = vmul.f32 1.442695, %v1668_v49  ;;  %v2298_v16 = vpack.c.bf16 %v3699_v25, %v3695_v53 }
 0x31e   : > { %v1530_v58 = vpop.permute.xlu1 %1529  ;;  %v2299_v32 = vpack.c.bf16 %v3701_v42, %v3697_v12  ;;  %v5453_v33 = vadd.f32 %v3701_v42, %v3699_v25 }
 0x31f   : > { %3714 = vpow2.f32 %v1741_v21  ;;  %v1669_v6 = vsub.f32 %v4927_v9, %v1530_v58  ;;  %v1670_v4 = vsub.f32 %v4929_v10, %v1530_v58 }
 0x320   : > { %v3703_v35 = vpop.eup %3702  ;;  %3716 = vpow2.f32 %v1743_v57  ;;  %2362 = vmatprep.mubr.bf16.mxu1 %v2299_v32 }
 0x321   : > { %v3705_v1 = vpop.eup %3704  ;;  %v1745_v2 = vmul.f32 1.442695, %v1669_v6  ;;  %v1747_v40 = vmul.f32 1.442695, %v1670_v4  ;;  %2363 = vmatmul.mubr.bf16.vlgmr.msra.gmra.mxu1 %v2298_v16 }
 0x322   : > { %v1535_v41 = vpop.permute.xlu1 %1534  ;;  %v5457_v34 = vadd.f32 %v3705_v1, %v3703_v35 }
 0x323   : > { %3718 = vpow2.f32 %v1745_v2  ;;  %v1671_v53 = vsub.f32 %v4934_v17, %v1535_v41  ;;  %v1672_v12 = vsub.f32 %v4936_v18, %v1535_v41 }
 0x324   : > { %v3707_v13 = vpop.eup %3706  ;;  %3720 = vpow2.f32 %v1747_v40 }
 0x325   : > { %v3709_v9 = vpop.eup %3708  ;;  %v1749_v8 = vmul.f32 1.442695, %v1671_v53  ;;  %v1751_v10 = vmul.f32 1.442695, %v1672_v12  ;;  %v2300_v48 = vpack.c.bf16 %v3707_v13, %v3703_v35 }
 0x326   : > { %v1540_v49 = vpop.permute.xlu0 %1539  ;;  %v2301_v25 = vpack.c.bf16 %v3709_v9, %v3705_v1  ;;  %v5461_v42 = vadd.f32 %v3709_v9, %v3707_v13 }
 0x327   : > { %3722 = vpow2.f32 %v1749_v8  ;;  %v1673_v21 = vsub.f32 %v4941_v27, %v1540_v49  ;;  %v1674_v57 = vsub.f32 %v4943_v28, %v1540_v49 }
 0x328   : > { %v3711_v16 = vpop.eup %3710  ;;  %3724 = vpow2.f32 %v1751_v10  ;;  %2370 = vmatprep.mubr.bf16.mxu1 %v2301_v25 }
 0x329   : > { %v3713_v17 = vpop.eup %3712  ;;  %v1753_v18 = vmul.f32 1.442695, %v1673_v21  ;;  %v1755_v58 = vmul.f32 1.442695, %v1674_v57  ;;  %2371 = vmatmul.mubr.bf16.gmra.mxu1 %v2300_v48 }
 0x32a   : > { %v1545_v32 = vpop.permute.xlu0 %1544  ;;  %v5465_v6 = vadd.f32 %v3713_v17, %v3711_v16 }
 0x32b   : > { %3726 = vpow2.f32 %v1753_v18  ;;  %v1675_v4 = vsub.f32 %v4948_v37, %v1545_v32  ;;  %v1676_v35 = vsub.f32 %v4950_v38, %v1545_v32 }
 0x32c   : > { %v3715_v1 = vpop.eup %3714  ;;  %3728 = vpow2.f32 %v1755_v58 }
 0x32d   : > { %v3717_v27 = vpop.eup %3716  ;;  %v1757_v2 = vmul.f32 1.442695, %v1675_v4  ;;  %v1759_v28 = vmul.f32 1.442695, %v1676_v35  ;;  %v2302_v40 = vpack.c.bf16 %v3715_v1, %v3711_v16 }
 0x32e   : > { %v1550_v41 = vpop.permute.xlu1 %1549  ;;  %v2303_v53 = vpack.c.bf16 %v3717_v27, %v3713_v17  ;;  %v5469_v12 = vadd.f32 %v3717_v27, %v3715_v1 }
 0x32f   : > { %3730 = vpow2.f32 %v1757_v2  ;;  %v1677_v13 = vsub.f32 %v4956_v50, %v1550_v41  ;;  %v1678_v9 = vsub.f32 %v4958_v51, %v1550_v41 }
 0x330   : > { %v3719_v8 = vpop.eup %3718  ;;  %3732 = vpow2.f32 %v1759_v28  ;;  %2378 = vmatprep.mubr.bf16.mxu1 %v2303_v53 }
 0x331   : > { %v3721_v37 = vpop.eup %3720  ;;  %v1761_v38 = vmul.f32 1.442695, %v1677_v13  ;;  %v1763_v10 = vmul.f32 1.442695, %v1678_v9  ;;  %2379 = vmatmul.mubr.bf16.gmra.mxu1 %v2302_v40 }
 0x332   : > { %v1555_v48 = vpop.permute.xlu1 %1554  ;;  %v5473_v49 = vadd.f32 %v3721_v37, %v3719_v8 }
 0x333   : > { %3734 = vpow2.f32 %v1761_v38  ;;  %v1679_v25 = vsub.f32 %v4963_v61, %v1555_v48  ;;  %v1680_v21 = vsub.f32 %v4965_v62, %v1555_v48  ;;  %v6431_v38 = vsub.f32 %v5101_v31, %v5108_v22 }
 0x334   : > { %v3723_v57 = vpop.eup %3722  ;;  %3736 = vpow2.f32 %v1763_v10  ;;  %v6432_v48 = vsub.f32 %v5110_v5, %v5122_v56  ;;  %v6436_v31 = vsub.f32 %v5166_v54, %v5178_v11  ;;  %v6437_v5 = vsub.f32 %v5180_v45, %v5188_v15  ;;  %v6441_v54 = vld [vmem:[#allocation75_spill] sm:$0xff]  ;;  %v6442_v11 = vld [vmem:[#allocation76_spill] sm:$0xff] }
 0x335   : > { %v3725_v50 = vpop.eup %3724  ;;  %v1765_v16 = vmul.f32 1.442695, %v1679_v25  ;;  %v1767_v51 = vmul.f32 1.442695, %v1680_v21  ;;  %v2304_v17 = vpack.c.bf16 %v3723_v57, %v3719_v8  ;;  %v1433_v10 = vmul.f32 1.442695, %v6431_v38 }
 0x336   : > { %v2305_v18 = vpack.c.bf16 %v3725_v50, %v3721_v37  ;;  %v5477_v58 = vadd.f32 %v3725_v50, %v3723_v57  ;;  %v1435_v25 = vmul.f32 1.442695, %v6432_v48  ;;  %v6433_v21 = vsub.f32 %v5124_v36, %v5136_v30  ;;  %v6456_v38 = vld [vmem:[#allocation86_spill] sm:$0xff] }
 0x337   : > { %3738 = vpow2.f32 %v1765_v16  ;;  %v6434_v50 = vsub.f32 %v5138_v44, %v5150_v59  ;;  %v1443_v22 = vmul.f32 1.442695, %v6436_v31  ;;  %v1445_v56 = vmul.f32 1.442695, %v6437_v5  ;;  %v6462_v31 = vld [vmem:[#allocation89_spill] sm:$0xff] }
 0x338   : > { %v3727_v32 = vpop.eup %3726  ;;  %3740 = vpow2.f32 %v1767_v51  ;;  %2386 = vmatprep.mubr.bf16.mxu1 %v2305_v18  ;;  %v1437_v57 = vmul.f32 1.442695, %v6433_v21  ;;  %v6435_v51 = vsub.f32 %v5152_v52, %v5164_v0  ;;  %v6438_v36 = vsub.f32 %v5190_v19, %v5198_v26  ;;  %v5520_v18 = vld [vmem:[#allocation2 + $0xf8] sm:$0xff]  ;;  %v6444_v19 = vld [vmem:[#allocation77_spill] sm:$0xff] }
 0x339   : > { %v3729_v4 = vpop.eup %3728  ;;  %2387 = vmatmul.mubr.bf16.gmra.mxu1 %v2304_v17  ;;  %v1439_v16 = vmul.f32 1.442695, %v6434_v50  ;;  %3742 = vpow2.f32 %v1433_v10  ;;  %v6439_v44 = vsub.f32 %v5200_v63, %v5208_v14  ;;  %v6440_v52 = vsub.f32 %v5210_v47, %v5218_v29  ;;  %v6445_v26 = vld [vmem:[#allocation78_spill] sm:$0xff]  ;;  %v6447_v14 = vld [vmem:[#allocation79_spill] sm:$0xff]  ;;  %v6449_v29 = vld [vmem:[#allocation80_spill] sm:$0xff] }
 0x33a   : > { %v5479_v35 = vadd.f32 %v3729_v4, %v3727_v32  ;;  %v1441_v17 = vmul.f32 1.442695, %v6435_v51  ;;  %3744 = vpow2.f32 %v1435_v25  ;;  %v1447_v30 = vmul.f32 1.442695, %v6438_v36  ;;  %v6458_v25 = vld [vmem:[#allocation87_spill] sm:$0xff]  ;;  %v6460_v50 = vld [vmem:[#allocation88_spill] sm:$0xff] }
 0x33b   : > { %3746 = vpow2.f32 %v1437_v57  ;;  %v1449_v59 = vmul.f32 1.442695, %v6439_v44  ;;  %v1451_v0 = vmul.f32 1.442695, %v6440_v52  ;;  %v6443_v45 = vsub.f32 %v6441_v54, %v6442_v11  ;;  %v6470_v11 = vld [vmem:[#allocation40_spill] sm:$0xff] }
 0x33c   : > { %v3731_v61 = vpop.eup %3730  ;;  %3748 = vpow2.f32 %v1439_v16  ;;  %v6448_v63 = vsub.f32 %v6447_v14, %v5248_v7  ;;  %v6450_v47 = vsub.f32 %v6449_v29, %v5257_v60  ;;  %v6455_v60 = vld [vmem:[#allocation85_spill] sm:$0xff]  ;;  %v6461_v16 = vsub.f32 %v6460_v50, %v5310_v55  ;;  %v6469_v55 = vld [vmem:[#allocation39_spill] sm:$0xff]  ;;  %v6485_v50 = vld [vmem:[#allocation100_spill] sm:$0xff] }
 0x33d   : > { %v3733_v1 = vpop.eup %3732  ;;  %v2306_v62 = vpack.c.bf16 %v3731_v61, %v3727_v32  ;;  %3750 = vpow2.f32 %v1441_v17  ;;  %v1453_v15 = vmul.f32 1.442695, %v6443_v45  ;;  %v6446_v32 = vsub.f32 %v6444_v19, %v6445_v26  ;;  %v6472_v19 = vld [vmem:[#allocation95_spill] sm:$0xff]  ;;  %v6473_v26 = vld [vmem:[#allocation96_spill] sm:$0xff] }
 0x33e   : > { %v2307_v27 = vpack.c.bf16 %v3733_v1, %v3729_v4  ;;  %v5481_v2 = vadd.f32 %v3733_v1, %v3731_v61  ;;  %3752 = vpow2.f32 %v1443_v22  ;;  %v1457_v61 = vmul.f32 1.442695, %v6448_v63  ;;  %v6463_v22 = vld [vmem:[#allocation92_spill] sm:$0xff] }
 0x33f   : > { %3754 = vpow2.f32 %v1445_v56  ;;  %v1455_v4 = vmul.f32 1.442695, %v6446_v32  ;;  %v6457_v10 = vsub.f32 %v6455_v60, %v6456_v38  ;;  %v1469_v51 = vmul.f32 1.442695, %v6461_v16  ;;  %v6481_v60 = vld [vmem:[#allocation42_spill] sm:$0xff] }
 0x340   : > { %v3735_v28 = vpop.eup %3734  ;;  %2394 = vmatprep.mubr.bf16.mxu1 %v2307_v27  ;;  %3756 = vpow2.f32 %v1447_v30  ;;  %v6464_v5 = vsub.f32 %v6462_v31, %v6463_v22  ;;  %v6467_v30 = vld [vmem:[#allocation94_spill] sm:$0xff]  ;;  %v6474_v32 = vsub.f32 %v6472_v19, %v6473_v26 }
 0x341   : > { %v3737_v40 = vpop.eup %3736  ;;  %2395 = vmatmul.mubr.bf16.gmra.mxu1 %v2306_v62  ;;  %3758 = vpow2.f32 %v1449_v59  ;;  %v1459_v62 = vmul.f32 1.442695, %v6450_v47  ;;  %v1465_v48 = vmul.f32 1.442695, %v6457_v10  ;;  %v6476_v47 = vld [vmem:[#allocation97_spill] sm:$0xff] }
 0x342   : > { %v5483_v41 = vadd.f32 %v3737_v40, %v3735_v28  ;;  %3760 = vpow2.f32 %v1451_v0  ;;  %v1471_v56 = vmul.f32 1.442695, %v6464_v5 }
 0x343   : > { %3762 = vpow2.f32 %v1453_v15 }
 0x344   : > { %v3739_v53 = vpop.eup %3738  ;;  %3764 = vpow2.f32 %v1455_v4  ;;  %v1475_v4 = vmul.f32 1.442695, %v6474_v32 }
 0x345   : > { %v3741_v13 = vpop.eup %3740  ;;  %v2308_v9 = vpack.c.bf16 %v3739_v53, %v3735_v28  ;;  %v6451_v28 = vld [vmem:[#allocation81_spill] sm:$0xff]  ;;  %3766 = vpow2.f32 %v1457_v61 }
 0x346   : > { %v2309_v8 = vpack.c.bf16 %v3741_v13, %v3737_v40  ;;  %v5485_v37 = vadd.f32 %v3741_v13, %v3739_v53  ;;  %v6452_v40 = vsub.f32 %v6451_v28, %v5267_v43  ;;  %v6453_v13 = vld [vmem:[#allocation82_spill] sm:$0xff]  ;;  %v5548_v43 = vpop.eup %3742  ;;  %3768 = vpow2.f32 %v1459_v62 }
 0x347   : > { %v5553_v57 = vpop.eup %3744  ;;  %v6477_v62 = vld [vmem:[#allocation98_spill] sm:$0xff] }
 0x348   : > { %2402 = vmatprep.mubr.bf16.mxu1 %v2309_v8  ;;  %v1461_v53 = vmul.f32 1.442695, %v6452_v40  ;;  %v5558_v17 = vpop.eup %3746  ;;  %v6478_v28 = vsub.f32 %v6476_v47, %v6477_v62 }
 0x349   : > { %2403 = vmatmul.mubr.bf16.gmra.mxu1 %v2308_v9  ;;  %v6454_v9 = vsub.f32 %v6453_v13, %v5276_v46  ;;  %v6459_v46 = vsub.f32 %v6458_v25, %v5300_v23  ;;  %v5564_v36 = vpop.eup %3748  ;;  %v6466_v23 = vld [vmem:[#allocation93_spill] sm:$0xff] }
 0x34a   : > { %3770 = vpow2.f32 %v1461_v53  ;;  %6465 = vst [vmem:[#allocation75_spill] sm:$0xff] %v5564_v36  ;;  %v6468_v44 = vsub.f32 %v6466_v23, %v6467_v30  ;;  %v5569_v0 = vpop.eup %3750  ;;  %v1477_v40 = vmul.f32 1.442695, %v6478_v28  ;;  %v6489_v23 = vld [vmem:[#allocation103_spill] sm:$0xff] }
 0x34b   : > { %v1463_v7 = vmul.f32 1.442695, %v6454_v9  ;;  %v1467_v21 = vmul.f32 1.442695, %v6459_v46  ;;  %v5573_v15 = vpop.eup %3752  ;;  %v6480_v9 = vld [vmem:[#allocation41_spill] sm:$0xff] }
 0x34c   : > { %v1473_v59 = vmul.f32 1.442695, %v6468_v44  ;;  %6471 = vst [vmem:[#allocation76_spill] sm:$0xff] %v5573_v15  ;;  %v5578_v14 = vpop.eup %3754 }
 0x34d   : > { %3772 = vpow2.f32 %v1463_v7  ;;  %v5583_v29 = vpop.eup %3756 }
 0x34e   : > { %3774 = vpow2.f32 %v1465_v48  ;;  %6475 = vst [vmem:[#allocation77_spill] sm:$0xff] %v5583_v29  ;;  %v5588_v13 = vpop.eup %3758 }
 0x34f   : > { %3776 = vpow2.f32 %v1467_v21  ;;  %6479 = vst [vmem:[#allocation78_spill] sm:$0xff] %v5588_v13  ;;  %v5592_v48 = vpop.eup %3760  ;;  %v6484_v21 = vld [vmem:[#allocation99_spill] sm:$0xff] }
 0x350   : > { %3778 = vpow2.f32 %v1469_v51  ;;  %6482 = vst [vmem:[#allocation79_spill] sm:$0xff] %v5592_v48  ;;  %v5597_v46 = vpop.eup %3762  ;;  %v6486_v16 = vsub.f32 %v6484_v21, %v6485_v50  ;;  %v6500_v50 = vld [vmem:[#allocation46_spill] sm:$0xff] }
 0x351   : > { %3780 = vpow2.f32 %v1471_v56  ;;  %6483 = vst [vmem:[#allocation80_spill] sm:$0xff] %v5597_v46  ;;  %v5603_v5 = vpop.eup %3764  ;;  %v6488_v56 = vld [vmem:[#allocation102_spill] sm:$0xff] }
 0x352   : > { %3782 = vpow2.f32 %v1473_v59  ;;  %v1479_v51 = vmul.f32 1.442695, %v6486_v16  ;;  %6487 = vst [vmem:[#allocation81_spill] sm:$0xff] %v5603_v5  ;;  %v6490_v30 = vsub.f32 %v6488_v56, %v6489_v23  ;;  %v6503_v23 = vld [vmem:[#allocation58_spill] sm:$0xff] }
 0x354   : > { %v1483_v44 = vmul.f32 1.442695, %v6490_v30 }
 0x357   : > { %v1368_v1 = vpop.xlane.xlu0 %1367 }
 0x358   : > { %v5532_v27 = vmax.f32 %v5520_v18, %v1368_v1  ;;  %v5581_v1 = vld [vmem:[#allocation2 + $0xf0] sm:$0xff] }
 0x35a   : > { %2586 = vst.msk [vmem:[#allocation2 + $0xf8] sm:$0xff] %vm2041_vm1, %v5532_v27  ;;  %1654 = vperm.xlu1 %3677, %v5532_v27  }
 0x35e   : > { %2108 = vperm.xlu1 %3677, %v5548_v43  }
 0x35f   : > { %v1560_v52 = vpop.permute.xlu0 %1559 }
 0x360   : > { %v1681_v54 = vsub.f32 %v6469_v55, %v1560_v52  ;;  %v1682_v45 = vsub.f32 %v6470_v11, %v1560_v52  ;;  %v5613_v55 = vpop.eup %3766 }
 0x361   : > { %6491 = vst [vmem:[#allocation82_spill] sm:$0xff] %v5613_v55  ;;  %v5617_v32 = vpop.eup %3768 }
 0x362   : > { %v1769_v63 = vmul.f32 1.442695, %v1681_v54  ;;  %v1771_v61 = vmul.f32 1.442695, %v1682_v45  ;;  %2118 = vperm.xlu1 %3677, %v5558_v17   ;;  %v6492_v54 = vld [vmem:[#allocation43_spill] sm:$0xff]  ;;  %v6493_v45 = vld [vmem:[#allocation44_spill] sm:$0xff]  ;;  %v5621_v62 = vpop.eup %3770 }
 0x363   : > { %v1565_v53 = vpop.permute.xlu0 %1564  ;;  %6494 = vst [vmem:[#allocation85_spill] sm:$0xff] %v5617_v32 }
 0x364   : > { %3784 = vpow2.f32 %v1769_v63  ;;  %v1683_v7 = vsub.f32 %v6480_v9, %v1565_v53  ;;  %v1684_v38 = vsub.f32 %v6481_v60, %v1565_v53  ;;  %v1365_v10 = vpop.xlane.xlu1 %1364  ;;  %v5624_v53 = vpop.eup %3772 }
 0x365   : > { %3786 = vpow2.f32 %v1771_v61  ;;  %v5595_v25 = vmax.f32 %v5581_v1, %v1365_v10  ;;  %v6496_v61 = vld [vmem:[#allocation48_spill] sm:$0xff]  ;;  %6497 = vst [vmem:[#allocation86_spill] sm:$0xff] %v5624_v53  ;;  %v6499_v10 = vld [vmem:[#allocation45_spill] sm:$0xff] }
 0x366   : > { %3788 = vpow2.f32 %v1475_v4  ;;  %v1773_v31 = vmul.f32 1.442695, %v1683_v7  ;;  %v1775_v22 = vmul.f32 1.442695, %v1684_v38  ;;  %2123 = vperm.xlu1 %3677, %v5564_v36   ;;  %v6495_v4 = vld [vmem:[#allocation47_spill] sm:$0xff]  ;;  %v5627_v38 = vpop.eup %3774 }
 0x367   : > { %3790 = vpow2.f32 %v1477_v40  ;;  %2585 = vst.msk [vmem:[#allocation2 + $0xf0] sm:$0xff] %vm2041_vm1, %v5595_v25  ;;  %1649 = vperm.xlu0 %3676, %v5595_v25   ;;  %v1570_v52 = vpop.permute.xlu0 %1569  ;;  %6498 = vst [vmem:[#allocation87_spill] sm:$0xff] %v5627_v38 }
 0x368   : > { %3792 = vpow2.f32 %v1773_v31  ;;  %v1685_v11 = vsub.f32 %v6492_v54, %v1570_v52  ;;  %v1686_v19 = vsub.f32 %v6493_v45, %v1570_v52  ;;  %v1580_v26 = vpop.permute.xlu1 %1579  ;;  %v5631_v31 = vpop.eup %3776 }
 0x369   : > { %3794 = vpow2.f32 %v1775_v22  ;;  %v1689_v63 = vsub.f32 %v6495_v4, %v1580_v26  ;;  %v1690_v47 = vsub.f32 %v6496_v61, %v1580_v26  ;;  %6501 = vst [vmem:[#allocation88_spill] sm:$0xff] %v5631_v31  ;;  %v6502_v22 = vld [vmem:[#allocation57_spill] sm:$0xff] }
 0x36a   : > { %3796 = vpow2.f32 %v1479_v51  ;;  %v1777_v28 = vmul.f32 1.442695, %v1685_v11  ;;  %v1779_v40 = vmul.f32 1.442695, %v1686_v19  ;;  %2133 = vperm.xlu1 %3677, %v5573_v15  }
 0x36b   : > { %3798 = vpow2.f32 %v1483_v44  ;;  %v1785_v9 = vmul.f32 1.442695, %v1689_v63  ;;  %v1787_v7 = vmul.f32 1.442695, %v1690_v47  ;;  %2113 = vperm.xlu0 %3676, %v5553_v57   ;;  %v1575_v60 = vpop.permute.xlu0 %1574  ;;  %v5635_v44 = vpop.eup %3778  ;;  %v6506_v63 = vld [vmem:[#allocation49_spill] sm:$0xff]  ;;  %v6507_v47 = vld [vmem:[#allocation50_spill] sm:$0xff] }
 0x36c   : > { %3800 = vpow2.f32 %v1777_v28  ;;  %v1687_v21 = vsub.f32 %v6499_v10, %v1575_v60  ;;  %v1688_v16 = vsub.f32 %v6500_v50, %v1575_v60  ;;  %v1605_v51 = vpop.permute.xlu1 %1604  ;;  %v5638_v11 = vpop.eup %3780  ;;  %v6508_v60 = vld [vmem:[#allocation61_spill] sm:$0xff] }
 0x36d   : > { %3802 = vpow2.f32 %v1779_v40  ;;  %v1699_v56 = vsub.f32 %v6502_v22, %v1605_v51  ;;  %v1700_v30 = vsub.f32 %v6503_v23, %v1605_v51  ;;  %6504 = vst [vmem:[#allocation89_spill] sm:$0xff] %v5638_v11  ;;  %v5641_v4 = vpop.eup %3782 }
 0x36e   : > { %3804 = vpow2.f32 %v1785_v9  ;;  %v1781_v52 = vmul.f32 1.442695, %v1687_v21  ;;  %v1783_v54 = vmul.f32 1.442695, %v1688_v16  ;;  %2143 = vperm.xlu1 %3677, %v5583_v29   ;;  %6505 = vst [vmem:[#allocation92_spill] sm:$0xff] %v5641_v4  ;;  %v6509_v21 = vld [vmem:[#allocation62_spill] sm:$0xff] }
 0x36f   : > { %3806 = vpow2.f32 %v1787_v7  ;;  %v1805_v45 = vmul.f32 1.442695, %v1699_v56  ;;  %v1807_v19 = vmul.f32 1.442695, %v1700_v30  ;;  %2128 = vperm.xlu0 %3676, %v5569_v0   ;;  %v1585_v26 = vpop.permute.xlu0 %1584 }
 0x370   : > { %3808 = vpow2.f32 %v1781_v52  ;;  %v1691_v61 = vsub.f32 %v6506_v63, %v1585_v26  ;;  %v1692_v28 = vsub.f32 %v6507_v47, %v1585_v26  ;;  %v1615_v40 = vpop.permute.xlu1 %1614  ;;  %v6512_v26 = vld [vmem:[#allocation51_spill] sm:$0xff] }
 0x371   : > { %v3785_v9 = vpop.eup %3784  ;;  %3810 = vpow2.f32 %v1783_v54  ;;  %v1703_v10 = vsub.f32 %v6508_v60, %v1615_v40  ;;  %v1704_v50 = vsub.f32 %v6509_v21, %v1615_v40  ;;  %v6514_v40 = vld [vmem:[#allocation65_spill] sm:$0xff] }
 0x372   : > { %v3787_v7 = vpop.eup %3786  ;;  %3812 = vpow2.f32 %v1805_v45  ;;  %v1789_v16 = vmul.f32 1.442695, %v1691_v61  ;;  %v1791_v51 = vmul.f32 1.442695, %v1692_v28  ;;  %2153 = vperm.xlu1 %3677, %v5592_v48   ;;  %v6513_v45 = vld [vmem:[#allocation52_spill] sm:$0xff] }
 0x373   : > { %v5648_v22 = vpop.eup %3788  ;;  %3814 = vpow2.f32 %v1807_v19  ;;  %v1813_v56 = vmul.f32 1.442695, %v1703_v10  ;;  %v1815_v23 = vmul.f32 1.442695, %v1704_v50  ;;  %2138 = vperm.xlu0 %3676, %v5578_v14   ;;  %v1590_v30 = vpop.permute.xlu0 %1589  ;;  %v5651_v52 = vadd.f32 %v3787_v7, %v3785_v9  ;;  %v6515_v19 = vld [vmem:[#allocation66_spill] sm:$0xff] }
 0x374   : > { %6510 = vst [vmem:[#allocation93_spill] sm:$0xff] %v5648_v22  ;;  %v5653_v54 = vpop.eup %3790  ;;  %3816 = vpow2.f32 %v1789_v16  ;;  %v1693_v63 = vsub.f32 %v6512_v26, %v1590_v30  ;;  %v1694_v61 = vsub.f32 %v6513_v45, %v1590_v30  ;;  %v1625_v47 = vpop.permute.xlu1 %1624 }
 0x375   : > { %6511 = vst [vmem:[#allocation94_spill] sm:$0xff] %v5653_v54  ;;  %v3793_v28 = vpop.eup %3792  ;;  %3818 = vpow2.f32 %v1791_v51  ;;  %v1707_v60 = vsub.f32 %v6514_v40, %v1625_v47  ;;  %v1708_v10 = vsub.f32 %v6515_v19, %v1625_v47  ;;  %v6518_v47 = vld [vmem:[#allocation53_spill] sm:$0xff] }
 0x376   : > { %v3795_v21 = vpop.eup %3794  ;;  %3820 = vpow2.f32 %v1813_v56  ;;  %v1793_v50 = vmul.f32 1.442695, %v1693_v63  ;;  %v1795_v59 = vmul.f32 1.442695, %v1694_v61  ;;  %2163 = vperm.xlu1 %3677, %v5603_v5   ;;  %v2310_v8 = vpack.c.bf16 %v3793_v28, %v3785_v9  ;;  %v6519_v56 = vld [vmem:[#allocation54_spill] sm:$0xff]  ;;  %v6520_v5 = vld [vmem:[#allocation69_spill] sm:$0xff] }
 0x377   : > { %v5660_v48 = vpop.eup %3796  ;;  %3822 = vpow2.f32 %v1815_v23  ;;  %v1821_v16 = vmul.f32 1.442695, %v1707_v60  ;;  %v1823_v26 = vmul.f32 1.442695, %v1708_v10  ;;  %2148 = vperm.xlu0 %3676, %v5588_v13   ;;  %v1595_v30 = vpop.permute.xlu0 %1594  ;;  %v2311_v51 = vpack.c.bf16 %v3795_v21, %v3787_v7  ;;  %v6521_v60 = vld [vmem:[#allocation70_spill] sm:$0xff] }
 0x378   : > { %6516 = vst [vmem:[#allocation39_spill] sm:$0xff] %v5660_v48  ;;  %v5663_v45 = vpop.eup %3798  ;;  %3824 = vpow2.f32 %v1793_v50  ;;  %v1695_v40 = vsub.f32 %v6518_v47, %v1595_v30  ;;  %v1696_v63 = vsub.f32 %v6519_v56, %v1595_v30  ;;  %v1635_v61 = vpop.permute.xlu1 %1634  ;;  %v5667_v19 = vadd.f32 %v3795_v21, %v3793_v28 }
 0x379   : > { %6517 = vst [vmem:[#allocation40_spill] sm:$0xff] %v5663_v45  ;;  %v3801_v9 = vpop.eup %3800  ;;  %3826 = vpow2.f32 %v1795_v59  ;;  %v1711_v23 = vsub.f32 %v6520_v5, %v1635_v61  ;;  %v1712_v10 = vsub.f32 %v6521_v60, %v1635_v61  ;;  %2410 = vmatprep.mubr.bf16.mxu1 %v2311_v51  ;;  %v6522_v51 = vld [vmem:[#allocation55_spill] sm:$0xff]  ;;  %v6525_v60 = vld [vmem:[#allocation74_spill] sm:$0xff] }
 0x37a   : > { %v3803_v29 = vpop.eup %3802  ;;  %3828 = vpow2.f32 %v1821_v16  ;;  %v1797_v7 = vmul.f32 1.442695, %v1695_v40  ;;  %v1799_v15 = vmul.f32 1.442695, %v1696_v63  ;;  %2411 = vmatmul.mubr.bf16.gmra.mxu1 %v2310_v8  ;;  %2173 = vperm.xlu1 %3677, %v5617_v32   ;;  %v6523_v16 = vld [vmem:[#allocation56_spill] sm:$0xff]  ;;  %v6524_v63 = vld [vmem:[#allocation73_spill] sm:$0xff] }
 0x37b   : > { %v5672_v50 = vpop.eup %3804  ;;  %3830 = vpow2.f32 %v1823_v26  ;;  %v1829_v30 = vmul.f32 1.442695, %v1711_v23  ;;  %v1831_v28 = vmul.f32 1.442695, %v1712_v10  ;;  %2158 = vperm.xlu0 %3676, %v5597_v46   ;;  %v1600_v59 = vpop.permute.xlu0 %1599  ;;  %v5675_v21 = vadd.f32 %v3803_v29, %v3801_v9 }
 0x37c   : > { %v3807_v5 = vpop.eup %3806  ;;  %3832 = vpow2.f32 %v1797_v7  ;;  %v1697_v47 = vsub.f32 %v6522_v51, %v1600_v59  ;;  %v1698_v40 = vsub.f32 %v6523_v16, %v1600_v59  ;;  %v1645_v56 = vpop.permute.xlu1 %1644 }
 0x37d   : > { %v3809_v8 = vpop.eup %3808  ;;  %3834 = vpow2.f32 %v1799_v15  ;;  %v1715_v61 = vsub.f32 %v6524_v63, %v1645_v56  ;;  %v1716_v26 = vsub.f32 %v6525_v60, %v1645_v56  ;;  %v5682_v23 = vadd.f32 %v3807_v5, %v5672_v50  ;;  %v6526_v60 = vld [vmem:[#allocation59_spill] sm:$0xff] }
 0x37e   : > { %v3811_v10 = vpop.eup %3810  ;;  %3836 = vpow2.f32 %v1829_v30  ;;  %v1801_v32 = vmul.f32 1.442695, %v1697_v47  ;;  %v1803_v46 = vmul.f32 1.442695, %v1698_v40  ;;  %2183 = vperm.xlu1 %3677, %v5624_v53   ;;  %v2312_v7 = vpack.c.bf16 %v3809_v8, %v3801_v9  ;;  %v6527_v30 = vld [vmem:[#allocation60_spill] sm:$0xff] }
 0x37f   : > { %v5685_v51 = vpop.eup %3812  ;;  %3838 = vpow2.f32 %v1831_v28  ;;  %v1837_v59 = vmul.f32 1.442695, %v1715_v61  ;;  %v1839_v16 = vmul.f32 1.442695, %v1716_v26  ;;  %2168 = vperm.xlu0 %3676, %v5613_v55   ;;  %v1610_v15 = vpop.permute.xlu0 %1609  ;;  %v2313_v63 = vpack.c.bf16 %v3811_v10, %v3803_v29  ;;  %v6528_v61 = vld [vmem:[#allocation101_spill] sm:$0xff] }
 0x380   : > { %v5688_v56 = vpop.eup %3814  ;;  %3840 = vpow2.f32 %v1801_v32  ;;  %v1701_v13 = vsub.f32 %v6526_v60, %v1610_v15  ;;  %v1702_v47 = vsub.f32 %v6527_v30, %v1610_v15  ;;  %v5692_v40 = vadd.f32 %v3811_v10, %v3809_v8  ;;  %v6530_v10 = vld [vmem:[#allocation105_spill] sm:$0xff] }
 0x381   : > { %v3817_v53 = vpop.eup %3816  ;;  %3842 = vpow2.f32 %v1803_v46  ;;  %2418 = vmatprep.mubr.bf16.mxu1 %v2313_v63  ;;  %v5696_v9 = vadd.f32 %v5688_v56, %v5685_v51  ;;  %v6529_v29 = vsub.f32 %v6528_v61, %v5372_v20  ;;  %v6531_v46 = vld [vmem:[#allocation106_spill] sm:$0xff] }
 0x382   : > { %v3819_v28 = vpop.eup %3818  ;;  %3844 = vpow2.f32 %v1837_v59  ;;  %v1809_v32 = vmul.f32 1.442695, %v1701_v13  ;;  %v1811_v55 = vmul.f32 1.442695, %v1702_v47  ;;  %2419 = vmatmul.mubr.bf16.gmra.mxu1 %v2312_v7  ;;  %2193 = vperm.xlu1 %3677, %v5631_v31   ;;  %v6532_v15 = vsub.f32 %v6530_v10, %v6531_v46  ;;  %v6533_v13 = vld [vmem:[#allocation63_spill] sm:$0xff]  ;;  %v6534_v59 = vld [vmem:[#allocation64_spill] sm:$0xff] }
 0x383   : > { %v1481_v26 = vmul.f32 1.442695, %v6529_v29  ;;  %v5702_v8 = vpop.eup %3820  ;;  %3846 = vpow2.f32 %v1839_v16  ;;  %2178 = vperm.xlu0 %3676, %v5621_v62   ;;  %v1620_v60 = vpop.permute.xlu0 %1619  ;;  %v2315_v30 = vpack.c.bf16 %v3819_v28, %v3807_v5  ;;  %v5708_v36 = vadd.f32 %v3819_v28, %v3817_v53  ;;  %v6535_v10 = vld [vmem:[#allocation104_spill] sm:$0xff] }
 0x384   : > { %v1487_v63 = vmul.f32 1.442695, %v6532_v15  ;;  %v5710_v20 = vpop.eup %3822  ;;  %3848 = vpow2.f32 %v1809_v32  ;;  %v1705_v7 = vsub.f32 %v6533_v13, %v1620_v60  ;;  %v1706_v47 = vsub.f32 %v6534_v59, %v1620_v60  ;;  %v6537_v60 = vld [vmem:[#allocation108_spill] sm:$0xff] }
 0x385   : > { %v3825_v61 = vpop.eup %3824  ;;  %3850 = vpow2.f32 %v1811_v55  ;;  %2426 = vmatprep.mubr.bf16.mxu1 %v2315_v30  ;;  %v5716_v29 = vadd.f32 %v5710_v20, %v5702_v8  ;;  %v6536_v5 = vsub.f32 %v6535_v10, %v5394_v39  ;;  %v6538_v55 = vld [vmem:[#allocation109_spill] sm:$0xff]  ;;  %v6540_v39 = vld [vmem:[#allocation67_spill] sm:$0xff] }
 0x386   : > { %v3827_v16 = vpop.eup %3826  ;;  %3852 = vpow2.f32 %v1481_v26  ;;  %v1817_v46 = vmul.f32 1.442695, %v1705_v7  ;;  %v1819_v15 = vmul.f32 1.442695, %v1706_v47  ;;  %2203 = vperm.xlu1 %3677, %v5638_v11   ;;  %v6539_v30 = vsub.f32 %v6537_v60, %v6538_v55  ;;  %v6541_v47 = vld [vmem:[#allocation68_spill] sm:$0xff] }
 0x387   : > { %v1485_v28 = vmul.f32 1.442695, %v6536_v5  ;;  %v5722_v32 = vpop.eup %3828  ;;  %3854 = vpow2.f32 %v1487_v63  ;;  %2188 = vperm.xlu0 %3676, %v5627_v38   ;;  %v1630_v59 = vpop.permute.xlu0 %1629  ;;  %v5728_v31 = vadd.f32 %v3827_v16, %v3825_v61  ;;  %v2314_v5 = vpack.c.bf16 %v3817_v53, %v5672_v50 }
 0x388   : > { %v1491_v13 = vmul.f32 1.442695, %v6539_v30  ;;  %v5730_v26 = vpop.eup %3830  ;;  %3856 = vpow2.f32 %v1817_v46  ;;  %v1709_v7 = vsub.f32 %v6540_v39, %v1630_v59  ;;  %v1710_v10 = vsub.f32 %v6541_v47, %v1630_v59  ;;  %v6542_v39 = vld [vmem:[#allocation107_spill] sm:$0xff] }
 0x389   : > { %v3833_v11 = vpop.eup %3832  ;;  %3858 = vpow2.f32 %v1819_v15  ;;  %v5737_v63 = vadd.f32 %v5730_v26, %v5722_v32  ;;  %v6543_v59 = vsub.f32 %v6542_v39, %v5416_v3 }
 0x38a   : > { %v3835_v60 = vpop.eup %3834  ;;  %3860 = vpow2.f32 %v1485_v28  ;;  %v1825_v55 = vmul.f32 1.442695, %v1709_v7  ;;  %v1827_v30 = vmul.f32 1.442695, %v1710_v10  ;;  %2427 = vmatmul.mubr.bf16.gmra.mxu1 %v2314_v5  ;;  %2213 = vperm.xlu1 %3677, %v5648_v22   ;;  %v6544_v28 = vld [vmem:[#allocation71_spill] sm:$0xff]  ;;  %v6545_v10 = vld [vmem:[#allocation72_spill] sm:$0xff] }
 0x38b   : > { %v5740_v46 = vpop.eup %3836  ;;  %3862 = vpow2.f32 %v1491_v13  ;;  %v1489_v53 = vmul.f32 1.442695, %v6543_v59  ;;  %2198 = vperm.xlu0 %3676, %v5635_v44   ;;  %v1640_v50 = vpop.permute.xlu0 %1639  ;;  %v2317_v15 = vpack.c.bf16 %v3835_v60, %v3827_v16  ;;  %v5746_v47 = vadd.f32 %v3835_v60, %v3833_v11 }
 0x38c   : > { %v3839_v38 = vpop.eup %3838  ;;  %3864 = vpow2.f32 %v1825_v55  ;;  %v1713_v7 = vsub.f32 %v6544_v28, %v1640_v50  ;;  %v1714_v5 = vsub.f32 %v6545_v10, %v1640_v50  ;;  %v2316_v50 = vpack.c.bf16 %v3833_v11, %v3825_v61 }
 0x38d   : > { %v3841_v22 = vpop.eup %3840  ;;  %3866 = vpow2.f32 %v1827_v30  ;;  %2434 = vmatprep.mubr.bf16.mxu1 %v2317_v15  ;;  %v5751_v13 = vadd.f32 %v3839_v38, %v5740_v46 }
 0x38e   : > { %v3843_v3 = vpop.eup %3842  ;;  %v1833_v39 = vmul.f32 1.442695, %v1713_v7  ;;  %v1835_v59 = vmul.f32 1.442695, %v1714_v5  ;;  %2223 = vperm.xlu1 %3677, %v5660_v48   ;;  %3868 = vpow2.f32 %v1489_v53 }
 0x38f   : > { %v3845_v16 = vpop.eup %3844  ;;  %2208 = vperm.xlu0 %3676, %v5641_v4   ;;  %v5755_v60 = vadd.f32 %v3843_v3, %v3841_v22  ;;  %v2319_v30 = vpack.c.bf16 %v5688_v56, %v3843_v3 }
 0x390   : > { %v3847_v55 = vpop.eup %3846  ;;  %3870 = vpow2.f32 %v1833_v39 }
 0x391   : > { %v3849_v28 = vpop.eup %3848  ;;  %3872 = vpow2.f32 %v1835_v59  ;;  %v5758_v15 = vadd.f32 %v3847_v55, %v3845_v16  ;;  %v2318_v59 = vpack.c.bf16 %v5685_v51, %v3841_v22 }
 0x392   : > { %v3851_v10 = vpop.eup %3850  ;;  %2435 = vmatmul.mubr.bf16.gmra.mxu1 %v2316_v50  ;;  %2233 = vperm.xlu1 %3677, %v5663_v45   ;;  %v2320_v22 = vpack.c.bf16 %v5702_v8, %v3849_v28 }
 0x393   : > { %v5761_v7 = vpop.eup %3852  ;;  %2442 = vmatprep.mubr.bf16.mxu1 %v2319_v30  ;;  %2218 = vperm.xlu0 %3676, %v5653_v54   ;;  %v5764_v53 = vadd.f32 %v3851_v10, %v3849_v28  ;;  %v2321_v30 = vpack.c.bf16 %v5710_v20, %v3851_v10 }
 0x394   : > { %6546 = vst [vmem:[#allocation95_spill] sm:$0xff] %v5761_v7  ;;  %v5766_v5 = vpop.eup %3854 }
 0x395   : > { %6547 = vst [vmem:[#allocation96_spill] sm:$0xff] %v5766_v5  ;;  %v3857_v11 = vpop.eup %3856 }
 0x396   : > { %v3859_v61 = vpop.eup %3858  ;;  %2243 = vperm.xlu1 %3677, %v5766_v5   ;;  %v2322_v20 = vpack.c.bf16 %v5722_v32, %v3857_v11 }
 0x397   : > { %v5769_v56 = vpop.eup %3860  ;;  %2228 = vperm.xlu0 %3676, %v5761_v7   ;;  %v5772_v3 = vadd.f32 %v3859_v61, %v3857_v11  ;;  %v2323_v51 = vpack.c.bf16 %v5730_v26, %v3859_v61  ;;  %v2077_v61 = vld [vmem:[%s4642_s3 + $0x18] sm:$0xff] }
 0x398   : > { %v5774_v39 = vpop.eup %3862 }
 0x399   : > { %6548 = vst [vmem:[#allocation97_spill] sm:$0xff] %v5774_v39  ;;  %v3865_v50 = vpop.eup %3864 }
 0x39a   : > { %v3867_v45 = vpop.eup %3866  ;;  %2443 = vmatmul.mubr.bf16.gmra.mxu1 %v2318_v59  ;;  %2253 = vperm.xlu1 %3677, %v5774_v39   ;;  %v2324_v59 = vpack.c.bf16 %v5740_v46, %v3865_v50 }
 0x39b   : > { %2450 = vmatprep.mubr.bf16.mxu1 %v2321_v30  ;;  %2238 = vperm.xlu0 %3676, %v5769_v56   ;;  %v5780_v5 = vadd.f32 %v3867_v45, %v3865_v50  ;;  %v5782_v48 = vpop.eup %3868  ;;  %v2325_v10 = vpack.c.bf16 %v3839_v38, %v3867_v45  ;;  %v6551_v38 = vld [vmem:[#allocation90_spill] sm:$0xff] }
 0x39d   : > { %v3871_v7 = vpop.eup %3870 }
 0x39e   : > { %v3873_v54 = vpop.eup %3872  ;;  %v2326_v39 = vpack.c.bf16 %v3845_v16, %v3871_v7 }
 0x39f   : > { %2248 = vperm.xlu0 %3676, %v5782_v48   ;;  %v5785_v4 = vadd.f32 %v3873_v54, %v3871_v7  ;;  %v2327_v30 = vpack.c.bf16 %v3847_v55, %v3873_v54  ;;  %v6552_v54 = vld [vmem:[#allocation91_spill] sm:$0xff]  ;;  %v2076_v55 = vld [vmem:[%s4642_s3 + $0x10] sm:$0xff] }
 0x3a2   : > { %2451 = vmatmul.mubr.bf16.gmra.mxu1 %v2320_v22 }
 0x3a3   : > { %2458 = vmatprep.mubr.bf16.mxu1 %v2323_v51 }
 0x3aa   : > { %2459 = vmatmul.mubr.bf16.gmra.mxu1 %v2322_v20 }
 0x3ab   : > { %2466 = vmatprep.mubr.bf16.mxu1 %v2325_v10  ;;  %v2078_v10 = vld [vmem:[%s4642_s3 + $0x20] sm:$0xff] }
 0x3b2   : > { %2467 = vmatmul.mubr.bf16.gmra.mxu1 %v2324_v59 }
 0x3b3   : > { %2474 = vmatprep.mubr.bf16.mxu1 %v2327_v30 }
 0x3ba   : > { %2475 = vmatmul.mubr.bf16.gmra.mxu1 %v2326_v39 }
 0x3be   : > { %1914 = vadd.xlane.f32.xlu0 %v5449_v24  ;;  %1917 = vadd.xlane.f32.xlu1 %v5453_v33  ;;  %v6549_v33 = vld [vmem:[#allocation83_spill] sm:$0xff] }
 0x3c2   : > { %1920 = vadd.xlane.f32.xlu0 %v5457_v34  ;;  %1926 = vadd.xlane.f32.xlu1 %v5465_v6 }
 0x3c6   : > { %1923 = vadd.xlane.f32.xlu0 %v5461_v42  ;;  %1932 = vadd.xlane.f32.xlu1 %v5473_v49  ;;  %v6550_v42 = vld [vmem:[#allocation84_spill] sm:$0xff]  ;;  %v2074_v49 = vld [vmem:[%s4642_s3] sm:$0xff] }
 0x3ca   : > { %1929 = vadd.xlane.f32.xlu0 %v5469_v12  ;;  %1938 = vadd.xlane.f32.xlu1 %v5479_v35 }
 0x3ce   : > { %1935 = vadd.xlane.f32.xlu0 %v5477_v58  ;;  %1944 = vadd.xlane.f32.xlu1 %v5483_v41 }
 0x3d2   : > { %1941 = vadd.xlane.f32.xlu0 %v5481_v2  ;;  %1950 = vadd.xlane.f32.xlu1 %v5651_v52 }
 0x3d5   : > { %v1655_v24 = vpop.permute.xlu1 %1654 }
 0x3d6   : > { %1947 = vadd.xlane.f32.xlu0 %v5485_v37  ;;  %1956 = vadd.xlane.f32.xlu1 %v5675_v21  ;;  %v1719_v34 = vsub.f32 %v6549_v33, %v1655_v24  ;;  %v1720_v6 = vsub.f32 %v6550_v42, %v1655_v24 }
 0x3d8   : > { %v1845_v12 = vmul.f32 1.442695, %v1719_v34  ;;  %v1847_v2 = vmul.f32 1.442695, %v1720_v6 }
 0x3d9   : > { %v2109_v58 = vpop.permute.xlu1 %2108 }
 0x3da   : > { %1953 = vadd.xlane.f32.xlu0 %v5667_v19  ;;  %1962 = vadd.xlane.f32.xlu1 %v5682_v23  ;;  %v2266_v19 = vmul.f32 %v2109_v58, %v2074_v49  ;;  %v2075_v23 = vld [vmem:[%s4642_s3 + $0x8] sm:$0xff]  ;;  %3874 = vpow2.f32 %v1845_v12 }
 0x3db   : > { %3876 = vpow2.f32 %v1847_v2  ;;  %v2079_v12 = vld [vmem:[%s4642_s3 + $0x28] sm:$0xff] }
 0x3dd   : > { %v2119_v26 = vpop.permute.xlu1 %2118 }
 0x3de   : > { %1959 = vadd.xlane.f32.xlu0 %v5692_v40  ;;  %1968 = vadd.xlane.f32.xlu1 %v5728_v31 }
 0x3e1   : > { %v3397_v35 = vpop.f32.mrf.mxu1  ;;  %v2124_v39 = vpop.permute.xlu1 %2123 }
 0x3e2   : > { %1965 = vadd.xlane.f32.xlu0 %v5708_v36  ;;  %1974 = vadd.xlane.f32.xlu1 %v5755_v60  ;;  %v1650_v41 = vpop.permute.xlu0 %1649  ;;  %v2269_v20 = vmul.f32 %v2124_v39, %v2077_v61  ;;  %v2083_v39 = vld [vmem:[%s4642_s3 + $0x48] sm:$0xff] }
 0x3e3   : > { %v3398_v37 = vpop.f32.mrf.mxu1  ;;  %v1717_v52 = vsub.f32 %v6551_v38, %v1650_v41  ;;  %v1718_v45 = vsub.f32 %v6552_v54, %v1650_v41 }
 0x3e4   : > { %v3399_v21 = vadd.f32 %v3398_v37, %v3397_v35 }
 0x3e5   : > { %v1841_v31 = vmul.f32 1.442695, %v1717_v52  ;;  %v1843_v40 = vmul.f32 1.442695, %v1718_v45  ;;  %v3400_v8 = vpop.f32.mrf.mxu1  ;;  %v2134_v49 = vpop.permute.xlu1 %2133  ;;  %v2080_v45 = vld [vmem:[%s4642_s3 + $0x30] sm:$0xff] }
 0x3e6   : > { %v2491_v32 = vadd.f32 %v3399_v21, %v2266_v19  ;;  %1971 = vadd.xlane.f32.xlu0 %v5746_v47  ;;  %1980 = vadd.xlane.f32.xlu1 %v5764_v53  ;;  %v2114_v36 = vpop.permute.xlu0 %2113  ;;  %v2268_v53 = vmul.f32 %v2119_v26, %v2076_v55  ;;  %v2271_v52 = vmul.f32 %v2134_v49, %v2079_v12 }
 0x3e7   : > { %3878 = vpow2.f32 %v1841_v31  ;;  %v3401_v46 = vpop.f32.mrf.mxu1  ;;  %v2267_v16 = vmul.f32 %v2114_v36, %v2075_v23  ;;  %v3875_v30 = vpop.eup %3874 }
 0x3e8   : > { %2523 = vst [vmem:[%s4642_s3] sm:$0xff] %v2491_v32  ;;  %3880 = vpow2.f32 %v1843_v40  ;;  %v3402_v60 = vadd.f32 %v3401_v46, %v3400_v8  ;;  %v3877_v33 = vpop.eup %3876  ;;  %v2081_v40 = vld [vmem:[%s4642_s3 + $0x38] sm:$0xff] }
 0x3e9   : > { %v3403_v28 = vpop.f32.mrf.mxu1  ;;  %v2006_v31 = vadd.f32 %v3877_v33, %v3875_v30  ;;  %v2144_v8 = vpop.permute.xlu1 %2143 }
 0x3ea   : > { %v2492_v7 = vadd.f32 %v3402_v60, %v2267_v16  ;;  %1977 = vadd.xlane.f32.xlu0 %v5696_v9  ;;  %1986 = vadd.xlane.f32.xlu1 %v5772_v3  ;;  %v2129_v3 = vpop.permute.xlu0 %2128  ;;  %v2273_v46 = vmul.f32 %v2144_v8, %v2081_v40  ;;  %v2082_v60 = vld [vmem:[%s4642_s3 + $0x40] sm:$0xff] }
 0x3eb   : > { %v3404_v47 = vpop.f32.mrf.mxu1 }
 0x3ec   : > { %2524 = vst [vmem:[%s4642_s3 + $0x8] sm:$0xff] %v2492_v7  ;;  %v3405_v11 = vadd.f32 %v3404_v47, %v3403_v28  ;;  %v6554_v28 = vsub.f32 %v5581_v1, %v5595_v25  ;;  %v2084_v25 = vld [vmem:[%s4642_s3 + $0x50] sm:$0xff] }
 0x3ed   : > { %v3406_v50 = vpop.f32.mrf.mxu1 }
 0x3ee   : > { %v2493_v22 = vadd.f32 %v3405_v11, %v2268_v53  ;;  %1983 = vadd.xlane.f32.xlu0 %v5716_v29  ;;  %1992 = vadd.xlane.f32.xlu1 %v5780_v5  ;;  %v2270_v5 = vmul.f32 %v2129_v3, %v2078_v10  ;;  %v2139_v19 = vpop.permute.xlu0 %2138  ;;  %v1493_v7 = vmul.f32 1.442695, %v6554_v28 }
 0x3ef   : > { %v3407_v51 = vpop.f32.mrf.mxu1 }
 0x3f0   : > { %2525 = vst [vmem:[%s4642_s3 + $0x10] sm:$0xff] %v2493_v22  ;;  %v3408_v9 = vadd.f32 %v3407_v51, %v3406_v50  ;;  %v2154_v50 = vpop.permute.xlu1 %2153 }
 0x3f1   : > { %v3409_v59 = vpop.f32.mrf.mxu1  ;;  %v2275_v10 = vmul.f32 %v2154_v50, %v2083_v39  ;;  %v1850_v50 = vld [vmem:[#allocation3 + $0x8] sm:$0xff] }
 0x3f2   : > { %v2494_v24 = vadd.f32 %v3408_v9, %v2269_v20  ;;  %1989 = vadd.xlane.f32.xlu0 %v5737_v63  ;;  %1998 = vadd.xlane.f32.xlu1 %v5785_v4  ;;  %v6553_v4 = vsub.f32 %v5520_v18, %v5532_v27  ;;  %v2272_v27 = vmul.f32 %v2139_v19, %v2080_v45 }
 0x3f3   : > { %v3410_v34 = vpop.f32.mrf.mxu1 }
 0x3f4   : > { %v3879_v29 = vpop.eup %3878  ;;  %2526 = vst [vmem:[%s4642_s3 + $0x18] sm:$0xff] %v2494_v24  ;;  %v3411_v42 = vadd.f32 %v3410_v34, %v3409_v59  ;;  %v1495_v37 = vmul.f32 1.442695, %v6553_v4 }
 0x3f5   : > { %v3881_v6 = vpop.eup %3880  ;;  %v3412_v58 = vpop.f32.mrf.mxu1  ;;  %v2328_v35 = vpack.c.bf16 %v3875_v30, %v3879_v29 }
 0x3f6   : > { %v2495_v2 = vadd.f32 %v3411_v42, %v2270_v5  ;;  %1995 = vadd.xlane.f32.xlu0 %v5751_v13  ;;  %v2329_v41 = vpack.c.bf16 %v3877_v33, %v3881_v6  ;;  %v2003_v63 = vadd.f32 %v3881_v6, %v3879_v29  ;;  %3882 = vpow2.f32 %v1495_v37  ;;  %v2085_v29 = vld [vmem:[%s4642_s3 + $0x58] sm:$0xff]  ;;  %v2164_v5 = vpop.permute.xlu1 %2163 }
 0x3f7   : > { %v3413_v38 = vpop.f32.mrf.mxu1  ;;  %3884 = vpow2.f32 %v1493_v7  ;;  %v2277_v49 = vmul.f32 %v2164_v5, %v2085_v29  ;;  %v1851_v29 = vld [vmem:[#allocation3 + $0x10] sm:$0xff] }
 0x3f8   : > { %2527 = vst [vmem:[%s4642_s3 + $0x20] sm:$0xff] %v2495_v2  ;;  %v3414_v54 = vadd.f32 %v3413_v38, %v3412_v58  ;;  %2482 = vmatprep.mubr.bf16.mxu1 %v2329_v41  ;;  %2004 = vadd.xlane.f32.xlu1 %v2003_v63 }
 0x3f9   : > { %v3415_v21 = vpop.f32.mrf.mxu1  ;;  %2483 = vmatmul.mubr.bf16.gmra.mxu1 %v2328_v35 }
 0x3fa   : > { %v2496_v13 = vadd.f32 %v3414_v54, %v2271_v52  ;;  %2001 = vadd.xlane.f32.xlu0 %v5758_v15  ;;  %v2149_v15 = vpop.permute.xlu0 %2148  ;;  %v2174_v41 = vpop.permute.xlu1 %2173 }
 0x3fb   : > { %v3416_v18 = vpop.f32.mrf.mxu1  ;;  %v2274_v11 = vmul.f32 %v2149_v15, %v2082_v60 }
 0x3fc   : > { %2528 = vst [vmem:[%s4642_s3 + $0x28] sm:$0xff] %v2496_v13  ;;  %v3417_v23 = vadd.f32 %v3416_v18, %v3415_v21 }
 0x3fd   : > { %v3418_v32 = vpop.f32.mrf.mxu1 }
 0x3fe   : > { %v2497_v36 = vadd.f32 %v3417_v23, %v2272_v27  ;;  %2007 = vadd.xlane.f32.xlu0 %v2006_v31  ;;  %v2159_v3 = vpop.permute.xlu0 %2158  ;;  %v2184_v4 = vpop.permute.xlu1 %2183  ;;  %v2086_v31 = vld [vmem:[%s4642_s3 + $0x60] sm:$0xff] }
 0x3ff   : > { %v3419_v26 = vpop.f32.mrf.mxu1  ;;  %v2276_v33 = vmul.f32 %v2159_v3, %v2084_v25  ;;  %v1882_v3 = vmul.f32 %v5553_v57, %v1850_v50 }
 0x400   : > { %2529 = vst [vmem:[%s4642_s3 + $0x30] sm:$0xff] %v2497_v36  ;;  %v3420_v16 = vadd.f32 %v3419_v26, %v3418_v32 }
 0x401   : > { %v3421_v55 = vpop.f32.mrf.mxu1 }
 0x402   : > { %v2498_v47 = vadd.f32 %v3420_v16, %v2273_v46  ;;  %v2169_v63 = vpop.permute.xlu0 %2168  ;;  %v5861_v38 = vpop.permute.xlu1 %2193  ;;  %v2087_v16 = vld [vmem:[%s4642_s3 + $0x68] sm:$0xff] }
 0x403   : > { %v3422_v53 = vpop.f32.mrf.mxu1  ;;  %v5849_v9 = vpop.eup %3882  ;;  %v2278_v32 = vmul.f32 %v2169_v63, %v2086_v31  ;;  %v2279_v28 = vmul.f32 %v2174_v41, %v2087_v16  ;;  %v1855_v31 = vld [vmem:[#allocation3 + $0x30] sm:$0xff] }
 0x404   : > { %2530 = vst [vmem:[%s4642_s3 + $0x38] sm:$0xff] %v2498_v47  ;;  %v3423_v61 = vadd.f32 %v3422_v53, %v3421_v55  ;;  %v5857_v2 = vpop.eup %3884  ;;  %v2088_v47 = vld [vmem:[%s4642_s3 + $0x70] sm:$0xff] }
 0x405   : > { %v3424_v22 = vpop.f32.mrf.mxu1 }
 0x406   : > { %v2499_v51 = vadd.f32 %v3423_v61, %v2274_v11  ;;  %v2179_v37 = vpop.permute.xlu0 %2178  ;;  %v5865_v54 = vpop.permute.xlu1 %2203 }
 0x407   : > { %v3425_v20 = vpop.f32.mrf.mxu1 }
 0x408   : > { %2531 = vst [vmem:[%s4642_s3 + $0x40] sm:$0xff] %v2499_v51  ;;  %v3426_v1 = vadd.f32 %v3425_v20, %v3424_v22  ;;  %v1849_v22 = vld [vmem:[#allocation3] sm:$0xff]  ;;  %v2280_v20 = vmul.f32 %v2179_v37, %v2088_v47 }
 0x409   : > { %v3427_v59 = vpop.f32.mrf.mxu1  ;;  %2263 = vperm.xlu1 %3677, %v5849_v9  }
 0x40a   : > { %v2500_v30 = vadd.f32 %v3426_v1, %v2275_v10  ;;  %v5863_v52 = vpop.permute.xlu0 %2188  ;;  %v5869_v19 = vpop.permute.xlu1 %2213  ;;  %v2089_v1 = vld [vmem:[%s4642_s3 + $0x78] sm:$0xff] }
 0x40b   : > { %v3428_v24 = vpop.f32.mrf.mxu1 }
 0x40c   : > { %2532 = vst [vmem:[%s4642_s3 + $0x48] sm:$0xff] %v2500_v30  ;;  %v3429_v34 = vadd.f32 %v3428_v24, %v3427_v59  ;;  %v1881_v59 = vmul.f32 %v5548_v43, %v1849_v22 }
 0x40d   : > { %v3430_v42 = vpop.f32.mrf.mxu1 }
 0x40e   : > { %v2501_v6 = vadd.f32 %v3429_v34, %v2276_v33  ;;  %v5867_v45 = vpop.permute.xlu0 %2198  ;;  %v5873_v13 = vpop.permute.xlu1 %2223  ;;  %v1853_v34 = vld [vmem:[#allocation3 + $0x20] sm:$0xff] }
 0x40f   : > { %v3431_v12 = vpop.f32.mrf.mxu1  ;;  %v1885_v43 = vmul.f32 %v5569_v0, %v1853_v34  ;;  %v1887_v0 = vmul.f32 %v5578_v14, %v1855_v31  ;;  %v1859_v34 = vld [vmem:[#allocation3 + $0x50] sm:$0xff] }
 0x410   : > { %2533 = vst [vmem:[%s4642_s3 + $0x50] sm:$0xff] %v2501_v6  ;;  %v3432_v58 = vadd.f32 %v3431_v12, %v3430_v42  ;;  %v2281_v12 = vmul.f32 %v2184_v4, %v2089_v1  ;;  %v6556_v1 = vld [vmem:[#allocation78_spill] sm:$0xff] }
 0x412   : > { %v2502_v35 = vadd.f32 %v3432_v58, %v2277_v49  ;;  %v5871_v21 = vpop.permute.xlu0 %2208  ;;  %v5877_v27 = vpop.permute.xlu1 %2233  ;;  %v2090_v58 = vld [vmem:[%s4642_s3 + $0x80] sm:$0xff] }
 0x414   : > { %2534 = vst [vmem:[%s4642_s3 + $0x58] sm:$0xff] %v2502_v35  ;;  %2258 = vperm.xlu0 %3676, %v5857_v2   ;;  %v1883_v35 = vmul.f32 %v5558_v17, %v1851_v29  ;;  %v1856_v29 = vld [vmem:[#allocation3 + $0x38] sm:$0xff] }
 0x416   : > { %v5875_v18 = vpop.permute.xlu0 %2218  ;;  %v5882_v36 = vpop.permute.xlu1 %2243 }
 0x41a   : > { %v5879_v23 = vpop.permute.xlu0 %2228  ;;  %v5889_v11 = vpop.permute.xlu1 %2253 }
 0x41e   : > { %v5884_v26 = vpop.permute.xlu0 %2238 }
 0x422   : > { %v5891_v61 = vpop.permute.xlu0 %2248 }
 0x43a   : > { %v3433_v40 = vpop.f32.mrf.mxu1 }
 0x43c   : > { %v3434_v8 = vpop.f32.mrf.mxu1 }
 0x43d   : > { %v3435_v46 = vadd.f32 %v3434_v8, %v3433_v40  ;;  %v1852_v40 = vld [vmem:[#allocation3 + $0x18] sm:$0xff] }
 0x43e   : > { %v3436_v60 = vpop.f32.mrf.mxu1 }
 0x43f   : > { %v2503_v15 = vadd.f32 %v3435_v46, %v2278_v32  ;;  %v2282_v46 = vmul.f32 %v5863_v52, %v2090_v58 }
 0x440   : > { %v3437_v55 = vpop.f32.mrf.mxu1 }
 0x441   : > { %2535 = vst [vmem:[%s4642_s3 + $0x60] sm:$0xff] %v2503_v15  ;;  %v3438_v7 = vadd.f32 %v3437_v55, %v3436_v60  ;;  %v2091_v60 = vld [vmem:[%s4642_s3 + $0x88] sm:$0xff]  ;;  %v6555_v15 = vld [vmem:[#allocation75_spill] sm:$0xff] }
 0x442   : > { %v3439_v53 = vpop.f32.mrf.mxu1  ;;  %v1884_v55 = vmul.f32 %v6555_v15, %v1852_v40  ;;  %v1861_v40 = vld [vmem:[#allocation3 + $0x60] sm:$0xff] }
 0x443   : > { %v2504_v39 = vadd.f32 %v3438_v7, %v2279_v28 }
 0x444   : > { %v3440_v51 = vpop.f32.mrf.mxu1 }
 0x445   : > { %2536 = vst [vmem:[%s4642_s3 + $0x68] sm:$0xff] %v2504_v39  ;;  %v3441_v10 = vadd.f32 %v3440_v51, %v3439_v53  ;;  %v1857_v53 = vld [vmem:[#allocation3 + $0x40] sm:$0xff]  ;;  %v1854_v39 = vld [vmem:[#allocation3 + $0x28] sm:$0xff]  ;;  %v2283_v51 = vmul.f32 %v5861_v38, %v2091_v60 }
 0x446   : > { %v3442_v25 = vpop.f32.mrf.mxu1  ;;  %v2094_v60 = vld [vmem:[%s4642_s3 + $0xa0] sm:$0xff] }
 0x447   : > { %v2505_v30 = vadd.f32 %v3441_v10, %v2280_v20  ;;  %v1918_v24 = vpop.xlane.xlu1 %1917  ;;  %v1915_v33 = vpop.xlane.xlu0 %1914  ;;  %v2092_v10 = vld [vmem:[%s4642_s3 + $0x90] sm:$0xff] }
 0x448   : > { %v2010_v5 = vadd.f32 %v1918_v24, %v1882_v3  ;;  %v3443_v42 = vpop.f32.mrf.mxu1  ;;  %v2009_v6 = vadd.f32 %v1915_v33, %v1881_v59  ;;  %v6557_v3 = vld [vmem:[#allocation76_spill] sm:$0xff] }
 0x449   : > { %2537 = vst [vmem:[%s4642_s3 + $0x70] sm:$0xff] %v2505_v30  ;;  %v3444_v49 = vadd.f32 %v3443_v42, %v3442_v25  ;;  %v1889_v25 = vmul.f32 %v6556_v1, %v1857_v53  ;;  %v1886_v59 = vmul.f32 %v6557_v3, %v1854_v39  ;;  %v1863_v39 = vld [vmem:[#allocation3 + $0x70] sm:$0xff] }
 0x44a   : > { %2043 = vst.msk [vmem:[#allocation3 + $0x8] sm:$0xff] %vm2041_vm1, %v2010_v5  ;;  %2042 = vst.msk [vmem:[#allocation3] sm:$0xff] %vm2041_vm1, %v2009_v6  ;;  %v3445_v57 = vpop.f32.mrf.mxu1  ;;  %v2284_v6 = vmul.f32 %v5867_v45, %v2092_v10  ;;  %v2095_v10 = vld [vmem:[%s4642_s3 + $0xa8] sm:$0xff]  ;;  %v1895_v1 = vmul.f32 %v5621_v62, %v1863_v39 }
 0x44b   : > { %v2506_v41 = vadd.f32 %v3444_v49, %v2281_v12  ;;  %v1927_v63 = vpop.xlane.xlu1 %1926  ;;  %v1921_v37 = vpop.xlane.xlu0 %1920  ;;  %v2093_v49 = vld [vmem:[%s4642_s3 + $0x98] sm:$0xff] }
 0x44c   : > { %v2013_v4 = vadd.f32 %v1927_v63, %v1885_v43  ;;  %v3446_v8 = vpop.f32.mrf.mxu1  ;;  %v2011_v32 = vadd.f32 %v1921_v37, %v1883_v35  ;;  %v6559_v35 = vld [vmem:[#allocation77_spill] sm:$0xff] }
 0x44d   : > { %2538 = vst [vmem:[%s4642_s3 + $0x78] sm:$0xff] %v2506_v41  ;;  %v3447_v16 = vadd.f32 %v3446_v8, %v3445_v57  ;;  %v6558_v57 = vld [vmem:[#allocation80_spill] sm:$0xff]  ;;  %v1888_v41 = vmul.f32 %v6559_v35, %v1856_v29 }
 0x44e   : > { %2046 = vst.msk [vmem:[#allocation3 + $0x20] sm:$0xff] %vm2041_vm1, %v2013_v4  ;;  %2044 = vst.msk [vmem:[#allocation3 + $0x10] sm:$0xff] %vm2041_vm1, %v2011_v32  ;;  %v3448_v17 = vpop.f32.mrf.mxu1  ;;  %v1891_v43 = vmul.f32 %v6558_v57, %v1859_v34  ;;  %v1858_v4 = vld [vmem:[#allocation3 + $0x48] sm:$0xff] }
 0x44f   : > { %v2507_v28 = vadd.f32 %v3447_v16, %v2282_v46  ;;  %v1933_v7 = vpop.xlane.xlu1 %1932  ;;  %v1924_v47 = vpop.xlane.xlu0 %1923  ;;  %v2285_v46 = vmul.f32 %v5865_v54, %v2093_v49  ;;  %v1862_v34 = vld [vmem:[#allocation3 + $0x68] sm:$0xff] }
 0x450   : > { %v2015_v52 = vadd.f32 %v1933_v7, %v1887_v0  ;;  %v3449_v50 = vpop.f32.mrf.mxu1  ;;  %v2012_v22 = vadd.f32 %v1924_v47, %v1884_v55  ;;  %v6560_v0 = vld [vmem:[#allocation82_spill] sm:$0xff]  ;;  %v6561_v55 = vld [vmem:[#allocation79_spill] sm:$0xff] }
 0x451   : > { %2539 = vst [vmem:[%s4642_s3 + $0x80] sm:$0xff] %v2507_v28  ;;  %v3450_v20 = vadd.f32 %v3449_v50, %v3448_v17  ;;  %v1893_v15 = vmul.f32 %v6560_v0, %v1861_v40  ;;  %v1890_v28 = vmul.f32 %v6561_v55, %v1858_v4  ;;  %v1869_v55 = vld [vmem:[#allocation3 + $0xa0] sm:$0xff] }
 0x452   : > { %2048 = vst.msk [vmem:[#allocation3 + $0x30] sm:$0xff] %vm2041_vm1, %v2015_v52  ;;  %2045 = vst.msk [vmem:[#allocation3 + $0x18] sm:$0xff] %vm2041_vm1, %v2012_v22  ;;  %v3451_v14 = vpop.f32.mrf.mxu1  ;;  %v1860_v52 = vld [vmem:[#allocation3 + $0x58] sm:$0xff] }
 0x453   : > { %v2508_v30 = vadd.f32 %v3450_v20, %v2283_v51  ;;  %v1939_v24 = vpop.xlane.xlu1 %1938  ;;  %v1930_v33 = vpop.xlane.xlu0 %1929  ;;  %v2286_v51 = vmul.f32 %v5871_v21, %v2094_v60 }
 0x454   : > { %v2017_v38 = vadd.f32 %v1939_v24, %v1889_v25  ;;  %v3452_v5 = vpop.f32.mrf.mxu1  ;;  %v2014_v42 = vadd.f32 %v1930_v33, %v1886_v59  ;;  %v6562_v25 = vld [vmem:[#allocation81_spill] sm:$0xff]  ;;  %v1865_v33 = vld [vmem:[#allocation3 + $0x80] sm:$0xff] }
 0x455   : > { %2540 = vst [vmem:[%s4642_s3 + $0x88] sm:$0xff] %v2508_v30  ;;  %v3453_v12 = vadd.f32 %v3452_v5, %v3451_v14  ;;  %v1892_v3 = vmul.f32 %v6562_v25, %v1860_v52  ;;  %v2287_v5 = vmul.f32 %v5869_v19, %v2095_v10  ;;  %v2098_v52 = vld [vmem:[%s4642_s3 + $0xc0] sm:$0xff]  ;;  %v1868_v25 = vld [vmem:[#allocation3 + $0x98] sm:$0xff] }
 0x456   : > { %2050 = vst.msk [vmem:[#allocation3 + $0x40] sm:$0xff] %vm2041_vm1, %v2017_v38  ;;  %2047 = vst.msk [vmem:[#allocation3 + $0x28] sm:$0xff] %vm2041_vm1, %v2014_v42  ;;  %v3454_v58 = vpop.f32.mrf.mxu1 }
 0x457   : > { %v2509_v63 = vadd.f32 %v3453_v12, %v2284_v6  ;;  %v1945_v37 = vpop.xlane.xlu1 %1944  ;;  %v1936_v31 = vpop.xlane.xlu0 %1935  ;;  %v2096_v6 = vld [vmem:[%s4642_s3 + $0xb0] sm:$0xff]  ;;  %v6563_v12 = vld [vmem:[#allocation87_spill] sm:$0xff] }
 0x458   : > { %v2019_v45 = vadd.f32 %v1945_v37, %v1891_v43  ;;  %v3455_v8 = vpop.f32.mrf.mxu1  ;;  %v2016_v32 = vadd.f32 %v1936_v31, %v1888_v41  ;;  %v1897_v49 = vmul.f32 %v6563_v12, %v1865_v33  ;;  %v1864_v37 = vld [vmem:[#allocation3 + $0x78] sm:$0xff]  ;;  %v2288_v4 = vmul.f32 %v5875_v18, %v2096_v6  ;;  %v2099_v33 = vld [vmem:[%s4642_s3 + $0xc8] sm:$0xff]  ;;  %v1873_v12 = vld [vmem:[#allocation3 + $0xc0] sm:$0xff] }
 0x459   : > { %2541 = vst [vmem:[%s4642_s3 + $0x90] sm:$0xff] %v2509_v63  ;;  %v3456_v16 = vadd.f32 %v3455_v8, %v3454_v58  ;;  %v6564_v58 = vld [vmem:[#allocation85_spill] sm:$0xff]  ;;  %v2097_v8 = vld [vmem:[%s4642_s3 + $0xb8] sm:$0xff] }
 0x45a   : > { %2052 = vst.msk [vmem:[#allocation3 + $0x50] sm:$0xff] %vm2041_vm1, %v2019_v45  ;;  %2049 = vst.msk [vmem:[#allocation3 + $0x38] sm:$0xff] %vm2041_vm1, %v2016_v32  ;;  %v3457_v17 = vpop.f32.mrf.mxu1  ;;  %v1894_v57 = vmul.f32 %v6564_v58, %v1862_v34  ;;  %v1867_v63 = vld [vmem:[#allocation3 + $0x90] sm:$0xff] }
 0x45b   : > { %v2510_v7 = vadd.f32 %v3456_v16, %v2285_v46  ;;  %v1951_v47 = vpop.xlane.xlu1 %1950  ;;  %v1942_v53 = vpop.xlane.xlu0 %1941  ;;  %v1899_v46 = vmul.f32 %v5635_v44, %v1867_v63  ;;  %v6565_v16 = vld [vmem:[#allocation86_spill] sm:$0xff] }
 0x45c   : > { %v2021_v54 = vadd.f32 %v1951_v47, %v1893_v15  ;;  %v3458_v50 = vpop.f32.mrf.mxu1  ;;  %v2018_v22 = vadd.f32 %v1942_v53, %v1890_v28  ;;  %v1896_v60 = vmul.f32 %v6565_v16, %v1864_v37  ;;  %v1866_v28 = vld [vmem:[#allocation3 + $0x88] sm:$0xff]  ;;  %v2289_v53 = vmul.f32 %v5873_v13, %v2097_v8  ;;  %v6570_v37 = vld [vmem:[#allocation95_spill] sm:$0xff] }
 0x45d   : > { %2542 = vst [vmem:[%s4642_s3 + $0x98] sm:$0xff] %v2510_v7  ;;  %v3459_v20 = vadd.f32 %v3458_v50, %v3457_v17 }
 0x45e   : > { %2054 = vst.msk [vmem:[#allocation3 + $0x60] sm:$0xff] %vm2041_vm1, %v2021_v54  ;;  %2051 = vst.msk [vmem:[#allocation3 + $0x48] sm:$0xff] %vm2041_vm1, %v2018_v22  ;;  %v3460_v14 = vpop.f32.mrf.mxu1  ;;  %v6566_v54 = vld [vmem:[#allocation92_spill] sm:$0xff] }
 0x45f   : > { %v2511_v59 = vadd.f32 %v3459_v20, %v2286_v51  ;;  %v1957_v30 = vpop.xlane.xlu1 %1956  ;;  %v1948_v24 = vpop.xlane.xlu0 %1947  ;;  %v1901_v50 = vmul.f32 %v6566_v54, %v1869_v55  ;;  %v6567_v22 = vld [vmem:[#allocation88_spill] sm:$0xff] }
 0x460   : > { %v2023_v21 = vadd.f32 %v1957_v30, %v1895_v1  ;;  %v3461_v29 = vpop.f32.mrf.mxu1  ;;  %v2020_v38 = vadd.f32 %v1948_v24, %v1892_v3  ;;  %v1898_v51 = vmul.f32 %v6567_v22, %v1866_v28  ;;  %v1871_v1 = vld [vmem:[#allocation3 + $0xb0] sm:$0xff]  ;;  %v2290_v30 = vmul.f32 %v5879_v23, %v2098_v52  ;;  %v1877_v52 = vld [vmem:[#allocation3 + $0xe0] sm:$0xff] }
 0x461   : > { %2543 = vst [vmem:[%s4642_s3 + $0xa0] sm:$0xff] %v2511_v59  ;;  %v3462_v42 = vadd.f32 %v3461_v29, %v3460_v14 }
 0x462   : > { %2056 = vst.msk [vmem:[#allocation3 + $0x70] sm:$0xff] %vm2041_vm1, %v2023_v21  ;;  %2053 = vst.msk [vmem:[#allocation3 + $0x58] sm:$0xff] %vm2041_vm1, %v2020_v38  ;;  %v3463_v62 = vpop.f32.mrf.mxu1  ;;  %v6568_v21 = vld [vmem:[#allocation94_spill] sm:$0xff]  ;;  %v6569_v38 = vld [vmem:[#allocation89_spill] sm:$0xff] }
 0x463   : > { %v2512_v43 = vadd.f32 %v3462_v42, %v2287_v5  ;;  %v1963_v35 = vpop.xlane.xlu1 %1962  ;;  %v1954_v41 = vpop.xlane.xlu0 %1953  ;;  %v1903_v29 = vmul.f32 %v6568_v21, %v1871_v1  ;;  %v1900_v5 = vmul.f32 %v6569_v38, %v1868_v25  ;;  %v1879_v21 = vld [vmem:[#allocation3 + $0xf0] sm:$0xff]  ;;  %v6574_v38 = vld [vmem:[#allocation96_spill] sm:$0xff] }
 0x464   : > { %v2025_v19 = vadd.f32 %v1963_v35, %v1897_v49  ;;  %v3464_v31 = vpop.f32.mrf.mxu1  ;;  %v2022_v40 = vadd.f32 %v1954_v41, %v1894_v57  ;;  %v1870_v49 = vld [vmem:[#allocation3 + $0xa8] sm:$0xff]  ;;  %v2100_v41 = vld [vmem:[%s4642_s3 + $0xd0] sm:$0xff] }
 0x465   : > { %2544 = vst [vmem:[%s4642_s3 + $0xa8] sm:$0xff] %v2512_v43  ;;  %v3465_v45 = vadd.f32 %v3464_v31, %v3463_v62  ;;  %v2291_v43 = vmul.f32 %v5877_v27, %v2099_v33  ;;  %v6571_v31 = vld [vmem:[#allocation93_spill] sm:$0xff] }
 0x466   : > { %2058 = vst.msk [vmem:[#allocation3 + $0x80] sm:$0xff] %vm2041_vm1, %v2025_v19  ;;  %2055 = vst.msk [vmem:[#allocation3 + $0x68] sm:$0xff] %vm2041_vm1, %v2022_v40  ;;  %v3466_v32 = vpop.f32.mrf.mxu1  ;;  %v1905_v19 = vmul.f32 %v6570_v37, %v1873_v12  ;;  %v1902_v40 = vmul.f32 %v6571_v31, %v1870_v49 }
 0x467   : > { %v2513_v17 = vadd.f32 %v3465_v45, %v2288_v4  ;;  %v1969_v0 = vpop.xlane.xlu1 %1968  ;;  %v1960_v15 = vpop.xlane.xlu0 %1959 }
 0x468   : > { %v2027_v18 = vadd.f32 %v1969_v0, %v1899_v46  ;;  %v3467_v7 = vpop.f32.mrf.mxu1  ;;  %v2024_v47 = vadd.f32 %v1960_v15, %v1896_v60  ;;  %v1872_v46 = vld [vmem:[#allocation3 + $0xb8] sm:$0xff] }
 0x469   : > { %2545 = vst [vmem:[%s4642_s3 + $0xb0] sm:$0xff] %v2513_v17  ;;  %v3468_v39 = vadd.f32 %v3467_v7, %v3466_v32  ;;  %v1875_v32 = vld [vmem:[#allocation3 + $0xd0] sm:$0xff]  ;;  %v2292_v17 = vmul.f32 %v5884_v26, %v2100_v41  ;;  %v2101_v15 = vld [vmem:[%s4642_s3 + $0xd8] sm:$0xff] }
 0x46a   : > { %2060 = vst.msk [vmem:[#allocation3 + $0x90] sm:$0xff] %vm2041_vm1, %v2027_v18  ;;  %2057 = vst.msk [vmem:[#allocation3 + $0x78] sm:$0xff] %vm2041_vm1, %v2024_v47  ;;  %v3469_v44 = vpop.f32.mrf.mxu1  ;;  %v1907_v28 = vmul.f32 %v5769_v56, %v1875_v32  ;;  %v6572_v18 = vld [vmem:[#allocation39_spill] sm:$0xff]  ;;  %v2293_v22 = vmul.f32 %v5882_v36, %v2101_v15 }
 0x46b   : > { %v2514_v20 = vadd.f32 %v3468_v39, %v2289_v53  ;;  %v1975_v10 = vpop.xlane.xlu1 %1974  ;;  %v1966_v14 = vpop.xlane.xlu0 %1965  ;;  %v1904_v7 = vmul.f32 %v6572_v18, %v1872_v46 }
 0x46c   : > { %v2029_v13 = vadd.f32 %v1975_v10, %v1901_v50  ;;  %v3470_v3 = vpop.f32.mrf.mxu1  ;;  %v2026_v59 = vadd.f32 %v1966_v14, %v1898_v51  ;;  %v1909_v10 = vmul.f32 %v5782_v48, %v1877_v52  ;;  %v6573_v14 = vld [vmem:[#allocation40_spill] sm:$0xff] }
 0x46d   : > { %2546 = vst [vmem:[%s4642_s3 + $0xb8] sm:$0xff] %v2514_v20  ;;  %v3471_v24 = vadd.f32 %v3470_v3, %v3469_v44  ;;  %v1874_v44 = vld [vmem:[#allocation3 + $0xc8] sm:$0xff]  ;;  %v2102_v20 = vld [vmem:[%s4642_s3 + $0xe0] sm:$0xff] }
 0x46e   : > { %2062 = vst.msk [vmem:[#allocation3 + $0xa0] sm:$0xff] %vm2041_vm1, %v2029_v13  ;;  %2059 = vst.msk [vmem:[#allocation3 + $0x88] sm:$0xff] %vm2041_vm1, %v2026_v59  ;;  %v3472_v34 = vpop.f32.mrf.mxu1  ;;  %v1906_v1 = vmul.f32 %v6573_v14, %v1874_v44  ;;  %v1876_v59 = vld [vmem:[#allocation3 + $0xd8] sm:$0xff]  ;;  %v2294_v33 = vmul.f32 %v5891_v61, %v2102_v20  ;;  %v1911_v61 = vmul.f32 %v5857_v2, %v1879_v21 }
 0x46f   : > { %v2515_v42 = vadd.f32 %v3471_v24, %v2290_v30  ;;  %v1981_v6 = vpop.xlane.xlu1 %1980  ;;  %v1972_v62 = vpop.xlane.xlu0 %1971 }
 0x470   : > { %v2031_v23 = vadd.f32 %v1981_v6, %v1903_v29  ;;  %v3473_v58 = vpop.f32.mrf.mxu1  ;;  %v2028_v57 = vadd.f32 %v1972_v62, %v1900_v5  ;;  %v2103_v29 = vld [vmem:[%s4642_s3 + $0xe8] sm:$0xff]  ;;  %v1908_v5 = vmul.f32 %v6574_v38, %v1876_v59 }
 0x471   : > { %2547 = vst [vmem:[%s4642_s3 + $0xc0] sm:$0xff] %v2515_v42  ;;  %v3474_v35 = vadd.f32 %v3473_v58, %v3472_v34  ;;  %v1878_v62 = vld [vmem:[#allocation3 + $0xe8] sm:$0xff] }
 0x472   : > { %2064 = vst.msk [vmem:[#allocation3 + $0xb0] sm:$0xff] %vm2041_vm1, %v2031_v23  ;;  %2061 = vst.msk [vmem:[#allocation3 + $0x98] sm:$0xff] %vm2041_vm1, %v2028_v57  ;;  %v3475_v63 = vpop.f32.mrf.mxu1  ;;  %v2295_v23 = vmul.f32 %v5889_v11, %v2103_v29 }
 0x473   : > { %v2516_v4 = vadd.f32 %v3474_v35, %v2291_v43  ;;  %v1987_v45 = vpop.xlane.xlu1 %1986  ;;  %v1978_v8 = vpop.xlane.xlu0 %1977  ;;  %v6575_v35 = vld [vmem:[#allocation97_spill] sm:$0xff] }
 0x474   : > { %v2033_v27 = vadd.f32 %v1987_v45, %v1905_v19  ;;  %v3476_v16 = vpop.f32.mrf.mxu1  ;;  %v2030_v60 = vadd.f32 %v1978_v8, %v1902_v40  ;;  %v1910_v41 = vmul.f32 %v6575_v35, %v1878_v62  ;;  %v1880_v19 = vld [vmem:[#allocation3 + $0xf8] sm:$0xff] }
 0x475   : > { %2548 = vst [vmem:[%s4642_s3 + $0xc8] sm:$0xff] %v2516_v4  ;;  %v3477_v0 = vadd.f32 %v3476_v16, %v3475_v63  ;;  %v1912_v2 = vmul.f32 %v5849_v9, %v1880_v19  ;;  %v2104_v4 = vld [vmem:[%s4642_s3 + $0xf0] sm:$0xff]  ;;  %v2105_v16 = vld [vmem:[%s4642_s3 + $0xf8] sm:$0xff] }
 0x476   : > { %2066 = vst.msk [vmem:[#allocation3 + $0xc0] sm:$0xff] %vm2041_vm1, %v2033_v27  ;;  %2063 = vst.msk [vmem:[#allocation3 + $0xa8] sm:$0xff] %vm2041_vm1, %v2030_v60  ;;  %v3478_v55 = vpop.f32.mrf.mxu1 }
 0x477   : > { %v2517_v47 = vadd.f32 %v3477_v0, %v2292_v17  ;;  %v1993_v53 = vpop.xlane.xlu1 %1992  ;;  %v1984_v39 = vpop.xlane.xlu0 %1983 }
 0x478   : > { %v3479_v26 = vpop.f32.mrf.mxu1  ;;  %v2035_v54 = vadd.f32 %v1993_v53, %v1907_v28  ;;  %v2032_v50 = vadd.f32 %v1984_v39, %v1904_v7 }
 0x479   : > { %2549 = vst [vmem:[%s4642_s3 + $0xd0] sm:$0xff] %v2517_v47  ;;  %v3480_v51 = vadd.f32 %v3479_v26, %v3478_v55 }
 0x47a   : > { %2068 = vst.msk [vmem:[#allocation3 + $0xd0] sm:$0xff] %vm2041_vm1, %v2035_v54  ;;  %2065 = vst.msk [vmem:[#allocation3 + $0xb8] sm:$0xff] %vm2041_vm1, %v2032_v50  ;;  %v3481_v56 = vpop.f32.mrf.mxu1 }
 0x47b   : > { %v2518_v25 = vadd.f32 %v3480_v51, %v2293_v22  ;;  %v1999_v13 = vpop.xlane.xlu1 %1998  ;;  %v1990_v3 = vpop.xlane.xlu0 %1989 }
 0x47c   : > { %v3482_v30 = vpop.f32.mrf.mxu1  ;;  %v2037_v36 = vadd.f32 %v1999_v13, %v1909_v10  ;;  %v2034_v24 = vadd.f32 %v1990_v3, %v1906_v1 }
 0x47d   : > { %2550 = vst [vmem:[%s4642_s3 + $0xd8] sm:$0xff] %v2518_v25  ;;  %v3483_v34 = vadd.f32 %v3482_v30, %v3481_v56 }
 0x47e   : > { %2070 = vst.msk [vmem:[#allocation3 + $0xe0] sm:$0xff] %vm2041_vm1, %v2037_v36  ;;  %2067 = vst.msk [vmem:[#allocation3 + $0xc8] sm:$0xff] %vm2041_vm1, %v2034_v24  ;;  %v3484_v48 = vpop.f32.mrf.mxu1 }
 0x47f   : > { %v2519_v42 = vadd.f32 %v3483_v34, %v2294_v33  ;;  %v1996_v6 = vpop.xlane.xlu0 %1995 }
 0x480   : > { %v3485_v12 = vpop.f32.mrf.mxu1  ;;  %v2036_v49 = vadd.f32 %v1996_v6, %v1908_v5 }
 0x481   : > { %2551 = vst [vmem:[%s4642_s3 + $0xe0] sm:$0xff] %v2519_v42  ;;  %v3486_v58 = vadd.f32 %v3485_v12, %v3484_v48  ;;  %v2005_v57 = vpop.xlane.xlu1 %2004 }
 0x482   : > { %2069 = vst.msk [vmem:[#allocation3 + $0xd8] sm:$0xff] %vm2041_vm1, %v2036_v49  ;;  %v2039_v43 = vadd.f32 %v2005_v57, %v1911_v61 }
 0x483   : > { %v2520_v63 = vadd.f32 %v3486_v58, %v2295_v23  ;;  %v2002_v37 = vpop.xlane.xlu0 %2001 }
 0x484   : > { %2072 = vst.msk [vmem:[#allocation3 + $0xf0] sm:$0xff] %vm2041_vm1, %v2039_v43  ;;  %v2038_v31 = vadd.f32 %v2002_v37, %v1910_v41 }
 0x485   : > { %2552 = vst [vmem:[%s4642_s3 + $0xe8] sm:$0xff] %v2520_v63  ;;  %v2264_v60 = vpop.permute.xlu1 %2263 }
 0x486   : > { %2071 = vst.msk [vmem:[#allocation3 + $0xe8] sm:$0xff] %vm2041_vm1, %v2038_v31  ;;  %v2297_v55 = vmul.f32 %v2264_v60, %v2105_v16 }
 0x487   : > { %v2008_v11 = vpop.xlane.xlu0 %2007 }
 0x488   : > { %v2040_v40 = vadd.f32 %v2008_v11, %v1912_v2 }
 0x48a   : > { %2073 = vst.msk [vmem:[#allocation3 + $0xf8] sm:$0xff] %vm2041_vm1, %v2040_v40 }
 0x48f   : > { %v2259_v45 = vpop.permute.xlu0 %2258 }
 0x490   : > { %v2296_v46 = vmul.f32 %v2259_v45, %v2104_v4 }
 0x4b9   : > { %v3487_v8 = vpop.f32.mrf.mxu1 }
 0x4bb   : > { %v3488_v32 = vpop.f32.mrf.mxu1 }
 0x4bc   : > { %v3489_v27 = vadd.f32 %v3488_v32, %v3487_v8 }
 0x4bd   : > { %v3490_v17 = vpop.f32.mrf.mxu1 }
 0x4be   : > { %v2521_v0 = vadd.f32 %v3489_v27, %v2296_v46 }
 0x4bf   : > { %v3491_v15 = vpop.f32.mrf.mxu1 }
 0x4c0   : > { %2553 = vst [vmem:[%s4642_s3 + $0xf0] sm:$0xff] %v2521_v0  ;;  %v3492_v9 = vadd.f32 %v3491_v15, %v3490_v17  ;;  %2590 = sbr.rel (%p3197_p9) target bundleno = 1424 (0x590), region = 60 }
 0x4c2   : > { %v2522_v28 = vadd.f32 %v3492_v9, %v2297_v55 }
 0x4c4   : > { %2554 = vst [vmem:[%s4642_s3 + $0xf8] sm:$0xff] %v2522_v28 }
 0x4c5   : > { %v2625_v18 = vld [vmem:[#allocation3 + $0x10] sm:$0xff]  ;;  %v2623_v7 = vld [vmem:[#allocation3] sm:$0xff]  ;;  %v2626_v47 = vld [vmem:[#allocation3 + $0x18] sm:$0xff]  ;;  %v4261_v53 = vmov 0  }
 0x4c6   : > { %3887 = vset.pattern.permute.xlu1 %v4261_v53  ;;  %3886 = vset.pattern.permute.xlu0 %v4261_v53  ;;  %3888 = vrcp.f32 %v2625_v18  ;;  %v2624_v39 = vld [vmem:[#allocation3 + $0x8] sm:$0xff]  ;;  %v2627_v44 = vld [vmem:[#allocation3 + $0x20] sm:$0xff]  ;;  %v2630_v26 = vld [vmem:[#allocation3 + $0x38] sm:$0xff] }
 0x4c7   : > { %3890 = vrcp.f32 %v2623_v7  ;;  %v2628_v52 = vld [vmem:[#allocation3 + $0x28] sm:$0xff]  ;;  %v2629_v54 = vld [vmem:[#allocation3 + $0x30] sm:$0xff]  ;;  %v2631_v22 = vld [vmem:[#allocation3 + $0x40] sm:$0xff] }
 0x4c8   : > { %3892 = vrcp.f32 %v2626_v47  ;;  %v2632_v50 = vld [vmem:[#allocation3 + $0x48] sm:$0xff]  ;;  %v2634_v10 = vld [vmem:[#allocation3 + $0x58] sm:$0xff]  ;;  %v2633_v1 = vld [vmem:[#allocation3 + $0x50] sm:$0xff] }
 0x4c9   : > { %3894 = vrcp.f32 %v2624_v39  ;;  %v2636_v13 = vld [vmem:[#allocation3 + $0x68] sm:$0xff]  ;;  %v2635_v59 = vld [vmem:[#allocation3 + $0x60] sm:$0xff]  ;;  %v2638_v36 = vld [vmem:[#allocation3 + $0x78] sm:$0xff] }
 0x4ca   : > { %3896 = vrcp.f32 %v2628_v52  ;;  %v2637_v33 = vld [vmem:[#allocation3 + $0x70] sm:$0xff]  ;;  %v2640_v21 = vld [vmem:[#allocation3 + $0x88] sm:$0xff]  ;;  %v2639_v48 = vld [vmem:[#allocation3 + $0x80] sm:$0xff] }
 0x4cb   : > { %3898 = vrcp.f32 %v2627_v44  ;;  %v2642_v5 = vld [vmem:[#allocation3 + $0x98] sm:$0xff]  ;;  %v2641_v6 = vld [vmem:[#allocation3 + $0x90] sm:$0xff]  ;;  %v2644_v12 = vld [vmem:[#allocation3 + $0xa8] sm:$0xff] }
 0x4cc   : > { %3900 = vrcp.f32 %v2630_v26  ;;  %v2643_v61 = vld [vmem:[#allocation3 + $0xa0] sm:$0xff]  ;;  %v2646_v58 = vld [vmem:[#allocation3 + $0xb8] sm:$0xff]  ;;  %v2645_v43 = vld [vmem:[#allocation3 + $0xb0] sm:$0xff] }
 0x4cd   : > { %3902 = vrcp.f32 %v2629_v54  ;;  %v2648_v41 = vld [vmem:[#allocation3 + $0xc8] sm:$0xff]  ;;  %v2647_v37 = vld [vmem:[#allocation3 + $0xc0] sm:$0xff]  ;;  %v2650_v31 = vld [vmem:[#allocation3 + $0xd8] sm:$0xff] }
 0x4ce   : > { %3904 = vrcp.f32 %v2632_v50  ;;  %v2649_v11 = vld [vmem:[#allocation3 + $0xd0] sm:$0xff]  ;;  %v2652_v4 = vld [vmem:[#allocation3 + $0xe8] sm:$0xff]  ;;  %v2651_v8 = vld [vmem:[#allocation3 + $0xe0] sm:$0xff] }
 0x4cf   : > { %3906 = vrcp.f32 %v2631_v22  ;;  %v2654_v46 = vld [vmem:[#allocation3 + $0xf8] sm:$0xff]  ;;  %v2653_v16 = vld [vmem:[#allocation3 + $0xf0] sm:$0xff]  ;;  %v2591_v47 = vld [vmem:[%s4642_s3] sm:$0xff] }
 0x4d0   : > { %3908 = vrcp.f32 %v2634_v10  ;;  %v2593_v7 = vld [vmem:[%s4642_s3 + $0x10] sm:$0xff]  ;;  %v2594_v26 = vld [vmem:[%s4642_s3 + $0x18] sm:$0xff]  ;;  %v2592_v54 = vld [vmem:[%s4642_s3 + $0x8] sm:$0xff] }
 0x4d1   : > { %3910 = vrcp.f32 %v2633_v1  ;;  %v2595_v10 = vld [vmem:[%s4642_s3 + $0x20] sm:$0xff] }
 0x4d2   : > { %3912 = vrcp.f32 %v2636_v13 }
 0x4d3   : > { %v3889_v51 = vpop.eup %3888  ;;  %3914 = vrcp.f32 %v2635_v59  ;;  %v2597_v59 = vld [vmem:[%s4642_s3 + $0x30] sm:$0xff] }
 0x4d4   : > { %v3891_v20 = vpop.eup %3890  ;;  %2699 = vperm.xlu1 %3887, %v3889_v51   ;;  %3916 = vrcp.f32 %v2638_v36 }
 0x4d5   : > { %v3893_v56 = vpop.eup %3892  ;;  %2689 = vperm.xlu0 %3886, %v3891_v20   ;;  %3918 = vrcp.f32 %v2637_v33 }
 0x4d6   : > { %v3895_v14 = vpop.eup %3894  ;;  %3920 = vrcp.f32 %v2640_v21  ;;  %v2599_v21 = vld [vmem:[%s4642_s3 + $0x40] sm:$0xff] }
 0x4d7   : > { %v3897_v25 = vpop.eup %3896  ;;  %3922 = vrcp.f32 %v2639_v48 }
 0x4d8   : > { %2704 = vperm.xlu1 %3887, %v3893_v56   ;;  %v3899_v3 = vpop.eup %3898  ;;  %3924 = vrcp.f32 %v2642_v5  ;;  %v2596_v56 = vld [vmem:[%s4642_s3 + $0x28] sm:$0xff] }
 0x4d9   : > { %2694 = vperm.xlu0 %3886, %v3895_v14   ;;  %v3901_v30 = vpop.eup %3900  ;;  %3926 = vrcp.f32 %v2641_v6  ;;  %v2601_v6 = vld [vmem:[%s4642_s3 + $0x50] sm:$0xff] }
 0x4da   : > { %v3903_v24 = vpop.eup %3902  ;;  %3928 = vrcp.f32 %v2644_v12 }
 0x4db   : > { %v3905_v34 = vpop.eup %3904  ;;  %3930 = vrcp.f32 %v2643_v61 }
 0x4dc   : > { %2714 = vperm.xlu1 %3887, %v3897_v25   ;;  %v3907_v29 = vpop.eup %3906  ;;  %3932 = vrcp.f32 %v2646_v58  ;;  %v2603_v58 = vld [vmem:[%s4642_s3 + $0x60] sm:$0xff] }
 0x4dd   : > { %2709 = vperm.xlu0 %3886, %v3899_v3   ;;  %v3909_v38 = vpop.eup %3908  ;;  %3934 = vrcp.f32 %v2645_v43  ;;  %v2598_v3 = vld [vmem:[%s4642_s3 + $0x38] sm:$0xff] }
 0x4de   : > { %v3911_v42 = vpop.eup %3910  ;;  %3936 = vrcp.f32 %v2648_v41 }
 0x4df   : > { %v3913_v62 = vpop.eup %3912  ;;  %3938 = vrcp.f32 %v2647_v37  ;;  %v2605_v37 = vld [vmem:[%s4642_s3 + $0x70] sm:$0xff] }
 0x4e0   : > { %2724 = vperm.xlu1 %3887, %v3901_v30   ;;  %v3915_v49 = vpop.eup %3914  ;;  %3940 = vrcp.f32 %v2650_v31 }
 0x4e1   : > { %2719 = vperm.xlu0 %3886, %v3903_v24   ;;  %v3917_v23 = vpop.eup %3916  ;;  %3942 = vrcp.f32 %v2649_v11 }
 0x4e2   : > { %v3919_v57 = vpop.eup %3918  ;;  %3944 = vrcp.f32 %v2652_v4  ;;  %v2607_v4 = vld [vmem:[%s4642_s3 + $0x80] sm:$0xff] }
 0x4e3   : > { %v3921_v35 = vpop.eup %3920  ;;  %3946 = vrcp.f32 %v2651_v8 }
 0x4e4   : > { %2734 = vperm.xlu1 %3887, %v3905_v34   ;;  %v3923_v63 = vpop.eup %3922  ;;  %3948 = vrcp.f32 %v2654_v46  ;;  %v2600_v34 = vld [vmem:[%s4642_s3 + $0x48] sm:$0xff] }
 0x4e5   : > { %2729 = vperm.xlu0 %3886, %v3907_v29   ;;  %v3925_v19 = vpop.eup %3924  ;;  %3950 = vrcp.f32 %v2653_v16  ;;  %v2609_v16 = vld [vmem:[%s4642_s3 + $0x90] sm:$0xff] }
 0x4e6   : > { %v3927_v2 = vpop.eup %3926 }
 0x4e7   : > { %v3929_v40 = vpop.eup %3928 }
 0x4e8   : > { %2744 = vperm.xlu1 %3887, %v3909_v38   ;;  %v3931_v45 = vpop.eup %3930 }
 0x4e9   : > { %2739 = vperm.xlu0 %3886, %v3911_v42   ;;  %v3933_v32 = vpop.eup %3932  ;;  %v2602_v42 = vld [vmem:[%s4642_s3 + $0x58] sm:$0xff] }
 0x4ea   : > { %v3935_v27 = vpop.eup %3934 }
 0x4eb   : > { %v3937_v60 = vpop.eup %3936 }
 0x4ec   : > { %2754 = vperm.xlu1 %3887, %v3913_v62   ;;  %v3939_v17 = vpop.eup %3938 }
 0x4ed   : > { %2749 = vperm.xlu0 %3886, %v3915_v49   ;;  %v3941_v0 = vpop.eup %3940 }
 0x4ee   : > { %v3943_v15 = vpop.eup %3942 }
 0x4ef   : > { %v3945_v55 = vpop.eup %3944 }
 0x4f0   : > { %2764 = vperm.xlu1 %3887, %v3917_v23   ;;  %v3947_v9 = vpop.eup %3946  ;;  %v2604_v23 = vld [vmem:[%s4642_s3 + $0x68] sm:$0xff] }
 0x4f1   : > { %2759 = vperm.xlu0 %3886, %v3919_v57   ;;  %v3949_v28 = vpop.eup %3948 }
 0x4f2   : > { %v3951_v18 = vpop.eup %3950 }
 0x4f4   : > { %2774 = vperm.xlu1 %3887, %v3921_v35  }
 0x4f5   : > { %2769 = vperm.xlu0 %3886, %v3923_v63   ;;  %v2606_v63 = vld [vmem:[%s4642_s3 + $0x78] sm:$0xff] }
 0x4f8   : > { %2784 = vperm.xlu1 %3887, %v3925_v19  }
 0x4f9   : > { %2779 = vperm.xlu0 %3886, %v3927_v2  }
 0x4fc   : > { %2794 = vperm.xlu1 %3887, %v3929_v40   ;;  %v2608_v40 = vld [vmem:[%s4642_s3 + $0x88] sm:$0xff] }
 0x4fd   : > { %2789 = vperm.xlu0 %3886, %v3931_v45  }
 0x500   : > { %2804 = vperm.xlu1 %3887, %v3933_v32  }
 0x501   : > { %2799 = vperm.xlu0 %3886, %v3935_v27   ;;  %v2610_v27 = vld [vmem:[%s4642_s3 + $0x98] sm:$0xff] }
 0x504   : > { %2814 = vperm.xlu1 %3887, %v3937_v60  }
 0x505   : > { %2809 = vperm.xlu0 %3886, %v3939_v17  }
 0x508   : > { %2824 = vperm.xlu1 %3887, %v3941_v0  }
 0x509   : > { %2819 = vperm.xlu0 %3886, %v3943_v15  }
 0x50c   : > { %2834 = vperm.xlu1 %3887, %v3945_v55   ;;  %v2612_v55 = vld [vmem:[%s4642_s3 + $0xa8] sm:$0xff] }
 0x50d   : > { %2829 = vperm.xlu0 %3886, %v3947_v9   ;;  %v2611_v9 = vld [vmem:[%s4642_s3 + $0xa0] sm:$0xff] }
 0x510   : > { %2844 = vperm.xlu1 %3887, %v3949_v28  }
 0x511   : > { %2839 = vperm.xlu0 %3886, %v3951_v18  }
 0x54f   : > { %v2700_v53 = vpop.permute.xlu1 %2699 }
 0x550   : > { %v2849_v39 = vmul.f32 %v2700_v53, %v2593_v7  ;;  %v2690_v52 = vpop.permute.xlu0 %2689  ;;  %v2614_v53 = vld [vmem:[%s4642_s3 + $0xb8] sm:$0xff] }
 0x551   : > { %v2847_v44 = vmul.f32 %v2690_v52, %v2591_v47 }
 0x552   : > { %2881 = vst [vmem:[%s4642_s3 + $0x10] sm:$0xff] %v2849_v39  ;;  %v2613_v39 = vld [vmem:[%s4642_s3 + $0xb0] sm:$0xff] }
 0x553   : > { %2879 = vst [vmem:[%s4642_s3] sm:$0xff] %v2847_v44  ;;  %v2705_v50 = vpop.permute.xlu1 %2704 }
 0x554   : > { %v2850_v22 = vmul.f32 %v2705_v50, %v2594_v26  ;;  %v2695_v51 = vpop.permute.xlu0 %2694  ;;  %v2616_v50 = vld [vmem:[%s4642_s3 + $0xc8] sm:$0xff] }
 0x555   : > { %v2848_v20 = vmul.f32 %v2695_v51, %v2592_v54 }
 0x556   : > { %2882 = vst [vmem:[%s4642_s3 + $0x18] sm:$0xff] %v2850_v22  ;;  %v2615_v22 = vld [vmem:[%s4642_s3 + $0xc0] sm:$0xff] }
 0x557   : > { %2880 = vst [vmem:[%s4642_s3 + $0x8] sm:$0xff] %v2848_v20  ;;  %v2715_v14 = vpop.permute.xlu1 %2714 }
 0x558   : > { %v2852_v1 = vmul.f32 %v2715_v14, %v2596_v56  ;;  %v2710_v25 = vpop.permute.xlu0 %2709  ;;  %v2618_v14 = vld [vmem:[%s4642_s3 + $0xd8] sm:$0xff] }
 0x559   : > { %v2851_v13 = vmul.f32 %v2710_v25, %v2595_v10 }
 0x55a   : > { %2884 = vst [vmem:[%s4642_s3 + $0x28] sm:$0xff] %v2852_v1  ;;  %v2617_v1 = vld [vmem:[%s4642_s3 + $0xd0] sm:$0xff] }
 0x55b   : > { %2883 = vst [vmem:[%s4642_s3 + $0x20] sm:$0xff] %v2851_v13  ;;  %v2725_v30 = vpop.permute.xlu1 %2724 }
 0x55c   : > { %v2854_v36 = vmul.f32 %v2725_v30, %v2598_v3  ;;  %v2720_v24 = vpop.permute.xlu0 %2719  ;;  %v2620_v30 = vld [vmem:[%s4642_s3 + $0xe8] sm:$0xff] }
 0x55d   : > { %v2853_v33 = vmul.f32 %v2720_v24, %v2597_v59 }
 0x55e   : > { %2886 = vst [vmem:[%s4642_s3 + $0x38] sm:$0xff] %v2854_v36  ;;  %v2619_v36 = vld [vmem:[%s4642_s3 + $0xe0] sm:$0xff] }
 0x55f   : > { %2885 = vst [vmem:[%s4642_s3 + $0x30] sm:$0xff] %v2853_v33  ;;  %v2735_v29 = vpop.permute.xlu1 %2734 }
 0x560   : > { %v2856_v48 = vmul.f32 %v2735_v29, %v2600_v34  ;;  %v2730_v38 = vpop.permute.xlu0 %2729  ;;  %v2622_v29 = vld [vmem:[%s4642_s3 + $0xf8] sm:$0xff] }
 0x561   : > { %v2855_v5 = vmul.f32 %v2730_v38, %v2599_v21 }
 0x562   : > { %2888 = vst [vmem:[%s4642_s3 + $0x48] sm:$0xff] %v2856_v48  ;;  %v2621_v48 = vld [vmem:[%s4642_s3 + $0xf0] sm:$0xff] }
 0x563   : > { %2887 = vst [vmem:[%s4642_s3 + $0x40] sm:$0xff] %v2855_v5  ;;  %v2745_v62 = vpop.permute.xlu1 %2744 }
 0x564   : > { %v2858_v12 = vmul.f32 %v2745_v62, %v2602_v42  ;;  %v2740_v49 = vpop.permute.xlu0 %2739 }
 0x565   : > { %v2857_v61 = vmul.f32 %v2740_v49, %v2601_v6 }
 0x566   : > { %2890 = vst [vmem:[%s4642_s3 + $0x58] sm:$0xff] %v2858_v12 }
 0x567   : > { %2889 = vst [vmem:[%s4642_s3 + $0x50] sm:$0xff] %v2857_v61  ;;  %v2755_v57 = vpop.permute.xlu1 %2754 }
 0x568   : > { %v2860_v43 = vmul.f32 %v2755_v57, %v2604_v23  ;;  %v2750_v35 = vpop.permute.xlu0 %2749 }
 0x569   : > { %v2859_v41 = vmul.f32 %v2750_v35, %v2603_v58 }
 0x56a   : > { %2892 = vst [vmem:[%s4642_s3 + $0x68] sm:$0xff] %v2860_v43 }
 0x56b   : > { %2891 = vst [vmem:[%s4642_s3 + $0x60] sm:$0xff] %v2859_v41  ;;  %v2765_v19 = vpop.permute.xlu1 %2764 }
 0x56c   : > { %v2862_v31 = vmul.f32 %v2765_v19, %v2606_v63  ;;  %v2760_v2 = vpop.permute.xlu0 %2759 }
 0x56d   : > { %v2861_v11 = vmul.f32 %v2760_v2, %v2605_v37 }
 0x56e   : > { %2894 = vst [vmem:[%s4642_s3 + $0x78] sm:$0xff] %v2862_v31 }
 0x56f   : > { %2893 = vst [vmem:[%s4642_s3 + $0x70] sm:$0xff] %v2861_v11  ;;  %v2775_v45 = vpop.permute.xlu1 %2774 }
 0x570   : > { %v2864_v8 = vmul.f32 %v2775_v45, %v2608_v40  ;;  %v2770_v32 = vpop.permute.xlu0 %2769 }
 0x571   : > { %v2863_v46 = vmul.f32 %v2770_v32, %v2607_v4 }
 0x572   : > { %2896 = vst [vmem:[%s4642_s3 + $0x88] sm:$0xff] %v2864_v8 }
 0x573   : > { %2895 = vst [vmem:[%s4642_s3 + $0x80] sm:$0xff] %v2863_v46  ;;  %v2785_v60 = vpop.permute.xlu1 %2784 }
 0x574   : > { %v2866_v17 = vmul.f32 %v2785_v60, %v2610_v27  ;;  %v2780_v0 = vpop.permute.xlu0 %2779 }
 0x575   : > { %v2865_v15 = vmul.f32 %v2780_v0, %v2609_v16 }
 0x576   : > { %2898 = vst [vmem:[%s4642_s3 + $0x98] sm:$0xff] %v2866_v17 }
 0x577   : > { %2897 = vst [vmem:[%s4642_s3 + $0x90] sm:$0xff] %v2865_v15  ;;  %v2795_v28 = vpop.permute.xlu1 %2794 }
 0x578   : > { %v2868_v18 = vmul.f32 %v2795_v28, %v2612_v55  ;;  %v2790_v7 = vpop.permute.xlu0 %2789 }
 0x579   : > { %v2867_v47 = vmul.f32 %v2790_v7, %v2611_v9 }
 0x57a   : > { %2900 = vst [vmem:[%s4642_s3 + $0xa8] sm:$0xff] %v2868_v18 }
 0x57b   : > { %2899 = vst [vmem:[%s4642_s3 + $0xa0] sm:$0xff] %v2867_v47  ;;  %v2805_v52 = vpop.permute.xlu1 %2804 }
 0x57c   : > { %v2870_v44 = vmul.f32 %v2805_v52, %v2614_v53  ;;  %v2800_v26 = vpop.permute.xlu0 %2799 }
 0x57d   : > { %v2869_v54 = vmul.f32 %v2800_v26, %v2613_v39 }
 0x57e   : > { %2902 = vst [vmem:[%s4642_s3 + $0xb8] sm:$0xff] %v2870_v44 }
 0x57f   : > { %2901 = vst [vmem:[%s4642_s3 + $0xb0] sm:$0xff] %v2869_v54  ;;  %v2815_v51 = vpop.permute.xlu1 %2814 }
 0x580   : > { %v2872_v20 = vmul.f32 %v2815_v51, %v2616_v50  ;;  %v2810_v56 = vpop.permute.xlu0 %2809 }
 0x581   : > { %v2871_v10 = vmul.f32 %v2810_v56, %v2615_v22 }
 0x582   : > { %2904 = vst [vmem:[%s4642_s3 + $0xc8] sm:$0xff] %v2872_v20 }
 0x583   : > { %2903 = vst [vmem:[%s4642_s3 + $0xc0] sm:$0xff] %v2871_v10  ;;  %v2825_v25 = vpop.permute.xlu1 %2824 }
 0x584   : > { %v2874_v13 = vmul.f32 %v2825_v25, %v2618_v14  ;;  %v2820_v3 = vpop.permute.xlu0 %2819 }
 0x585   : > { %v2873_v59 = vmul.f32 %v2820_v3, %v2617_v1 }
 0x586   : > { %2906 = vst [vmem:[%s4642_s3 + $0xd8] sm:$0xff] %v2874_v13 }
 0x587   : > { %2905 = vst [vmem:[%s4642_s3 + $0xd0] sm:$0xff] %v2873_v59  ;;  %v2835_v24 = vpop.permute.xlu1 %2834 }
 0x588   : > { %v2876_v33 = vmul.f32 %v2835_v24, %v2620_v30  ;;  %v2830_v34 = vpop.permute.xlu0 %2829 }
 0x589   : > { %v2875_v21 = vmul.f32 %v2830_v34, %v2619_v36 }
 0x58a   : > { %2908 = vst [vmem:[%s4642_s3 + $0xe8] sm:$0xff] %v2876_v33 }
 0x58b   : > { %2907 = vst [vmem:[%s4642_s3 + $0xe0] sm:$0xff] %v2875_v21  ;;  %v2845_v38 = vpop.permute.xlu1 %2844 }
 0x58c   : > { %v2878_v5 = vmul.f32 %v2845_v38, %v2622_v29  ;;  %v2840_v42 = vpop.permute.xlu0 %2839 }
 0x58d   : > { %v2877_v6 = vmul.f32 %v2840_v42, %v2621_v48 }
 0x58e   : > { %2910 = vst [vmem:[%s4642_s3 + $0xf8] sm:$0xff] %v2878_v5 }
 0x58f   : > { %2909 = vst [vmem:[%s4642_s3 + $0xf0] sm:$0xff] %v2877_v6 }
 0x590 PF: > { %s6576_s5 = sld [smem:[#allocation26_spill]]  ;;  %s2929_s13 = sshll.u32 %s4642_s3, 4  ;;  %s6076_s13 = int_to_ptr.vmem [resolvable:$true] %s2929_s13 }
 0x591   : > { %s6577_s1 = sld [smem:[#allocation25_spill]]  ;;  %s2912_s11 = scalar_lea.sflag [#allocation7], %s4614_s0 }
 0x592   : > { %s6578_s21 = sld [smem:[#allocation27_spill]]  ;;  %s4064_s4 = scalar_lea.vmem %s6076_s13, 4096 }
 0x593   : > { %s6579_s26 = sld [smem:[#allocation113_spill]]  ;;  %p4065_p13 = scmp.ne.s32.totalorder %s6076_s13, %s4064_s4 }
 0x594   : > { %p6581_p7 = scmp.ne.s32.totalorder %s6331_s27, 0  ;;  %s4262_s28 = smov [#allocation13]  }
 0x595   : > { %s4068_s3 = sshll.u32 %s4262_s28, 4  ;;  %s4069_s3 = int_to_ptr.vmem [resolvable:$false] %s4068_s3 }
 0x596   : > { %s3199_s15 = sshll.u32 %s6576_s5, 5  ;;  %p4066_p3 = pnand %p4065_p13, %p6581_p7 }
 0x597   : > { %s3200_s16 = sshll.u32 %s6577_s1, 6  ;;  %s4070_s12 = scalar_lea.vmem %s4069_s3, 8192 }
 0x598   : > { %s3201_s9 = sshll.u32 %s6578_s21, 8  ;;  %s2924_s20 = sadd.s32 %s3200_s16, %s3199_s15 }
 0x599   : > { %s2926_s17 = sadd.s32 %s3201_s9, %s2924_s20  ;;  %s6580_s7 = smov %s6579_s26 }
 0x59a   : > { %s3202_s24 = sshll.u32 %s2926_s17, 7  ;;  %p4067_p8 = pneg %p4066_p3 }
 0x59b   : > { %s6081_s18 = scalar_lea.hbm %s6579_s26, %s3202_s24  ;;  %p4071_p11 = scmp.lt.s32.totalorder %s6076_s13, %s4069_s3 }
 0x59c   : > { %p4072_p4 = scmp.lt.s32.totalorder %s4070_s12, %s4064_s4 }
 0x59e   : > { %p4073_p6 = por %p4072_p4, %p4071_p11 }
 0x5a0   : > { %p4074_p0 = pnand %p4073_p6, %p4067_p8 }
 0x5a2   : > { %4077 = shalt.err (!%p4074_p0)
}
 0x5a3   : > { %s4078_s19 = scalar_lea.hbm %s6081_s18, 4096  ;;  %s4082_s21 = scalar_lea.hbm %s6580_s7, 65536 }
 0x5a4   : > { %p4079_p10 = scmp.ne.s32.totalorder %s6081_s18, %s4078_s19  ;;  %p4083_p5 = scmp.lt.s32.totalorder %s6081_s18, %s6580_s7 }
 0x5a5   : > { %p4084_p2 = scmp.lt.s32.totalorder %s4082_s21, %s4078_s19 }
 0x5a6   : > { %p4080_p12 = pnand %p4079_p10, %p6581_p7 }
 0x5a7   : > { %p4085_p9 = por %p4084_p2, %p4083_p5 }
 0x5a8   : > { %p4081_p1 = pneg %p4080_p12 }
 0x5aa   : > { %p4086_p13 = pnand %p4085_p9, %p4081_p1 }
 0x5ac   : > { %4089 = shalt.err (!%p4086_p13)
}
 0x5ad   : > { %s4263_s9 = smov 128   ;;  %s4264_s20 = smov 8  }
 0x5ae   : > { %3501 = dma.vmem_to_hbm [thread:$0]  (%p6581_p7), %s6076_s13, 4096, %s6081_s18, %s2912_s11, %s4263_s9, %s4263_s9, %s4264_s20  }
 0x5af PF: > { %s6582_s17 = sld [smem:[#allocation23_spill]]  ;;  %p3521_p3 = scmp.ge.s32.totalorder %s4248_s6, 2 }
 0x5b0   : > { %s6583_s24 = sld [smem:[#allocation38_spill]] }
 0x5b5   : > { %s2944_s14 = sand.u32 1, %s6582_s17  }
 0x5b6   : > { %p6584_p8 = scmp.ne.s32.totalorder %s6583_s24, 0  ;;  %s2945_s25 = scalar_lea.sflag [#allocation7], %s2944_s14 }
 0x5b8   : > { %p3517_p11 = pnand %p3521_p3, %p6584_p8 }
 0x5ba   : > { %p3518_p4 = pneg %p3517_p11 }
 0x5bc   : > { %4175 = dma.done.wait (%p3518_p4), %s2945_s25, 4096  }
 0x5bd   : > { %4177 = vsyncadd (%p3518_p4), %s2945_s25, 4294963200  ;;  %s26_s6 = sadd.s32 1, %s4248_s6   ;;  %s6586_s15 = sld [smem:[#allocation19_spill]] }
 0x5be   : > { %p6111_p6 = scmp.ge.s32.totalorder %s26_s6, 34   ;;  %s6587_s16 = sld [smem:[#allocation20_spill]] }
 0x5bf   : > { %s6588_s18 = sld [smem:[#allocation21_spill]]  ;;  %s6598_s17 = smov %s4581_s8 }
 0x5c0   : > { %s6589_s19 = sld [smem:[#allocation22_spill]]  ;;  %s6600_s21 = smov %s4208_s22 }
 0x5c1   : > { %s6590_s20 = sld [smem:[#allocation35_spill]]  ;;  %s6601_s22 = smov %s4212_s23 }
 0x5c2   : > { %s6591_s27 = sld [smem:[#allocation36_spill]]  ;;  %s6603_s25 = smov %s4236_s29 }
 0x5c3   : > { %s6592_s24 = sld [smem:[#allocation28_spill]]  ;;  %s6604_s26 = smov %s4240_s30 }
 0x5c4   : > { %s6593_s0 = sld [smem:[#allocation29_spill]] }
 0x5c5   : > { %s6594_s28 = sld [smem:[#allocation30_spill]] }
 0x5c6   : > { %s6595_s13 = sld [smem:[#allocation31_spill]] }
 0x5c7   : > { %s6596_s11 = sld [smem:[#allocation32_spill]] }
 0x5c8   : > { %s6597_s5 = sld [smem:[#allocation34_spill]]  ;;  %s6602_s23 = smov %s6591_s27 }
 0x5c9   :  { %25 = sbr.rel (!%p6111_p6) target bundleno = 21 (0x15), region = 127 }
 0x5ca   : > { %s6605_s27 = smov %s6593_s0 }
 0x5cc   : > { %s6606_s29 = smov %s6595_s13 }
 0x5cd   : > { %s6607_s30 = smov %s6596_s11 }
 0x5ce   :  { %2950 = vsyncpa [#allocation6], 1 }
 0x5cf   :  { %2952 = vsyncpa [#allocation6 + $0x1], 1 }
 0x5d0   :  { %2953 = vsyncpa [#allocation9], 1 }
 0x5d1   :  { %2955 = vsyncpa [#allocation9 + $0x1], 1 }
 0x5d2   :  { %2956 = vsyncpa [#allocation12], 1 }
 0x5d3   :  { %2958 = vsyncpa [#allocation12 + $0x1], 1 }
 0x5d4   :  { %2959 = vsyncpa [#allocation7], 1 }
 0x5d5   :  { %2961 = vsyncpa [#allocation7 + $0x1], 1 }

</bundles_post_ra>
